<compile_context>
chip_gen: v6e
topology: v6e:2x2x1
jax: 0.10.0
libtpu: 0.0.40
codegen_flags: <defaults>
</compile_context>

<pallas_src>
import math
import functools

import jax
import jax.numpy as jnp
from jax import lax
from jax.experimental import pallas as pl
from jax.experimental.pallas import tpu as pltpu

N_HEADS = 2
LN_EPS = 1e-4  # GlowTTS-style LayerNorm eps.  TODO(synk): confirm vs nn.LayerNorm 1e-5.


def _bf16(x):
    return x.astype(jnp.bfloat16)


# ----------------------------------------------------------------------------
# Fused Pallas kernels operating on the flat channel-major layout (C, B*T)
# ----------------------------------------------------------------------------


def _prenet_kernel(x_ref, pos_ref, m_ref, w1_ref, b1_ref, w2_ref, b2_ref, o_ref):
    """PreNet (pointwise conv -> relu -> pointwise conv + residual) fused with
    the positional-encoding add that precedes the encoder."""
    x = x_ref[...]                      # (C, B*T) f32
    m = m_ref[...]                      # (1, B*T)
    h = jnp.dot(w1_ref[...], _bf16(x * m),
                preferred_element_type=jnp.float32) + b1_ref[...]
    h = jnp.maximum(h, 0.0)
    h = jnp.dot(w2_ref[...], _bf16(h * m),
                preferred_element_type=jnp.float32) + b2_ref[...]
    o_ref[...] = ((x + h) * m + pos_ref[...]) * m


def pre_net_flat(x_flat, pos_flat, m_flat, p):
    C, BT = x_flat.shape
    return pl.pallas_call(
        _prenet_kernel,
        out_shape=jax.ShapeDtypeStruct((C, BT), jnp.float32),
    )(x_flat, pos_flat, m_flat, p["w1"], p["b1"], p["w2"], p["b2"])


def _encoder_layer_kernel(x_ref, m_ref, am_ref, wqkv_ref, bqkv_ref, wo_ref, bo_ref,
                          g1_ref, be1_ref, wf1_ref, bf1_ref, wf2_ref, bf2_ref,
                          g2_ref, be2_ref, o_ref, *, n_heads, d_head, scale):
    """One fused transformer encoder layer on the flat (C, B*T) layout."""
    x = x_ref[...]                      # (C, B*T) f32
    m = m_ref[...]                      # (1, B*T)
    am = am_ref[...]                    # (B*T, B*T) block-diag batch & key-valid mask
    C = x.shape[0]

    # --- multi-head self-attention (one lane-dense QKV matmul) ---
    qkv = jnp.dot(wqkv_ref[...], _bf16(x * m),
                  preferred_element_type=jnp.float32) + bqkv_ref[...]   # (3C, B*T)
    q, k, v = qkv[:C], qkv[C:2 * C], qkv[2 * C:]

    heads = []
    for h in range(n_heads):            # static unroll (n_heads is tiny)
        rows = slice(h * d_head, (h + 1) * d_head)
        qh, kh, vh = q[rows], k[rows], v[rows]                          # (d, B*T)
        s = lax.dot_general(_bf16(qh), _bf16(kh), (((0,), (0,)), ((), ())),
                            preferred_element_type=jnp.float32) * scale  # (BT, BT)
        s = s + (am - 1.0) * 1e9        # mask padded keys & cross-batch entries
        s = s - jnp.max(s, axis=-1, keepdims=True)
        p = jnp.exp(s)
        p = p * pl.reciprocal(jnp.sum(p, axis=-1, keepdims=True), approx=True)
        heads.append(lax.dot_general(_bf16(vh), _bf16(p), (((1,), (1,)), ((), ())),
                                     preferred_element_type=jnp.float32))  # (d, BT)
    attn = jnp.concatenate(heads, axis=0)                               # (C, B*T)

    o = jnp.dot(wo_ref[...], _bf16(attn),
                preferred_element_type=jnp.float32) + bo_ref[...]
    x = (x + o) * m
    # LayerNorm over the channel axis
    mu = jnp.mean(x, axis=0, keepdims=True)
    var = jnp.mean((x - mu) ** 2, axis=0, keepdims=True)
    x = (x - mu) * lax.rsqrt(var + LN_EPS) * g1_ref[...] + be1_ref[...]

    # --- feed-forward ---
    hdn = jnp.dot(wf1_ref[...], _bf16(x * m),
                  preferred_element_type=jnp.float32) + bf1_ref[...]
    hdn = jnp.maximum(hdn, 0.0)
    hdn = jnp.dot(wf2_ref[...], _bf16(hdn * m),
                  preferred_element_type=jnp.float32) + bf2_ref[...]
    x = (x + hdn) * m
    mu = jnp.mean(x, axis=0, keepdims=True)
    var = jnp.mean((x - mu) ** 2, axis=0, keepdims=True)
    x = (x - mu) * lax.rsqrt(var + LN_EPS) * g2_ref[...] + be2_ref[...]

    o_ref[...] = x * m


def encoder_layer_flat(x_flat, m_flat, attn_bias, p, *, n_heads):
    C, BT = x_flat.shape
    d_head = C // n_heads
    kern = functools.partial(_encoder_layer_kernel, n_heads=n_heads,
                             d_head=d_head, scale=1.0 / math.sqrt(d_head))
    return pl.pallas_call(
        kern,
        out_shape=jax.ShapeDtypeStruct((C, BT), jnp.float32),
    )(x_flat, m_flat, attn_bias,
      p["w_qkv"], p["b_qkv"], p["w_o"], p["b_o"], p["ln1_g"], p["ln1_b"],
      p["w_ff1"], p["b_ff1"], p["w_ff2"], p["b_ff2"], p["ln2_g"], p["ln2_b"])


def _heads_kernel(x_ref, m_ref, wmu_ref, bmu_ref, dw1_ref, db1_ref, dw2_ref, db2_ref,
                  mu_ref, dur_ref):
    """proj_mu and the duration predictor fused into one kernel."""
    x = x_ref[...]                      # (C, B*T)
    m = m_ref[...]
    mu_ref[...] = jnp.dot(wmu_ref[...], _bf16(x),
                          preferred_element_type=jnp.float32) + bmu_ref[...]
    h = jnp.dot(dw1_ref[...], _bf16(x * m),
                preferred_element_type=jnp.float32) + db1_ref[...]
    h = jnp.maximum(h, 0.0)
    d = jnp.dot(dw2_ref[...], _bf16(h * m),
                preferred_element_type=jnp.float32) + db2_ref[...]
    dur_ref[...] = d * m


def project_heads_flat(x_flat, m_flat, params):
    C, BT = x_flat.shape
    n_mel = params["proj_mu_w"].shape[0]
    va = params["variance_adopter"]
    return pl.pallas_call(
        _heads_kernel,
        out_shape=(jax.ShapeDtypeStruct((n_mel, BT), jnp.float32),
                   jax.ShapeDtypeStruct((1, BT), jnp.float32)),
    )(x_flat, m_flat, params["proj_mu_w"], params["proj_mu_b"],
      va["dp_w1"], va["dp_b1"], va["dp_w2"], va["dp_b2"])


def _glow_flow_kernel(z_ref, m_ref, anb_ref, anl_ref, invw_ref,
                      cw1_ref, cb1_ref, cw2_ref, cb2_ref, zo_ref, ls_ref):
    """One Glow flow: ActNorm + invertible 1x1 conv + affine coupling, fused."""
    m = m_ref[...]                      # (1, B*T_sq)
    z = z_ref[...]                      # (C_sq, B*T_sq)
    c_half = z.shape[0] // 2
    # ActNorm
    z = (anb_ref[...] + jnp.exp(anl_ref[...]) * z) * m
    # Invertible 1x1 conv (full channel mixing) — kept f32 to match slogdet
    z = jnp.dot(invw_ref[...], z, preferred_element_type=jnp.float32) * m
    # Affine coupling.  TODO(synk): reference WN coupling net simplified to
    #                   two pointwise convs with tanh (WN source not given).
    z0, z1 = z[:c_half], z[c_half:]
    h = jnp.dot(cw1_ref[...], _bf16(z0 * m),
                preferred_element_type=jnp.float32) + cb1_ref[...]
    h = jnp.tanh(h)
    h = jnp.dot(cw2_ref[...], _bf16(h * m),
                preferred_element_type=jnp.float32) + cb2_ref[...]
    mean, logs = h[:c_half], h[c_half:]
    z1 = (mean + jnp.exp(logs) * z1) * m
    zo_ref[...] = jnp.concatenate([z0, z1], axis=0)
    ls_ref[...] = logs * m              # per-batch logdet sum done outside


def glow_flow_flat(z_flat, m_flat, flow):
    C_sq, BT = z_flat.shape
    return pl.pallas_call(
        _glow_flow_kernel,
        out_shape=(jax.ShapeDtypeStruct((C_sq, BT), jnp.float32),
                   jax.ShapeDtypeStruct((C_sq // 2, BT), jnp.float32)),
    )(z_flat, m_flat, flow["an_bias"], flow["an_logs"], flow["inv_w"],
      flow["cp_w1"], flow["cp_b1"], flow["cp_w2"], flow["cp_b2"])


# ----------------------------------------------------------------------------
# Per-batch Pallas kernels (grid=(B,), batch axis parallel across cores)
# ----------------------------------------------------------------------------


def _logp_kernel(xmu_ref, xlogs_ref, z_ref, o_ref):
    x_mu = xmu_ref[0]                   # (T_x, n_mel)  (pre-transposed)
    x_logs = xlogs_ref[0]
    z = z_ref[0]                        # (n_mel, T_y)
    x_s_sq_r = jnp.exp(-2.0 * x_logs)
    # per-T_x terms via lane reductions (XLU) instead of degenerate N=1 MXU pushes
    logp1 = jnp.sum(-0.5 * math.log(2.0 * math.pi) - x_logs, axis=1, keepdims=True)
    logp4 = jnp.sum(-0.5 * x_mu * x_mu * x_s_sq_r, axis=1, keepdims=True)
    logp2 = jnp.dot(x_s_sq_r, -0.5 * z * z, preferred_element_type=jnp.float32)
    logp3 = jnp.dot(x_mu * x_s_sq_r, z, preferred_element_type=jnp.float32)
    o_ref[0] = logp2 + logp3 + logp1 + logp4


def compute_logp(x_mu_t, x_logs_t, z):
    B, T_x, n_mel = x_mu_t.shape
    T_y = z.shape[2]
    return pl.pallas_call(
        _logp_kernel,
        out_shape=jax.ShapeDtypeStruct((B, T_x, T_y), jnp.float32),
        grid=(B,),
        in_specs=[pl.BlockSpec((1, T_x, n_mel), lambda i: (i, 0, 0)),
                  pl.BlockSpec((1, T_x, n_mel), lambda i: (i, 0, 0)),
                  pl.BlockSpec((1, n_mel, T_y), lambda i: (i, 0, 0))],
        out_specs=pl.BlockSpec((1, T_x, T_y), lambda i: (i, 0, 0)),
        compiler_params=pltpu.CompilerParams(dimension_semantics=("parallel",)),
    )(x_mu_t, x_logs_t, z)


def _length_regulate_kernel(xmu_ref, xlogs_ref, path_ref, zmu_ref, zlogs_ref):
    p = path_ref[0]
    zmu_ref[0] = jnp.dot(xmu_ref[0], p, preferred_element_type=jnp.float32)
    zlogs_ref[0] = jnp.dot(xlogs_ref[0], p, preferred_element_type=jnp.float32)


def length_regulate(x_mu, x_logs, path):
    B, n_mel, T_x = x_mu.shape
    T_y = path.shape[2]
    spec_in = pl.BlockSpec((1, n_mel, T_x), lambda i: (i, 0, 0))
    spec_path = pl.BlockSpec((1, T_x, T_y), lambda i: (i, 0, 0))
    spec_out = pl.BlockSpec((1, n_mel, T_y), lambda i: (i, 0, 0))
    return pl.pallas_call(
        _length_regulate_kernel,
        out_shape=(jax.ShapeDtypeStruct((B, n_mel, T_y), jnp.float32),
                   jax.ShapeDtypeStruct((B, n_mel, T_y), jnp.float32)),
        grid=(B,),
        in_specs=[spec_in, spec_in, spec_path],
        out_specs=(spec_out, spec_out),
        compiler_params=pltpu.CompilerParams(dimension_semantics=("parallel",)),
    )(x_mu, x_logs, path)


# ----------------------------------------------------------------------------
# JAX glue (masks, embeddings, Glow squeeze/logdet, monotonic alignment search)
# ----------------------------------------------------------------------------


def sequence_mask(length, max_length):
    return jnp.arange(max_length)[None, :] < length[:, None]


def embedding_flat(phoneme, a1, f2, p):
    e = jnp.concatenate(
        [p["phoneme"][phoneme], p["a1"][a1], p["f2"][f2]], axis=-1)   # (B, T, C)
    B, T, C = e.shape
    return e.reshape(B * T, C).T                                      # (C, B*T)


def rel_positional_encoding_flat(C, T, B):
    # TODO(synk): true ESPnet-style relative positional attention not given;
    #             simplified to an absolute sinusoidal encoding added once.
    pos = jnp.arange(T, dtype=jnp.float32)[:, None]
    div = jnp.exp(jnp.arange(0, C, 2, dtype=jnp.float32) * (-math.log(10000.0) / C))
    pe = jnp.zeros((T, C), jnp.float32)
    pe = pe.at[:, 0::2].set(jnp.sin(pos * div))
    pe = pe.at[:, 1::2].set(jnp.cos(pos * div))
    pe_ct = pe.T                                                      # (C, T)
    return jnp.broadcast_to(pe_ct[:, None, :], (C, B, T)).reshape(C, B * T)


def glow_forward(y, y_mask, p, n_sqz=2):
    """Glow decoder forward: y -> (z, log|df/dz|, z_mask)."""
    B, C, T = y.shape
    T_trim = (T // n_sqz) * n_sqz
    T_sq = T_trim // n_sqz
    C_sq = C * n_sqz
    y = y[:, :, :T_trim]
    y_mask = y_mask[:, :, :T_trim]
    # squeeze
    y_s = y.reshape(B, C, T_sq, n_sqz)
    y_s = jnp.transpose(y_s, (0, 3, 1, 2)).reshape(B, C_sq, T_sq)
    m_s = y_mask[:, :, n_sqz - 1::n_sqz]                              # (B, 1, T_sq)
    z = y_s * m_s
    # flatten to (C_sq, B*T_sq) for lane-dense fused flow kernels
    z_flat = jnp.transpose(z, (1, 0, 2)).reshape(C_sq, B * T_sq)
    m_flat = jnp.transpose(m_s, (1, 0, 2)).reshape(1, B * T_sq)

    logdet = jnp.zeros((B,), jnp.float32)
    mask_sum = jnp.sum(m_s, axis=(1, 2))                              # (B,)
    for flow in p["flows"]:
        z_flat, ls = glow_flow_flat(z_flat, m_flat, flow)
        logdet = logdet + jnp.sum(flow["an_logs"]) * mask_sum                 # ActNorm
        logdet = logdet + jnp.linalg.slogdet(flow["inv_w"])[1] * mask_sum     # InvConv
        logdet = logdet + jnp.sum(ls.reshape(C_sq // 2, B, T_sq), axis=(0, 2))  # coupling
    # unflatten + unsqueeze
    z = jnp.transpose(z_flat.reshape(C_sq, B, T_sq), (1, 0, 2))
    z_u = z.reshape(B, n_sqz, C, T_sq)
    z_u = jnp.transpose(z_u, (0, 2, 3, 1)).reshape(B, C, T_trim)
    m_u = jnp.repeat(m_s, n_sqz, axis=2)
    return z_u * m_u, logdet, m_u


def maximum_path(logp, mask):
    """Monotonic alignment search (GlowTTS maximum_path), vectorized over batch.
    logp, mask: (B, T_x, T_y) -> binary path (B, T_x, T_y)."""
    # TODO(synk): inherently sequential DP; implemented with lax.scan in JAX.
    B, T_x, T_y = logp.shape
    neg = jnp.float32(-1e9)
    value_in = logp * mask
    t_x_len = jnp.sum(mask[:, :, 0], axis=1).astype(jnp.int32)
    t_y_len = jnp.sum(mask[:, 0, :], axis=1).astype(jnp.int32)
    idx = jnp.arange(T_x)

    cols = jnp.moveaxis(value_in, 2, 0)  # (T_y, B, T_x)

    def fwd(carry, col):
        prev, j = carry
        v_cur = jnp.where(idx[None, :] == j, neg, prev)
        left0 = jnp.where(j == 0, jnp.float32(0.0), neg)
        v_prev = jnp.concatenate(
            [jnp.broadcast_to(left0, (B, 1)), prev[:, :-1]], axis=1)
        new = jnp.maximum(v_cur, v_prev) + col
        return (new, j + 1), new

    (_, _), vcols = lax.scan(fwd, (jnp.full((B, T_x), neg), jnp.int32(0)), cols)
    value = jnp.moveaxis(vcols, 0, 2)  # (B, T_x, T_y)

    js = jnp.arange(T_y - 1, -1, -1, dtype=jnp.int32)

    def bwd(index, j):
        active = j < t_y_len
        row = jax.nn.one_hot(index, T_x, dtype=logp.dtype) * active[:, None].astype(logp.dtype)
        prev_col = lax.dynamic_slice_in_dim(value, jnp.maximum(j - 1, 0), 1, axis=2)[:, :, 0]
        v_at = jnp.take_along_axis(prev_col, index[:, None], axis=1)[:, 0]
        v_left = jnp.take_along_axis(prev_col, jnp.maximum(index - 1, 0)[:, None], axis=1)[:, 0]
        dec = (index != 0) & ((index == j) | (v_at < v_left)) & active
        return index - dec.astype(jnp.int32), row

    _, rows = lax.scan(bwd, t_x_len - 1, js)  # rows: (T_y, B, T_x), j descending
    path = jnp.moveaxis(rows[::-1], 0, 2)     # (B, T_x, T_y)
    return path


# ----------------------------------------------------------------------------
# Full TTSModel forward
# ----------------------------------------------------------------------------


def tts_forward(params, phoneme, a1, f2, x_length, y, y_length):
    B, T_x = phoneme.shape
    n_mel, T_y = y.shape[1], y.shape[2]

    x_flat = embedding_flat(phoneme, a1, f2, params["emb"])           # (C, B*T_x)
    C = x_flat.shape[0]
    pos_flat = rel_positional_encoding_flat(C, T_x, B)

    x_mask_bt = sequence_mask(x_length, T_x).astype(jnp.float32)      # (B, T_x)
    z_mask_bt = sequence_mask(y_length, T_y).astype(jnp.float32)
    x_mask = x_mask_bt[:, None, :]                                    # (B, 1, T_x)
    z_mask = z_mask_bt[:, None, :]
    xm_flat = x_mask_bt.reshape(1, B * T_x)                           # (1, B*T_x)

    # block-diagonal attention mask: same batch AND valid key
    bid = jnp.repeat(jnp.arange(B), T_x)
    attn_bias = (bid[:, None] == bid[None, :]).astype(jnp.float32) * xm_flat

    # pre-net (+pos add) and encoder: one fused Pallas kernel per stage / layer
    x_flat = pre_net_flat(x_flat, pos_flat, xm_flat, params["pre_net"])
    for layer_p in params["encoder"]["layers"]:
        x_flat = encoder_layer_flat(x_flat, xm_flat, attn_bias, layer_p,
                                    n_heads=N_HEADS)

    # proj_mu + duration predictor heads (fused)
    x_mu_flat, dur_flat = project_heads_flat(x_flat, xm_flat, params)
    x_mu = jnp.transpose(x_mu_flat.reshape(n_mel, B, T_x), (1, 0, 2))   # (B,n_mel,T_x)
    x_logs = jnp.zeros_like(x_mu)
    dur_pred = jnp.transpose(dur_flat.reshape(1, B, T_x), (1, 0, 2))    # (B,1,T_x)

    # Glow decoder
    z, log_df_dz, z_mask = glow_forward(y, z_mask, params["decoder"])   # (B,n_mel,T_y')

    attn_mask = x_mask[:, :, :, None] * z_mask[:, :, None, :]           # (B,1,T_x,T_y')

    # torch.no_grad() block: alignment
    logp = lax.stop_gradient(
        compute_logp(jnp.transpose(x_mu, (0, 2, 1)),
                     jnp.transpose(x_logs, (0, 2, 1)), z))              # (B,T_x,T_y')
    path = lax.stop_gradient(maximum_path(logp, attn_mask[:, 0]))[:, None]

    # variance adopter: length regulation (duration predictor already computed)
    z_mu, z_logs = length_regulate(x_mu, x_logs, path[:, 0])
    z_mu = z_mu[:, :, :z.shape[-1]]
    z_logs = z_logs[:, :, :z.shape[-1]]
    duration = jnp.sum(path, axis=-1)                                   # (B,1,T_x)

    return ((z_mu, z_logs), (z, log_df_dz), (dur_pred, duration), (x_mask, z_mask))


# ----------------------------------------------------------------------------
# Deterministic parameter initialization (matmul weights stored in bf16)
# ----------------------------------------------------------------------------


def init_params(key, *, C, n_mel, ffn, n_layers, n_flows, n_sqz, dec_hidden,
                vocab_ph, vocab_a1, vocab_f2):
    state = [key]

    def nxt():
        state[0], k = jax.random.split(state[0])
        return k

    def w(shape, scale=0.1, dtype=jnp.float32):
        return (scale * jax.random.normal(nxt(), shape, jnp.float32)).astype(dtype)

    def wb(shape, scale=0.1):
        return w(shape, scale, jnp.bfloat16)

    def bcol(n):
        return jnp.zeros((n, 1), jnp.float32)

    C3 = C // 3
    C_sq = n_mel * n_sqz

    params = {
        "emb": {
            "phoneme": w((vocab_ph, C3)),
            "a1": w((vocab_a1, C3)),
            "f2": w((vocab_f2, C3)),
        },
        "pre_net": {"w1": wb((C, C)), "b1": bcol(C),
                    "w2": wb((C, C)), "b2": bcol(C)},
        "encoder": {"layers": []},
        "proj_mu_w": wb((n_mel, C)),
        "proj_mu_b": bcol(n_mel),
        "variance_adopter": {
            "dp_w1": wb((C, C)), "dp_b1": bcol(C),
            "dp_w2": wb((1, C)), "dp_b2": bcol(1),
        },
        "decoder": {"flows": []},
    }
    for _ in range(n_layers):
        params["encoder"]["layers"].append({
            "w_qkv": wb((3 * C, C)), "b_qkv": bcol(3 * C),
            "w_o": wb((C, C)), "b_o": bcol(C),
            "ln1_g": jnp.ones((C, 1), jnp.float32), "ln1_b": bcol(C),
            "w_ff1": wb((ffn, C)), "b_ff1": bcol(ffn),
            "w_ff2": wb((C, ffn)), "b_ff2": bcol(C),
            "ln2_g": jnp.ones((C, 1), jnp.float32), "ln2_b": bcol(C),
        })
    for _ in range(n_flows):
        params["decoder"]["flows"].append({
            "an_bias": w((C_sq, 1), 0.01),
            "an_logs": w((C_sq, 1), 0.01),
            "inv_w": jnp.eye(C_sq, dtype=jnp.float32) + w((C_sq, C_sq), 0.02),
            "cp_w1": wb((dec_hidden, C_sq // 2)), "cp_b1": bcol(dec_hidden),
            "cp_w2": wb((C_sq, dec_hidden), 0.01), "cp_b2": bcol(C_sq),
        })
    return params


# ----------------------------------------------------------------------------
# Main
# ----------------------------------------------------------------------------

if __name__ == "__main__":
    B, T_x, T_y = 2, 8, 16
    C, n_mel = 48, 16

    key = jax.random.PRNGKey(0)
    k_ph, k_a1, k_f2, k_y, k_p = jax.random.split(key, 5)

    phoneme = jax.random.randint(k_ph, (B, T_x), 0, 40, dtype=jnp.int32)
    a1 = jax.random.randint(k_a1, (B, T_x), 0, 10, dtype=jnp.int32)
    f2 = jax.random.randint(k_f2, (B, T_x), 0, 10, dtype=jnp.int32)
    x_length = jnp.array([8, 6], dtype=jnp.int32)
    y = jax.random.normal(k_y, (B, n_mel, T_y), jnp.float32)
    y_length = jnp.array([16, 12], dtype=jnp.int32)

    params = init_params(
        k_p, C=C, n_mel=n_mel, ffn=96, n_layers=2, n_flows=2, n_sqz=2,
        dec_hidden=32, vocab_ph=40, vocab_a1=10, vocab_f2=10)

    fwd = jax.jit(tts_forward)
    out = fwd(params, phoneme, a1, f2, x_length, y, y_length)
    out = jax.tree_util.tree_map(lambda t: t.block_until_ready(), out)

    (z_mu, z_logs), (z, log_df_dz), (dur_pred, duration), (x_mask, z_mask) = out
    assert z_mu.shape == (B, n_mel, T_y)
    assert z_logs.shape == (B, n_mel, T_y)
    assert z.shape == (B, n_mel, T_y)
    assert log_df_dz.shape == (B,)
    assert dur_pred.shape == (B, 1, T_x)
    assert duration.shape == (B, 1, T_x)
    assert x_mask.shape == (B, 1, T_x) and z_mask.shape == (B, 1, T_y)
    assert all(bool(jnp.all(jnp.isfinite(t))) for t in
               (z_mu, z_logs, z, log_df_dz, dur_pred, duration))
    print("KERNEL_OK")
</pallas_src>

<mosaic_0001>
module attributes {stable_mosaic.version = 11 : i64} {
  func.func @_prenet_kernel(%arg0: memref<48x16xf32, #tpu.memory_space<vmem>>, %arg1: memref<48x16xf32, #tpu.memory_space<vmem>>, %arg2: memref<1x16xf32, #tpu.memory_space<vmem>>, %arg3: memref<48x48xbf16, #tpu.memory_space<vmem>>, %arg4: memref<48x1xf32, #tpu.memory_space<vmem>>, %arg5: memref<48x48xbf16, #tpu.memory_space<vmem>>, %arg6: memref<48x1xf32, #tpu.memory_space<vmem>>, %arg7: memref<48x16xf32, #tpu.memory_space<vmem>>) attributes {dimension_semantics = [], scalar_prefetch = 0 : i64, scratch_operands = 0 : i64, tpu.core_type = #tpu.core_type<tc>} {
    %c0 = arith.constant 0 : index
    %c0_0 = arith.constant 0 : index
    %0 = vector.load %arg0[%c0, %c0_0] : memref<48x16xf32, #tpu.memory_space<vmem>>, vector<48x16xf32>
    %c0_1 = arith.constant 0 : index
    %c0_2 = arith.constant 0 : index
    %1 = vector.load %arg2[%c0_1, %c0_2] : memref<1x16xf32, #tpu.memory_space<vmem>>, vector<1x16xf32>
    %c0_3 = arith.constant 0 : index
    %c0_4 = arith.constant 0 : index
    %2 = vector.load %arg3[%c0_3, %c0_4] : memref<48x48xbf16, #tpu.memory_space<vmem>>, vector<48x48xbf16>
    %3 = vector.broadcast %1 : vector<1x16xf32> to vector<48x16xf32>
    %4 = arith.mulf %0, %3 : vector<48x16xf32>
    %5 = arith.truncf %4 : vector<48x16xf32> to vector<48x16xbf16>
    %cst = arith.constant dense<0.000000e+00> : vector<48x16xf32>
    %6 = tpu.matmul %2, %5, %cst {dimension_numbers = #tpu.dot_dimension_numbers<[1], [0], [0], [1], [0, 0, 1, 1], [], []>} : vector<48x48xbf16>, vector<48x16xbf16>, vector<48x16xf32> -> vector<48x16xf32>
    %c0_5 = arith.constant 0 : index
    %c0_6 = arith.constant 0 : index
    %7 = vector.load %arg4[%c0_5, %c0_6] : memref<48x1xf32, #tpu.memory_space<vmem>>, vector<48x1xf32>
    %8 = vector.broadcast %7 : vector<48x1xf32> to vector<48x16xf32>
    %9 = arith.addf %6, %8 : vector<48x16xf32>
    %cst_7 = arith.constant 0.000000e+00 : f32
    %10 = vector.broadcast %cst_7 : f32 to vector<48x16xf32>
    %11 = arith.maximumf %9, %10 : vector<48x16xf32>
    %c0_8 = arith.constant 0 : index
    %c0_9 = arith.constant 0 : index
    %12 = vector.load %arg5[%c0_8, %c0_9] : memref<48x48xbf16, #tpu.memory_space<vmem>>, vector<48x48xbf16>
    %13 = vector.broadcast %1 : vector<1x16xf32> to vector<48x16xf32>
    %14 = arith.mulf %11, %13 : vector<48x16xf32>
    %15 = arith.truncf %14 : vector<48x16xf32> to vector<48x16xbf16>
    %cst_10 = arith.constant dense<0.000000e+00> : vector<48x16xf32>
    %16 = tpu.matmul %12, %15, %cst_10 {dimension_numbers = #tpu.dot_dimension_numbers<[1], [0], [0], [1], [0, 0, 1, 1], [], []>} : vector<48x48xbf16>, vector<48x16xbf16>, vector<48x16xf32> -> vector<48x16xf32>
    %c0_11 = arith.constant 0 : index
    %c0_12 = arith.constant 0 : index
    %17 = vector.load %arg6[%c0_11, %c0_12] : memref<48x1xf32, #tpu.memory_space<vmem>>, vector<48x1xf32>
    %18 = vector.broadcast %17 : vector<48x1xf32> to vector<48x16xf32>
    %19 = arith.addf %16, %18 : vector<48x16xf32>
    %20 = arith.addf %0, %19 : vector<48x16xf32>
    %21 = vector.broadcast %1 : vector<1x16xf32> to vector<48x16xf32>
    %22 = arith.mulf %20, %21 : vector<48x16xf32>
    %c0_13 = arith.constant 0 : index
    %c0_14 = arith.constant 0 : index
    %23 = vector.load %arg1[%c0_13, %c0_14] : memref<48x16xf32, #tpu.memory_space<vmem>>, vector<48x16xf32>
    %24 = arith.addf %22, %23 : vector<48x16xf32>
    %25 = vector.broadcast %1 : vector<1x16xf32> to vector<48x16xf32>
    %26 = arith.mulf %24, %25 : vector<48x16xf32>
    %c0_15 = arith.constant 0 : index
    %c0_16 = arith.constant 0 : index
    %27 = vector.load %arg7[%c0_15, %c0_16] : memref<48x16xf32, #tpu.memory_space<vmem>>, vector<48x16xf32>
    tpu.vector_store %arg7[%c0_15, %c0_16], %26 {strides = array<i32>} : memref<48x16xf32, #tpu.memory_space<vmem>>, vector<48x16xf32>,
    return
  }
}

module attributes {stable_mosaic.version = 11 : i64} {
  func.func @_encoder_layer_kernel(%arg0: memref<48x16xf32, #tpu.memory_space<vmem>>, %arg1: memref<1x16xf32, #tpu.memory_space<vmem>>, %arg2: memref<16x16xf32, #tpu.memory_space<vmem>>, %arg3: memref<144x48xbf16, #tpu.memory_space<vmem>>, %arg4: memref<144x1xf32, #tpu.memory_space<vmem>>, %arg5: memref<48x48xbf16, #tpu.memory_space<vmem>>, %arg6: memref<48x1xf32, #tpu.memory_space<vmem>>, %arg7: memref<48x1xf32, #tpu.memory_space<vmem>>, %arg8: memref<48x1xf32, #tpu.memory_space<vmem>>, %arg9: memref<96x48xbf16, #tpu.memory_space<vmem>>, %arg10: memref<96x1xf32, #tpu.memory_space<vmem>>, %arg11: memref<48x96xbf16, #tpu.memory_space<vmem>>, %arg12: memref<48x1xf32, #tpu.memory_space<vmem>>, %arg13: memref<48x1xf32, #tpu.memory_space<vmem>>, %arg14: memref<48x1xf32, #tpu.memory_space<vmem>>, %arg15: memref<48x16xf32, #tpu.memory_space<vmem>>) attributes {dimension_semantics = [], scalar_prefetch = 0 : i64, scratch_operands = 0 : i64, tpu.core_type = #tpu.core_type<tc>} {
    %c0 = arith.constant 0 : index
    %c0_0 = arith.constant 0 : index
    %0 = vector.load %arg0[%c0, %c0_0] : memref<48x16xf32, #tpu.memory_space<vmem>>, vector<48x16xf32>
    %c0_1 = arith.constant 0 : index
    %c0_2 = arith.constant 0 : index
    %1 = vector.load %arg1[%c0_1, %c0_2] : memref<1x16xf32, #tpu.memory_space<vmem>>, vector<1x16xf32>
    %c0_3 = arith.constant 0 : index
    %c0_4 = arith.constant 0 : index
    %2 = vector.load %arg2[%c0_3, %c0_4] : memref<16x16xf32, #tpu.memory_space<vmem>>, vector<16x16xf32>
    %c0_5 = arith.constant 0 : index
    %c0_6 = arith.constant 0 : index
    %3 = vector.load %arg3[%c0_5, %c0_6] : memref<144x48xbf16, #tpu.memory_space<vmem>>, vector<144x48xbf16>
    %4 = vector.broadcast %1 : vector<1x16xf32> to vector<48x16xf32>
    %5 = arith.mulf %0, %4 : vector<48x16xf32>
    %6 = arith.truncf %5 : vector<48x16xf32> to vector<48x16xbf16>
    %cst = arith.constant dense<0.000000e+00> : vector<144x16xf32>
    %7 = tpu.matmul %3, %6, %cst {dimension_numbers = #tpu.dot_dimension_numbers<[1], [0], [0], [1], [0, 0, 1, 1], [], []>} : vector<144x48xbf16>, vector<48x16xbf16>, vector<144x16xf32> -> vector<144x16xf32>
    %c0_7 = arith.constant 0 : index
    %c0_8 = arith.constant 0 : index
    %8 = vector.load %arg4[%c0_7, %c0_8] : memref<144x1xf32, #tpu.memory_space<vmem>>, vector<144x1xf32>
    %9 = vector.broadcast %8 : vector<144x1xf32> to vector<144x16xf32>
    %10 = arith.addf %7, %9 : vector<144x16xf32>
    %11 = vector.extract_strided_slice %10 {offsets = [0, 0], sizes = [48, 16], strides = [1, 1]} : vector<144x16xf32> to vector<48x16xf32>
    %12 = vector.extract_strided_slice %10 {offsets = [48, 0], sizes = [48, 16], strides = [1, 1]} : vector<144x16xf32> to vector<48x16xf32>
    %13 = vector.extract_strided_slice %10 {offsets = [96, 0], sizes = [48, 16], strides = [1, 1]} : vector<144x16xf32> to vector<48x16xf32>
    %14 = vector.extract_strided_slice %11 {offsets = [0, 0], sizes = [24, 16], strides = [1, 1]} : vector<48x16xf32> to vector<24x16xf32>
    %15 = vector.extract_strided_slice %12 {offsets = [0, 0], sizes = [24, 16], strides = [1, 1]} : vector<48x16xf32> to vector<24x16xf32>
    %16 = vector.extract_strided_slice %13 {offsets = [0, 0], sizes = [24, 16], strides = [1, 1]} : vector<48x16xf32> to vector<24x16xf32>
    %17 = arith.truncf %14 : vector<24x16xf32> to vector<24x16xbf16>
    %18 = arith.truncf %15 : vector<24x16xf32> to vector<24x16xbf16>
    %cst_9 = arith.constant dense<0.000000e+00> : vector<16x16xf32>
    %19 = tpu.matmul %17, %18, %cst_9 {dimension_numbers = #tpu.dot_dimension_numbers<[0], [0], [1], [1], [0, 1, 1, 1], [], []>} : vector<24x16xbf16>, vector<24x16xbf16>, vector<16x16xf32> -> vector<16x16xf32>
    %cst_10 = arith.constant 0.204124153 : f32
    %20 = vector.broadcast %cst_10 : f32 to vector<16x16xf32>
    %21 = arith.mulf %19, %20 : vector<16x16xf32>
    %cst_11 = arith.constant 1.000000e+00 : f32
    %22 = vector.broadcast %cst_11 : f32 to vector<16x16xf32>
    %23 = arith.subf %2, %22 : vector<16x16xf32>
    %cst_12 = arith.constant 1.000000e+09 : f32
    %24 = vector.broadcast %cst_12 : f32 to vector<16x16xf32>
    %25 = arith.mulf %23, %24 : vector<16x16xf32>
    %26 = arith.addf %21, %25 : vector<16x16xf32>
    %cst_13 = arith.constant dense<0xFF800000> : vector<16xf32>
    %27 = vector.multi_reduction <maximumf>, %26, %cst_13 [1] : vector<16x16xf32> to vector<16xf32>
    %28 = vector.shape_cast %27 : vector<16xf32> to vector<16x1xf32>
    %29 = vector.broadcast %28 : vector<16x1xf32> to vector<16x16xf32>
    %30 = arith.subf %26, %29 : vector<16x16xf32>
    %31 = math.exp %30 : vector<16x16xf32>
    %cst_14 = arith.constant dense<0.000000e+00> : vector<16xf32>
    %32 = vector.multi_reduction <add>, %31, %cst_14 [1] : vector<16x16xf32> to vector<16xf32>
    %33 = vector.shape_cast %32 : vector<16xf32> to vector<16x1xf32>
    %34 = tpu.reciprocal %33 {approx = true} : vector<16x1xf32> -> vector<16x1xf32>
    %35 = vector.broadcast %34 : vector<16x1xf32> to vector<16x16xf32>
    %36 = arith.mulf %31, %35 : vector<16x16xf32>
    %37 = arith.truncf %16 : vector<24x16xf32> to vector<24x16xbf16>
    %38 = arith.truncf %36 : vector<16x16xf32> to vector<16x16xbf16>
    %cst_15 = arith.constant dense<0.000000e+00> : vector<24x16xf32>
    %39 = tpu.matmul %37, %38, %cst_15 {dimension_numbers = #tpu.dot_dimension_numbers<[1], [1], [0], [0], [0, 0, 1, 0], [], []>} : vector<24x16xbf16>, vector<16x16xbf16>, vector<24x16xf32> -> vector<24x16xf32>
    %40 = vector.extract_strided_slice %11 {offsets = [24, 0], sizes = [24, 16], strides = [1, 1]} : vector<48x16xf32> to vector<24x16xf32>
    %41 = vector.extract_strided_slice %12 {offsets = [24, 0], sizes = [24, 16], strides = [1, 1]} : vector<48x16xf32> to vector<24x16xf32>
    %42 = vector.extract_strided_slice %13 {offsets = [24, 0], sizes = [24, 16], strides = [1, 1]} : vector<48x16xf32> to vector<24x16xf32>
    %43 = arith.truncf %40 : vector<24x16xf32> to vector<24x16xbf16>
    %44 = arith.truncf %41 : vector<24x16xf32> to vector<24x16xbf16>
    %cst_16 = arith.constant dense<0.000000e+00> : vector<16x16xf32>
    %45 = tpu.matmul %43, %44, %cst_16 {dimension_numbers = #tpu.dot_dimension_numbers<[0], [0], [1], [1], [0, 1, 1, 1], [], []>} : vector<24x16xbf16>, vector<24x16xbf16>, vector<16x16xf32> -> vector<16x16xf32>
    %cst_17 = arith.constant 0.204124153 : f32
    %46 = vector.broadcast %cst_17 : f32 to vector<16x16xf32>
    %47 = arith.mulf %45, %46 : vector<16x16xf32>
    %cst_18 = arith.constant 1.000000e+00 : f32
    %48 = vector.broadcast %cst_18 : f32 to vector<16x16xf32>
    %49 = arith.subf %2, %48 : vector<16x16xf32>
    %cst_19 = arith.constant 1.000000e+09 : f32
    %50 = vector.broadcast %cst_19 : f32 to vector<16x16xf32>
    %51 = arith.mulf %49, %50 : vector<16x16xf32>
    %52 = arith.addf %47, %51 : vector<16x16xf32>
    %cst_20 = arith.constant dense<0xFF800000> : vector<16xf32>
    %53 = vector.multi_reduction <maximumf>, %52, %cst_20 [1] : vector<16x16xf32> to vector<16xf32>
    %54 = vector.shape_cast %53 : vector<16xf32> to vector<16x1xf32>
    %55 = vector.broadcast %54 : vector<16x1xf32> to vector<16x16xf32>
    %56 = arith.subf %52, %55 : vector<16x16xf32>
    %57 = math.exp %56 : vector<16x16xf32>
    %cst_21 = arith.constant dense<0.000000e+00> : vector<16xf32>
    %58 = vector.multi_reduction <add>, %57, %cst_21 [1] : vector<16x16xf32> to vector<16xf32>
    %59 = vector.shape_cast %58 : vector<16xf32> to vector<16x1xf32>
    %60 = tpu.reciprocal %59 {approx = true} : vector<16x1xf32> -> vector<16x1xf32>
    %61 = vector.broadcast %60 : vector<16x1xf32> to vector<16x16xf32>
    %62 = arith.mulf %57, %61 : vector<16x16xf32>
    %63 = arith.truncf %42 : vector<24x16xf32> to vector<24x16xbf16>
    %64 = arith.truncf %62 : vector<16x16xf32> to vector<16x16xbf16>
    %cst_22 = arith.constant dense<0.000000e+00> : vector<24x16xf32>
    %65 = tpu.matmul %63, %64, %cst_22 {dimension_numbers = #tpu.dot_dimension_numbers<[1], [1], [0], [0], [0, 0, 1, 0], [], []>} : vector<24x16xbf16>, vector<16x16xbf16>, vector<24x16xf32> -> vector<24x16xf32>
    %66 = tpu.concatenate %39, %65 in 0 : vector<24x16xf32>, vector<24x16xf32> -> vector<48x16xf32>
    %c0_23 = arith.constant 0 : index
    %c0_24 = arith.constant 0 : index
    %67 = vector.load %arg5[%c0_23, %c0_24] : memref<48x48xbf16, #tpu.memory_space<vmem>>, vector<48x48xbf16>
    %68 = arith.truncf %66 : vector<48x16xf32> to vector<48x16xbf16>
    %cst_25 = arith.constant dense<0.000000e+00> : vector<48x16xf32>
    %69 = tpu.matmul %67, %68, %cst_25 {dimension_numbers = #tpu.dot_dimension_numbers<[1], [0], [0], [1], [0, 0, 1, 1], [], []>} : vector<48x48xbf16>, vector<48x16xbf16>, vector<48x16xf32> -> vector<48x16xf32>
    %c0_26 = arith.constant 0 : index
    %c0_27 = arith.constant 0 : index
    %70 = vector.load %arg6[%c0_26, %c0_27] : memref<48x1xf32, #tpu.memory_space<vmem>>, vector<48x1xf32>
    %71 = vector.broadcast %70 : vector<48x1xf32> to vector<48x16xf32>
    %72 = arith.addf %69, %71 : vector<48x16xf32>
    %73 = arith.addf %0, %72 : vector<48x16xf32>
    %74 = vector.broadcast %1 : vector<1x16xf32> to vector<48x16xf32>
    %75 = arith.mulf %73, %74 : vector<48x16xf32>
    %cst_28 = arith.constant dense<0.000000e+00> : vector<16xf32>
    %76 = vector.multi_reduction <add>, %75, %cst_28 [0] : vector<48x16xf32> to vector<16xf32>
    %77 = vector.shape_cast %76 : vector<16xf32> to vector<1x16xf32>
    %cst_29 = arith.constant 4.800000e+01 : f32
    %78 = vector.broadcast %cst_29 : f32 to vector<1x16xf32>
    %79 = arith.divf %77, %78 : vector<1x16xf32>
    %80 = vector.broadcast %79 : vector<1x16xf32> to vector<48x16xf32>
    %81 = arith.subf %75, %80 : vector<48x16xf32>
    %82 = arith.mulf %81, %81 : vector<48x16xf32>
    %cst_30 = arith.constant dense<0.000000e+00> : vector<16xf32>
    %83 = vector.multi_reduction <add>, %82, %cst_30 [0] : vector<48x16xf32> to vector<16xf32>
    %84 = vector.shape_cast %83 : vector<16xf32> to vector<1x16xf32>
    %cst_31 = arith.constant 4.800000e+01 : f32
    %85 = vector.broadcast %cst_31 : f32 to vector<1x16xf32>
    %86 = arith.divf %84, %85 : vector<1x16xf32>
    %87 = vector.broadcast %79 : vector<1x16xf32> to vector<48x16xf32>
    %88 = arith.subf %75, %87 : vector<48x16xf32>
    %cst_32 = arith.constant 9.99999974E-5 : f32
    %89 = vector.broadcast %cst_32 : f32 to vector<1x16xf32>
    %90 = arith.addf %86, %89 : vector<1x16xf32>
    %91 = math.rsqrt %90 : vector<1x16xf32>
    %92 = vector.broadcast %91 : vector<1x16xf32> to vector<48x16xf32>
    %93 = arith.mulf %88, %92 : vector<48x16xf32>
    %c0_33 = arith.constant 0 : index
    %c0_34 = arith.constant 0 : index
    %94 = vector.load %arg7[%c0_33, %c0_34] : memref<48x1xf32, #tpu.memory_space<vmem>>, vector<48x1xf32>
    %95 = vector.broadcast %94 : vector<48x1xf32> to vector<48x16xf32>
    %96 = arith.mulf %93, %95 : vector<48x16xf32>
    %c0_35 = arith.constant 0 : index
    %c0_36 = arith.constant 0 : index
    %97 = vector.load %arg8[%c0_35, %c0_36] : memref<48x1xf32, #tpu.memory_space<vmem>>, vector<48x1xf32>
    %98 = vector.broadcast %97 : vector<48x1xf32> to vector<48x16xf32>
    %99 = arith.addf %96, %98 : vector<48x16xf32>
    %c0_37 = arith.constant 0 : index
    %c0_38 = arith.constant 0 : index
    %100 = vector.load %arg9[%c0_37, %c0_38] : memref<96x48xbf16, #tpu.memory_space<vmem>>, vector<96x48xbf16>
    %101 = vector.broadcast %1 : vector<1x16xf32> to vector<48x16xf32>
    %102 = arith.mulf %99, %101 : vector<48x16xf32>
    %103 = arith.truncf %102 : vector<48x16xf32> to vector<48x16xbf16>
    %cst_39 = arith.constant dense<0.000000e+00> : vector<96x16xf32>
    %104 = tpu.matmul %100, %103, %cst_39 {dimension_numbers = #tpu.dot_dimension_numbers<[1], [0], [0], [1], [0, 0, 1, 1], [], []>} : vector<96x48xbf16>, vector<48x16xbf16>, vector<96x16xf32> -> vector<96x16xf32>
    %c0_40 = arith.constant 0 : index
    %c0_41 = arith.constant 0 : index
    %105 = vector.load %arg10[%c0_40, %c0_41] : memref<96x1xf32, #tpu.memory_space<vmem>>, vector<96x1xf32>
    %106 = vector.broadcast %105 : vector<96x1xf32> to vector<96x16xf32>
    %107 = arith.addf %104, %106 : vector<96x16xf32>
    %cst_42 = arith.constant 0.000000e+00 : f32
    %108 = vector.broadcast %cst_42 : f32 to vector<96x16xf32>
    %109 = arith.maximumf %107, %108 : vector<96x16xf32>
    %c0_43 = arith.constant 0 : index
    %c0_44 = arith.constant 0 : index
    %110 = vector.load %arg11[%c0_43, %c0_44] : memref<48x96xbf16, #tpu.memory_space<vmem>>, vector<48x96xbf16>
    %111 = vector.broadcast %1 : vector<1x16xf32> to vector<96x16xf32>
    %112 = arith.mulf %109, %111 : vector<96x16xf32>
    %113 = arith.truncf %112 : vector<96x16xf32> to vector<96x16xbf16>
    %cst_45 = arith.constant dense<0.000000e+00> : vector<48x16xf32>
    %114 = tpu.matmul %110, %113, %cst_45 {dimension_numbers = #tpu.dot_dimension_numbers<[1], [0], [0], [1], [0, 0, 1, 1], [], []>} : vector<48x96xbf16>, vector<96x16xbf16>, vector<48x16xf32> -> vector<48x16xf32>
    %c0_46 = arith.constant 0 : index
    %c0_47 = arith.constant 0 : index
    %115 = vector.load %arg12[%c0_46, %c0_47] : memref<48x1xf32, #tpu.memory_space<vmem>>, vector<48x1xf32>
    %116 = vector.broadcast %115 : vector<48x1xf32> to vector<48x16xf32>
    %117 = arith.addf %114, %116 : vector<48x16xf32>
    %118 = arith.addf %99, %117 : vector<48x16xf32>
    %119 = vector.broadcast %1 : vector<1x16xf32> to vector<48x16xf32>
    %120 = arith.mulf %118, %119 : vector<48x16xf32>
    %cst_48 = arith.constant dense<0.000000e+00> : vector<16xf32>
    %121 = vector.multi_reduction <add>, %120, %cst_48 [0] : vector<48x16xf32> to vector<16xf32>
    %122 = vector.shape_cast %121 : vector<16xf32> to vector<1x16xf32>
    %cst_49 = arith.constant 4.800000e+01 : f32
    %123 = vector.broadcast %cst_49 : f32 to vector<1x16xf32>
    %124 = arith.divf %122, %123 : vector<1x16xf32>
    %125 = vector.broadcast %124 : vector<1x16xf32> to vector<48x16xf32>
    %126 = arith.subf %120, %125 : vector<48x16xf32>
    %127 = arith.mulf %126, %126 : vector<48x16xf32>
    %cst_50 = arith.constant dense<0.000000e+00> : vector<16xf32>
    %128 = vector.multi_reduction <add>, %127, %cst_50 [0] : vector<48x16xf32> to vector<16xf32>
    %129 = vector.shape_cast %128 : vector<16xf32> to vector<1x16xf32>
    %cst_51 = arith.constant 4.800000e+01 : f32
    %130 = vector.broadcast %cst_51 : f32 to vector<1x16xf32>
    %131 = arith.divf %129, %130 : vector<1x16xf32>
    %132 = vector.broadcast %124 : vector<1x16xf32> to vector<48x16xf32>
    %133 = arith.subf %120, %132 : vector<48x16xf32>
    %cst_52 = arith.constant 9.99999974E-5 : f32
    %134 = vector.broadcast %cst_52 : f32 to vector<1x16xf32>
    %135 = arith.addf %131, %134 : vector<1x16xf32>
    %136 = math.rsqrt %135 : vector<1x16xf32>
    %137 = vector.broadcast %136 : vector<1x16xf32> to vector<48x16xf32>
    %138 = arith.mulf %133, %137 : vector<48x16xf32>
    %c0_53 = arith.constant 0 : index
    %c0_54 = arith.constant 0 : index
    %139 = vector.load %arg13[%c0_53, %c0_54] : memref<48x1xf32, #tpu.memory_space<vmem>>, vector<48x1xf32>
    %140 = vector.broadcast %139 : vector<48x1xf32> to vector<48x16xf32>
    %141 = arith.mulf %138, %140 : vector<48x16xf32>
    %c0_55 = arith.constant 0 : index
    %c0_56 = arith.constant 0 : index
    %142 = vector.load %arg14[%c0_55, %c0_56] : memref<48x1xf32, #tpu.memory_space<vmem>>, vector<48x1xf32>
    %143 = vector.broadcast %142 : vector<48x1xf32> to vector<48x16xf32>
    %144 = arith.addf %141, %143 : vector<48x16xf32>
    %145 = vector.broadcast %1 : vector<1x16xf32> to vector<48x16xf32>
    %146 = arith.mulf %144, %145 : vector<48x16xf32>
    %c0_57 = arith.constant 0 : index
    %c0_58 = arith.constant 0 : index
    %147 = vector.load %arg15[%c0_57, %c0_58] : memref<48x16xf32, #tpu.memory_space<vmem>>, vector<48x16xf32>
    tpu.vector_store %arg15[%c0_57, %c0_58], %146 {strides = array<i32>} : memref<48x16xf32, #tpu.memory_space<vmem>>, vector<48x16xf32>,
    return
  }
}

module attributes {stable_mosaic.version = 11 : i64} {
  func.func @_heads_kernel(%arg0: memref<48x16xf32, #tpu.memory_space<vmem>>, %arg1: memref<1x16xf32, #tpu.memory_space<vmem>>, %arg2: memref<16x48xbf16, #tpu.memory_space<vmem>>, %arg3: memref<16x1xf32, #tpu.memory_space<vmem>>, %arg4: memref<48x48xbf16, #tpu.memory_space<vmem>>, %arg5: memref<48x1xf32, #tpu.memory_space<vmem>>, %arg6: memref<1x48xbf16, #tpu.memory_space<vmem>>, %arg7: memref<1x1xf32, #tpu.memory_space<vmem>>, %arg8: memref<16x16xf32, #tpu.memory_space<vmem>>, %arg9: memref<1x16xf32, #tpu.memory_space<vmem>>) attributes {dimension_semantics = [], scalar_prefetch = 0 : i64, scratch_operands = 0 : i64, tpu.core_type = #tpu.core_type<tc>} {
    %c0 = arith.constant 0 : index
    %c0_0 = arith.constant 0 : index
    %0 = vector.load %arg0[%c0, %c0_0] : memref<48x16xf32, #tpu.memory_space<vmem>>, vector<48x16xf32>
    %c0_1 = arith.constant 0 : index
    %c0_2 = arith.constant 0 : index
    %1 = vector.load %arg1[%c0_1, %c0_2] : memref<1x16xf32, #tpu.memory_space<vmem>>, vector<1x16xf32>
    %c0_3 = arith.constant 0 : index
    %c0_4 = arith.constant 0 : index
    %2 = vector.load %arg2[%c0_3, %c0_4] : memref<16x48xbf16, #tpu.memory_space<vmem>>, vector<16x48xbf16>
    %3 = arith.truncf %0 : vector<48x16xf32> to vector<48x16xbf16>
    %cst = arith.constant dense<0.000000e+00> : vector<16x16xf32>
    %4 = tpu.matmul %2, %3, %cst {dimension_numbers = #tpu.dot_dimension_numbers<[1], [0], [0], [1], [0, 0, 1, 1], [], []>} : vector<16x48xbf16>, vector<48x16xbf16>, vector<16x16xf32> -> vector<16x16xf32>
    %c0_5 = arith.constant 0 : index
    %c0_6 = arith.constant 0 : index
    %5 = vector.load %arg3[%c0_5, %c0_6] : memref<16x1xf32, #tpu.memory_space<vmem>>, vector<16x1xf32>
    %6 = vector.broadcast %5 : vector<16x1xf32> to vector<16x16xf32>
    %7 = arith.addf %4, %6 : vector<16x16xf32>
    %c0_7 = arith.constant 0 : index
    %c0_8 = arith.constant 0 : index
    %8 = vector.load %arg8[%c0_7, %c0_8] : memref<16x16xf32, #tpu.memory_space<vmem>>, vector<16x16xf32>
    tpu.vector_store %arg8[%c0_7, %c0_8], %7 {strides = array<i32>} : memref<16x16xf32, #tpu.memory_space<vmem>>, vector<16x16xf32>,
    %c0_9 = arith.constant 0 : index
    %c0_10 = arith.constant 0 : index
    %9 = vector.load %arg4[%c0_9, %c0_10] : memref<48x48xbf16, #tpu.memory_space<vmem>>, vector<48x48xbf16>
    %10 = vector.broadcast %1 : vector<1x16xf32> to vector<48x16xf32>
    %11 = arith.mulf %0, %10 : vector<48x16xf32>
    %12 = arith.truncf %11 : vector<48x16xf32> to vector<48x16xbf16>
    %cst_11 = arith.constant dense<0.000000e+00> : vector<48x16xf32>
    %13 = tpu.matmul %9, %12, %cst_11 {dimension_numbers = #tpu.dot_dimension_numbers<[1], [0], [0], [1], [0, 0, 1, 1], [], []>} : vector<48x48xbf16>, vector<48x16xbf16>, vector<48x16xf32> -> vector<48x16xf32>
    %c0_12 = arith.constant 0 : index
    %c0_13 = arith.constant 0 : index
    %14 = vector.load %arg5[%c0_12, %c0_13] : memref<48x1xf32, #tpu.memory_space<vmem>>, vector<48x1xf32>
    %15 = vector.broadcast %14 : vector<48x1xf32> to vector<48x16xf32>
    %16 = arith.addf %13, %15 : vector<48x16xf32>
    %cst_14 = arith.constant 0.000000e+00 : f32
    %17 = vector.broadcast %cst_14 : f32 to vector<48x16xf32>
    %18 = arith.maximumf %16, %17 : vector<48x16xf32>
    %c0_15 = arith.constant 0 : index
    %c0_16 = arith.constant 0 : index
    %19 = vector.load %arg6[%c0_15, %c0_16] : memref<1x48xbf16, #tpu.memory_space<vmem>>, vector<1x48xbf16>
    %20 = vector.broadcast %1 : vector<1x16xf32> to vector<48x16xf32>
    %21 = arith.mulf %18, %20 : vector<48x16xf32>
    %22 = arith.truncf %21 : vector<48x16xf32> to vector<48x16xbf16>
    %cst_17 = arith.constant dense<0.000000e+00> : vector<1x16xf32>
    %23 = tpu.matmul %19, %22, %cst_17 {dimension_numbers = #tpu.dot_dimension_numbers<[1], [0], [0], [1], [0, 0, 1, 1], [], []>} : vector<1x48xbf16>, vector<48x16xbf16>, vector<1x16xf32> -> vector<1x16xf32>
    %c0_18 = arith.constant 0 : index
    %c0_19 = arith.constant 0 : index
    %24 = vector.load %arg7[%c0_18, %c0_19] : memref<1x1xf32, #tpu.memory_space<vmem>>, vector<1x1xf32>
    %25 = vector.broadcast %24 : vector<1x1xf32> to vector<1x16xf32>
    %26 = arith.addf %23, %25 : vector<1x16xf32>
    %27 = arith.mulf %26, %1 : vector<1x16xf32>
    %c0_20 = arith.constant 0 : index
    %c0_21 = arith.constant 0 : index
    %28 = vector.load %arg9[%c0_20, %c0_21] : memref<1x16xf32, #tpu.memory_space<vmem>>, vector<1x16xf32>
    tpu.vector_store %arg9[%c0_20, %c0_21], %27 {strides = array<i32>} : memref<1x16xf32, #tpu.memory_space<vmem>>, vector<1x16xf32>,
    return
  }
}

module attributes {stable_mosaic.version = 11 : i64} {
  func.func @_glow_flow_kernel(%arg0: memref<32x16xf32, #tpu.memory_space<vmem>>, %arg1: memref<1x16xf32, #tpu.memory_space<vmem>>, %arg2: memref<32x1xf32, #tpu.memory_space<vmem>>, %arg3: memref<32x1xf32, #tpu.memory_space<vmem>>, %arg4: memref<32x32xf32, #tpu.memory_space<vmem>>, %arg5: memref<32x16xbf16, #tpu.memory_space<vmem>>, %arg6: memref<32x1xf32, #tpu.memory_space<vmem>>, %arg7: memref<32x32xbf16, #tpu.memory_space<vmem>>, %arg8: memref<32x1xf32, #tpu.memory_space<vmem>>, %arg9: memref<32x16xf32, #tpu.memory_space<vmem>>, %arg10: memref<16x16xf32, #tpu.memory_space<vmem>>) attributes {dimension_semantics = [], scalar_prefetch = 0 : i64, scratch_operands = 0 : i64, tpu.core_type = #tpu.core_type<tc>} {
    %c0 = arith.constant 0 : index
    %c0_0 = arith.constant 0 : index
    %0 = vector.load %arg1[%c0, %c0_0] : memref<1x16xf32, #tpu.memory_space<vmem>>, vector<1x16xf32>
    %c0_1 = arith.constant 0 : index
    %c0_2 = arith.constant 0 : index
    %1 = vector.load %arg0[%c0_1, %c0_2] : memref<32x16xf32, #tpu.memory_space<vmem>>, vector<32x16xf32>
    %c0_3 = arith.constant 0 : index
    %c0_4 = arith.constant 0 : index
    %2 = vector.load %arg2[%c0_3, %c0_4] : memref<32x1xf32, #tpu.memory_space<vmem>>, vector<32x1xf32>
    %c0_5 = arith.constant 0 : index
    %c0_6 = arith.constant 0 : index
    %3 = vector.load %arg3[%c0_5, %c0_6] : memref<32x1xf32, #tpu.memory_space<vmem>>, vector<32x1xf32>
    %4 = math.exp %3 : vector<32x1xf32>
    %5 = vector.broadcast %4 : vector<32x1xf32> to vector<32x16xf32>
    %6 = arith.mulf %5, %1 : vector<32x16xf32>
    %7 = vector.broadcast %2 : vector<32x1xf32> to vector<32x16xf32>
    %8 = arith.addf %7, %6 : vector<32x16xf32>
    %9 = vector.broadcast %0 : vector<1x16xf32> to vector<32x16xf32>
    %10 = arith.mulf %8, %9 : vector<32x16xf32>
    %c0_7 = arith.constant 0 : index
    %c0_8 = arith.constant 0 : index
    %11 = vector.load %arg4[%c0_7, %c0_8] : memref<32x32xf32, #tpu.memory_space<vmem>>, vector<32x32xf32>
    %cst = arith.constant dense<0.000000e+00> : vector<32x16xf32>
    %12 = tpu.matmul %11, %10, %cst {dimension_numbers = #tpu.dot_dimension_numbers<[1], [0], [0], [1], [0, 0, 1, 1], [], []>} : vector<32x32xf32>, vector<32x16xf32>, vector<32x16xf32> -> vector<32x16xf32>
    %13 = vector.broadcast %0 : vector<1x16xf32> to vector<32x16xf32>
    %14 = arith.mulf %12, %13 : vector<32x16xf32>
    %15 = vector.extract_strided_slice %14 {offsets = [0, 0], sizes = [16, 16], strides = [1, 1]} : vector<32x16xf32> to vector<16x16xf32>
    %16 = vector.extract_strided_slice %14 {offsets = [16, 0], sizes = [16, 16], strides = [1, 1]} : vector<32x16xf32> to vector<16x16xf32>
    %c0_9 = arith.constant 0 : index
    %c0_10 = arith.constant 0 : index
    %17 = vector.load %arg5[%c0_9, %c0_10] : memref<32x16xbf16, #tpu.memory_space<vmem>>, vector<32x16xbf16>
    %18 = vector.broadcast %0 : vector<1x16xf32> to vector<16x16xf32>
    %19 = arith.mulf %15, %18 : vector<16x16xf32>
    %20 = arith.truncf %19 : vector<16x16xf32> to vector<16x16xbf16>
    %cst_11 = arith.constant dense<0.000000e+00> : vector<32x16xf32>
    %21 = tpu.matmul %17, %20, %cst_11 {dimension_numbers = #tpu.dot_dimension_numbers<[1], [0], [0], [1], [0, 0, 1, 1], [], []>} : vector<32x16xbf16>, vector<16x16xbf16>, vector<32x16xf32> -> vector<32x16xf32>
    %c0_12 = arith.constant 0 : index
    %c0_13 = arith.constant 0 : index
    %22 = vector.load %arg6[%c0_12, %c0_13] : memref<32x1xf32, #tpu.memory_space<vmem>>, vector<32x1xf32>
    %23 = vector.broadcast %22 : vector<32x1xf32> to vector<32x16xf32>
    %24 = arith.addf %21, %23 : vector<32x16xf32>
    %25 = math.tanh %24 : vector<32x16xf32>
    %c0_14 = arith.constant 0 : index
    %c0_15 = arith.constant 0 : index
    %26 = vector.load %arg7[%c0_14, %c0_15] : memref<32x32xbf16, #tpu.memory_space<vmem>>, vector<32x32xbf16>
    %27 = vector.broadcast %0 : vector<1x16xf32> to vector<32x16xf32>
    %28 = arith.mulf %25, %27 : vector<32x16xf32>
    %29 = arith.truncf %28 : vector<32x16xf32> to vector<32x16xbf16>
    %cst_16 = arith.constant dense<0.000000e+00> : vector<32x16xf32>
    %30 = tpu.matmul %26, %29, %cst_16 {dimension_numbers = #tpu.dot_dimension_numbers<[1], [0], [0], [1], [0, 0, 1, 1], [], []>} : vector<32x32xbf16>, vector<32x16xbf16>, vector<32x16xf32> -> vector<32x16xf32>
    %c0_17 = arith.constant 0 : index
    %c0_18 = arith.constant 0 : index
    %31 = vector.load %arg8[%c0_17, %c0_18] : memref<32x1xf32, #tpu.memory_space<vmem>>, vector<32x1xf32>
    %32 = vector.broadcast %31 : vector<32x1xf32> to vector<32x16xf32>
    %33 = arith.addf %30, %32 : vector<32x16xf32>
    %34 = vector.extract_strided_slice %33 {offsets = [0, 0], sizes = [16, 16], strides = [1, 1]} : vector<32x16xf32> to vector<16x16xf32>
    %35 = vector.extract_strided_slice %33 {offsets = [16, 0], sizes = [16, 16], strides = [1, 1]} : vector<32x16xf32> to vector<16x16xf32>
    %36 = math.exp %35 : vector<16x16xf32>
    %37 = arith.mulf %36, %16 : vector<16x16xf32>
    %38 = arith.addf %34, %37 : vector<16x16xf32>
    %39 = vector.broadcast %0 : vector<1x16xf32> to vector<16x16xf32>
    %40 = arith.mulf %38, %39 : vector<16x16xf32>
    %41 = tpu.concatenate %15, %40 in 0 : vector<16x16xf32>, vector<16x16xf32> -> vector<32x16xf32>
    %c0_19 = arith.constant 0 : index
    %c0_20 = arith.constant 0 : index
    %42 = vector.load %arg9[%c0_19, %c0_20] : memref<32x16xf32, #tpu.memory_space<vmem>>, vector<32x16xf32>
    tpu.vector_store %arg9[%c0_19, %c0_20], %41 {strides = array<i32>} : memref<32x16xf32, #tpu.memory_space<vmem>>, vector<32x16xf32>,
    %43 = vector.broadcast %0 : vector<1x16xf32> to vector<16x16xf32>
    %44 = arith.mulf %35, %43 : vector<16x16xf32>
    %c0_21 = arith.constant 0 : index
    %c0_22 = arith.constant 0 : index
    %45 = vector.load %arg10[%c0_21, %c0_22] : memref<16x16xf32, #tpu.memory_space<vmem>>, vector<16x16xf32>
    tpu.vector_store %arg10[%c0_21, %c0_22], %44 {strides = array<i32>} : memref<16x16xf32, #tpu.memory_space<vmem>>, vector<16x16xf32>,
    return
  }
}

module attributes {stable_mosaic.version = 11 : i64} {
  func.func @_logp_kernel(%arg0: i32, %arg1: memref<1x8x16xf32, #tpu.memory_space<vmem>>, %arg2: memref<1x8x16xf32, #tpu.memory_space<vmem>>, %arg3: memref<1x16x16xf32, #tpu.memory_space<vmem>>, %arg4: memref<1x8x16xf32, #tpu.memory_space<vmem>>) attributes {dimension_semantics = [#tpu.dimension_semantics<parallel>], iteration_bounds = array<i64: 2>, scalar_prefetch = 0 : i64, scratch_operands = 0 : i64, tpu.core_type = #tpu.core_type<tc>, window_params = [{transform_indices = @transform_0, window_bounds = array<i64: 1, 8, 16>}, {transform_indices = @transform_1, window_bounds = array<i64: 1, 8, 16>}, {transform_indices = @transform_2, window_bounds = array<i64: 1, 16, 16>}, {transform_indices = @transform_3, window_bounds = array<i64: 1, 8, 16>}]} {
    %c0 = arith.constant 0 : index
    %c0_0 = arith.constant 0 : index
    %c0_1 = arith.constant 0 : index
    %0 = vector.load %arg1[%c0, %c0_0, %c0_1] : memref<1x8x16xf32, #tpu.memory_space<vmem>>, vector<1x8x16xf32>
    %1 = vector.shape_cast %0 : vector<1x8x16xf32> to vector<8x16xf32>
    %c0_2 = arith.constant 0 : index
    %c0_3 = arith.constant 0 : index
    %c0_4 = arith.constant 0 : index
    %2 = vector.load %arg2[%c0_2, %c0_3, %c0_4] : memref<1x8x16xf32, #tpu.memory_space<vmem>>, vector<1x8x16xf32>
    %3 = vector.shape_cast %2 : vector<1x8x16xf32> to vector<8x16xf32>
    %c0_5 = arith.constant 0 : index
    %c0_6 = arith.constant 0 : index
    %c0_7 = arith.constant 0 : index
    %4 = vector.load %arg3[%c0_5, %c0_6, %c0_7] : memref<1x16x16xf32, #tpu.memory_space<vmem>>, vector<1x16x16xf32>
    %5 = vector.shape_cast %4 : vector<1x16x16xf32> to vector<16x16xf32>
    %cst = arith.constant -2.000000e+00 : f32
    %6 = vector.broadcast %cst : f32 to vector<8x16xf32>
    %7 = arith.mulf %6, %3 : vector<8x16xf32>
    %8 = math.exp %7 : vector<8x16xf32>
    %cst_8 = arith.constant -0.918938517 : f32
    %9 = vector.broadcast %cst_8 : f32 to vector<8x16xf32>
    %10 = arith.subf %9, %3 : vector<8x16xf32>
    %cst_9 = arith.constant dense<0.000000e+00> : vector<8xf32>
    %11 = vector.multi_reduction <add>, %10, %cst_9 [1] : vector<8x16xf32> to vector<8xf32>
    %12 = vector.shape_cast %11 : vector<8xf32> to vector<8x1xf32>
    %cst_10 = arith.constant -5.000000e-01 : f32
    %13 = vector.broadcast %cst_10 : f32 to vector<8x16xf32>
    %14 = arith.mulf %13, %1 : vector<8x16xf32>
    %15 = arith.mulf %14, %1 : vector<8x16xf32>
    %16 = arith.mulf %15, %8 : vector<8x16xf32>
    %cst_11 = arith.constant dense<0.000000e+00> : vector<8xf32>
    %17 = vector.multi_reduction <add>, %16, %cst_11 [1] : vector<8x16xf32> to vector<8xf32>
    %18 = vector.shape_cast %17 : vector<8xf32> to vector<8x1xf32>
    %cst_12 = arith.constant -5.000000e-01 : f32
    %19 = vector.broadcast %cst_12 : f32 to vector<16x16xf32>
    %20 = arith.mulf %19, %5 : vector<16x16xf32>
    %21 = arith.mulf %20, %5 : vector<16x16xf32>
    %cst_13 = arith.constant dense<0.000000e+00> : vector<8x16xf32>
    %22 = tpu.matmul %8, %21, %cst_13 {dimension_numbers = #tpu.dot_dimension_numbers<[1], [0], [0], [1], [0, 0, 1, 1], [], []>} : vector<8x16xf32>, vector<16x16xf32>, vector<8x16xf32> -> vector<8x16xf32>
    %23 = arith.mulf %1, %8 : vector<8x16xf32>
    %cst_14 = arith.constant dense<0.000000e+00> : vector<8x16xf32>
    %24 = tpu.matmul %23, %5, %cst_14 {dimension_numbers = #tpu.dot_dimension_numbers<[1], [0], [0], [1], [0, 0, 1, 1], [], []>} : vector<8x16xf32>, vector<16x16xf32>, vector<8x16xf32> -> vector<8x16xf32>
    %25 = arith.addf %22, %24 : vector<8x16xf32>
    %26 = vector.broadcast %12 : vector<8x1xf32> to vector<8x16xf32>
    %27 = arith.addf %25, %26 : vector<8x16xf32>
    %28 = vector.broadcast %18 : vector<8x1xf32> to vector<8x16xf32>
    %29 = arith.addf %27, %28 : vector<8x16xf32>
    %c0_15 = arith.constant 0 : index
    %c0_16 = arith.constant 0 : index
    %c0_17 = arith.constant 0 : index
    %30 = vector.load %arg4[%c0_15, %c0_16, %c0_17] : memref<1x8x16xf32, #tpu.memory_space<vmem>>, vector<1x8x16xf32>
    %31 = vector.shape_cast %30 : vector<1x8x16xf32> to vector<8x16xf32>
    %32 = vector.shape_cast %29 : vector<8x16xf32> to vector<1x8x16xf32>
    tpu.vector_store %arg4[%c0_15, %c0_16, %c0_17], %32 {strides = array<i32>} : memref<1x8x16xf32, #tpu.memory_space<vmem>>, vector<1x8x16xf32>,
    return
  }
  func.func @transform_0(%arg0: i32) -> (i32, i32, i32) {
    %c0_i32 = arith.constant 0 : i32
    %c0_i32_0 = arith.constant 0 : i32
    %c0_i32_1 = arith.constant 0 : i32
    return %arg0, %c0_i32, %c0_i32_0 : i32, i32, i32
  }
  func.func @transform_1(%arg0: i32) -> (i32, i32, i32) {
    %c0_i32 = arith.constant 0 : i32
    %c0_i32_0 = arith.constant 0 : i32
    %c0_i32_1 = arith.constant 0 : i32
    return %arg0, %c0_i32, %c0_i32_0 : i32, i32, i32
  }
  func.func @transform_2(%arg0: i32) -> (i32, i32, i32) {
    %c0_i32 = arith.constant 0 : i32
    %c0_i32_0 = arith.constant 0 : i32
    %c0_i32_1 = arith.constant 0 : i32
    return %arg0, %c0_i32, %c0_i32_0 : i32, i32, i32
  }
  func.func @transform_3(%arg0: i32) -> (i32, i32, i32) {
    %c0_i32 = arith.constant 0 : i32
    %c0_i32_0 = arith.constant 0 : i32
    %c0_i32_1 = arith.constant 0 : i32
    return %arg0, %c0_i32, %c0_i32_0 : i32, i32, i32
  }
}

module attributes {stable_mosaic.version = 11 : i64} {
  func.func @_length_regulate_kernel(%arg0: i32, %arg1: memref<1x16x8xf32, #tpu.memory_space<vmem>>, %arg2: memref<1x16x8xf32, #tpu.memory_space<vmem>>, %arg3: memref<1x8x16xf32, #tpu.memory_space<vmem>>, %arg4: memref<1x16x16xf32, #tpu.memory_space<vmem>>, %arg5: memref<1x16x16xf32, #tpu.memory_space<vmem>>) attributes {dimension_semantics = [#tpu.dimension_semantics<parallel>], iteration_bounds = array<i64: 2>, scalar_prefetch = 0 : i64, scratch_operands = 0 : i64, tpu.core_type = #tpu.core_type<tc>, window_params = [{transform_indices = @transform_0, window_bounds = array<i64: 1, 16, 8>}, {transform_indices = @transform_1, window_bounds = array<i64: 1, 16, 8>}, {transform_indices = @transform_2, window_bounds = array<i64: 1, 8, 16>}, {transform_indices = @transform_3, window_bounds = array<i64: 1, 16, 16>}, {transform_indices = @transform_4, window_bounds = array<i64: 1, 16, 16>}]} {
    %c0 = arith.constant 0 : index
    %c0_0 = arith.constant 0 : index
    %c0_1 = arith.constant 0 : index
    %0 = vector.load %arg3[%c0, %c0_0, %c0_1] : memref<1x8x16xf32, #tpu.memory_space<vmem>>, vector<1x8x16xf32>
    %1 = vector.shape_cast %0 : vector<1x8x16xf32> to vector<8x16xf32>
    %c0_2 = arith.constant 0 : index
    %c0_3 = arith.constant 0 : index
    %c0_4 = arith.constant 0 : index
    %2 = vector.load %arg1[%c0_2, %c0_3, %c0_4] : memref<1x16x8xf32, #tpu.memory_space<vmem>>, vector<1x16x8xf32>
    %3 = vector.shape_cast %2 : vector<1x16x8xf32> to vector<16x8xf32>
    %cst = arith.constant dense<0.000000e+00> : vector<16x16xf32>
    %4 = tpu.matmul %3, %1, %cst {dimension_numbers = #tpu.dot_dimension_numbers<[1], [0], [0], [1], [0, 0, 1, 1], [], []>} : vector<16x8xf32>, vector<8x16xf32>, vector<16x16xf32> -> vector<16x16xf32>
    %c0_5 = arith.constant 0 : index
    %c0_6 = arith.constant 0 : index
    %c0_7 = arith.constant 0 : index
    %5 = vector.load %arg4[%c0_5, %c0_6, %c0_7] : memref<1x16x16xf32, #tpu.memory_space<vmem>>, vector<1x16x16xf32>
    %6 = vector.shape_cast %5 : vector<1x16x16xf32> to vector<16x16xf32>
    %7 = vector.shape_cast %4 : vector<16x16xf32> to vector<1x16x16xf32>
    tpu.vector_store %arg4[%c0_5, %c0_6, %c0_7], %7 {strides = array<i32>} : memref<1x16x16xf32, #tpu.memory_space<vmem>>, vector<1x16x16xf32>,
    %c0_8 = arith.constant 0 : index
    %c0_9 = arith.constant 0 : index
    %c0_10 = arith.constant 0 : index
    %8 = vector.load %arg2[%c0_8, %c0_9, %c0_10] : memref<1x16x8xf32, #tpu.memory_space<vmem>>, vector<1x16x8xf32>
    %9 = vector.shape_cast %8 : vector<1x16x8xf32> to vector<16x8xf32>
    %cst_11 = arith.constant dense<0.000000e+00> : vector<16x16xf32>
    %10 = tpu.matmul %9, %1, %cst_11 {dimension_numbers = #tpu.dot_dimension_numbers<[1], [0], [0], [1], [0, 0, 1, 1], [], []>} : vector<16x8xf32>, vector<8x16xf32>, vector<16x16xf32> -> vector<16x16xf32>
    %c0_12 = arith.constant 0 : index
    %c0_13 = arith.constant 0 : index
    %c0_14 = arith.constant 0 : index
    %11 = vector.load %arg5[%c0_12, %c0_13, %c0_14] : memref<1x16x16xf32, #tpu.memory_space<vmem>>, vector<1x16x16xf32>
    %12 = vector.shape_cast %11 : vector<1x16x16xf32> to vector<16x16xf32>
    %13 = vector.shape_cast %10 : vector<16x16xf32> to vector<1x16x16xf32>
    tpu.vector_store %arg5[%c0_12, %c0_13, %c0_14], %13 {strides = array<i32>} : memref<1x16x16xf32, #tpu.memory_space<vmem>>, vector<1x16x16xf32>,
    return
  }
  func.func @transform_0(%arg0: i32) -> (i32, i32, i32) {
    %c0_i32 = arith.constant 0 : i32
    %c0_i32_0 = arith.constant 0 : i32
    %c0_i32_1 = arith.constant 0 : i32
    return %arg0, %c0_i32, %c0_i32_0 : i32, i32, i32
  }
  func.func @transform_1(%arg0: i32) -> (i32, i32, i32) {
    %c0_i32 = arith.constant 0 : i32
    %c0_i32_0 = arith.constant 0 : i32
    %c0_i32_1 = arith.constant 0 : i32
    return %arg0, %c0_i32, %c0_i32_0 : i32, i32, i32
  }
  func.func @transform_2(%arg0: i32) -> (i32, i32, i32) {
    %c0_i32 = arith.constant 0 : i32
    %c0_i32_0 = arith.constant 0 : i32
    %c0_i32_1 = arith.constant 0 : i32
    return %arg0, %c0_i32, %c0_i32_0 : i32, i32, i32
  }
  func.func @transform_3(%arg0: i32) -> (i32, i32, i32) {
    %c0_i32 = arith.constant 0 : i32
    %c0_i32_0 = arith.constant 0 : i32
    %c0_i32_1 = arith.constant 0 : i32
    return %arg0, %c0_i32, %c0_i32_0 : i32, i32, i32
  }
  func.func @transform_4(%arg0: i32) -> (i32, i32, i32) {
    %c0_i32 = arith.constant 0 : i32
    %c0_i32_0 = arith.constant 0 : i32
    %c0_i32_1 = arith.constant 0 : i32
    return %arg0, %c0_i32, %c0_i32_0 : i32, i32, i32
  }
}

</mosaic_0001>

<bundles_post_ra>
// kernel: tts_forward.8
= control target key start
LH: loop header
LB: loop body
LE: loop exit
PB: predicated region body
PF: predicated region fallthrough
CT: control target
= control target key end

     0   :  { %v424_v0 = vmov 0.0   ;;  %vm425_vm0 = vmmov 0   ;;  %v426_v9 = vmov 0   ;;  %vm106_vm1 = vcmask 392192   ;;  %s658_s0 = inlined_call_operand.vmem [shape: f32[48,16], index: 0, kind: input, shape index: {}]   ;;  %s659_s2 = inlined_call_operand.vmem [shape: f32[1,16], index: 2, kind: input, shape index: {}]   ;;  %s660_s3 = inlined_call_operand.vmem [shape: bf16[48,48], index: 3, kind: input, shape index: {}]   ;;  %s661_s4 = inlined_call_operand.vmem [shape: f32[48,1], index: 4, kind: input, shape index: {}]   ;;  %s662_s6 = inlined_call_operand.vmem [shape: f32[48,1], index: 6, kind: input, shape index: {}]   ;;  %s663_s5 = inlined_call_operand.vmem [shape: bf16[48,48], index: 5, kind: input, shape index: {}]   ;;  %s664_s1 = inlined_call_operand.vmem [shape: f32[48,16], index: 1, kind: input, shape index: {}]   ;;  %s665_s7 = inlined_call_operand.vmem [shape: f32[48,16], index: 7, kind: output, shape index: {}]  }
   0x1   :  { %377 = vmatprep.subr.bf16.mxu0 %v424_v0  ;;  %v471_v1 = vld [vmem:[%s658_s0 + $0x20] sm:$0xff]  ;;  %v476_v2 = vld [vmem:[%s658_s0 + $0x28] sm:$0xff]  ;;  %383 = vmatprep.mubr.msk.bf16.mxu0 %vm425_vm0, %v424_v0  ;;  %v492_v6 = vld [vmem:[%s658_s0 + $0x10] sm:$0xff]  ;;  %vm341_vm2 = vcmask 130048  }
   0x2   :  { %v481_v3 = vld [vmem:[%s659_s2] ss:$0 sm:$0xff]  ;;  %v497_v7 = vld [vmem:[%s658_s0 + $0x18] sm:$0xff]  ;;  %416 = vset.pattern.permute.xlu0 %v426_v9  ;;  %417 = vset.pattern.permute.xlu1 %v426_v9  ;;  %v511_v12 = vld [vmem:[%s658_s0 + $0x8] sm:$0xff] }
   0x3   :  { %v50_v4 = vmul.f32 %v481_v3, %v471_v1  ;;  %v51_v5 = vmul.f32 %v481_v3, %v476_v2  ;;  %v502_v8 = vld [vmem:[%s658_s0] sm:$0xff]  ;;  %v48_v10 = vmul.f32 %v481_v3, %v492_v6  ;;  %v49_v11 = vmul.f32 %v481_v3, %v497_v7  ;;  %395 = vmatprep.subr.bf16.mxu1 %v424_v0  ;;  %v57_v18 = vld [vmem:[%s661_s4 + $0x10] sm:$0xff]  ;;  %v60_v19 = vld [vmem:[%s661_s4 + $0x28] sm:$0xff] }
   0x4   :  { %401 = vmatprep.mubr.msk.bf16.mxu1 %vm425_vm0, %v424_v0  ;;  %v46_v15 = vmul.f32 %v481_v3, %v502_v8  ;;  %v47_v16 = vmul.f32 %v481_v3, %v511_v12  ;;  %v59_v17 = vld [vmem:[%s661_s4 + $0x20] sm:$0xff]  ;;  %73 = vperm.xlu1 %417, %v57_v18   ;;  %v58_v20 = vld [vmem:[%s661_s4 + $0x18] sm:$0xff]  ;;  %v56_v24 = vld [vmem:[%s661_s4 + $0x8] sm:$0xff] }
   0x5   :  { %v54_v13 = vpack.c.bf16 %v51_v5, %v50_v4  ;;  %v53_v14 = vpack.c.bf16 %v49_v11, %v48_v10  ;;  %83 = vperm.xlu0 %416, %v59_v17   ;;  %v55_v22 = vld [vmem:[%s661_s4] sm:$0xff]  ;;  %v195_v26 = vld [vmem:[%s662_s6 + $0x8] sm:$0xff]  ;;  %v196_v27 = vld [vmem:[%s662_s6 + $0x10] sm:$0xff] }
   0x6   :  { %v52_v21 = vpack.c.bf16 %v47_v16, %v46_v15  ;;  %v418_v23 = vld [vmem:[%s660_s3] sm:$0xff]   ;;  %v419_v28 = vld [vmem:[%s660_s3 + $0x8] sm:$0xff]   ;;  %v197_v29 = vld [vmem:[%s662_s6 + $0x18] sm:$0xff] }
   0x7   :  { %378 = vmatpush3.bf16.msra.mxu0 %v54_v13  ;;  %v194_v25 = vld [vmem:[%s662_s6] sm:$0xff]  ;;  %v199_v31 = vld [vmem:[%s662_s6 + $0x28] sm:$0xff]  ;;  %v420_v32 = vld [vmem:[%s660_s3 + $0x10] sm:$0xff]  }
   0x8   :  { %379 = vmatprep.subr.bf16.mxu0 %v424_v0  ;;  %78 = vperm.xlu1 %417, %v58_v20   ;;  %v198_v30 = vld [vmem:[%s662_s6 + $0x20] sm:$0xff]  ;;  %v422_v17 = vld [vmem:[%s663_s5 + $0x8] sm:$0xff]   ;;  %v423_v18 = vld [vmem:[%s663_s5 + $0x10] sm:$0xff]  }
   0x9   :  { %88 = vperm.xlu0 %416, %v60_v19   ;;  %v421_v16 = vld [vmem:[%s663_s5] sm:$0xff]  }
   0xb   :  { %380 = vmatpush3.bf16.msra.mxu0 %v53_v14 }
   0xc   :  { %381 = vmatprep.subr.bf16.mxu0 %v424_v0  ;;  %68 = vperm.xlu1 %417, %v56_v24  }
   0xd   :  { %63 = vperm.xlu0 %416, %v55_v22  }
   0xf   :  { %382 = vmatpush3.bf16.msra.mxu0 %v52_v21 }
  0x10   :  { %207 = vperm.xlu1 %417, %v195_v26  }
  0x11   :  { %202 = vperm.xlu0 %416, %v194_v25   ;;  %v323_v25 = vld [vmem:[%s664_s1] sm:$0xff] }
  0x12   :  { %384 = vmatmul.mubr.msk.bf16.vlgmr.msra.gmra.mxu0 %vm106_vm1, %v418_v23 }
  0x13   :  { %387 = vmatprep.mubr.msk.bf16.mxu0 %vm425_vm0, %v424_v0 }
  0x14   :  { %217 = vperm.xlu1 %417, %v197_v29  }
  0x15   :  { %212 = vperm.xlu0 %416, %v196_v27  }
  0x18   :  { %227 = vperm.xlu1 %417, %v199_v31  }
  0x19   :  { %222 = vperm.xlu0 %416, %v198_v30  }
  0x1a   :  { %388 = vmatmul.mubr.msk.bf16.gmra.mxu0 %vm106_vm1, %v419_v28 }
  0x1b   :  { %391 = vmatprep.mubr.msk.bf16.mxu0 %vm425_vm0, %v424_v0 }
  0x22   :  { %392 = vmatmul.mubr.msk.bf16.gmra.mxu0 %vm106_vm1, %v420_v32  ;;  %v324_v32 = vld [vmem:[%s664_s1 + $0x8] sm:$0xff] }
  0x7f   :  { %v74_v37 = vpop.permute.xlu1 %73 }
  0x80   :  { %v84_v39 = vpop.permute.xlu0 %83 }
  0x83   :  { %v79_v42 = vpop.permute.xlu1 %78 }
  0x84   :  { %v89_v44 = vpop.permute.xlu0 %88 }
  0x87   :  { %v69_v49 = vpop.permute.xlu1 %68 }
  0x88   :  { %v64_v54 = vpop.permute.xlu0 %63 }
  0x8b   :  { %v208_v24 = vpop.permute.xlu1 %207 }
  0x8c   :  { %v203_v19 = vpop.permute.xlu0 %202 }
  0x90   :  { %v213_v31 = vpop.permute.xlu0 %212 }
  0xd2   :  { %v150_v33 = vpop.f32.mrf.mxu0 }
  0xd3   :  { %v151_v59 = vadd.f32 %v150_v33, %v64_v54 }
  0xd4   :  { %v385_v34 = vpop.f32.mrf.mxu0 }
  0xd5   :  { %v173_v9 = vmax.f32 %v151_v59, 0.0 }
  0xd6   :  { %v153_v35 = vpop.f32.mrf.mxu0 }
  0xd7   :  { %v154_v56 = vadd.f32 %v153_v35, %v69_v49  ;;  %v185_v14 = vmul.f32 %v481_v3, %v173_v9 }
  0xd8   :  { %v386_v36 = vpop.f32.mrf.mxu0 }
  0xd9   :  { %v174_v63 = vmax.f32 %v154_v56, 0.0 }
  0xda   :  { %v158_v38 = vpop.f32.mrf.mxu0 }
  0xdb   :  { %v159_v51 = vadd.f32 %v158_v38, %v74_v37  ;;  %v186_v11 = vmul.f32 %v481_v3, %v174_v63  ;;  %v218_v38 = vpop.permute.xlu1 %217 }
  0xdc   :  { %v389_v40 = vpop.f32.mrf.mxu0 }
  0xdd   :  { %v175_v60 = vmax.f32 %v159_v51, 0.0  ;;  %v191_v15 = vpack.c.bf16 %v186_v11, %v185_v14 }
  0xde   :  { %v161_v41 = vpop.f32.mrf.mxu0 }
  0xdf   :  { %v162_v48 = vadd.f32 %v161_v41, %v79_v42  ;;  %v187_v10 = vmul.f32 %v481_v3, %v175_v60  ;;  %v228_v54 = vpop.permute.xlu1 %227 }
  0xe0   :  { %v390_v43 = vpop.f32.mrf.mxu0 }
  0xe1   :  { %v176_v57 = vmax.f32 %v162_v48, 0.0 }
  0xe2   :  { %v166_v45 = vpop.f32.mrf.mxu0 }
  0xe3   :  { %v167_v46 = vadd.f32 %v166_v45, %v84_v39  ;;  %v188_v4 = vmul.f32 %v481_v3, %v176_v57  ;;  %v325_v39 = vld [vmem:[%s664_s1 + $0x10] sm:$0xff] }
  0xe4   :  { %v393_v47 = vpop.f32.mrf.mxu0 }
  0xe5   :  { %v177_v52 = vmax.f32 %v167_v46, 0.0  ;;  %v192_v13 = vpack.c.bf16 %v188_v4, %v187_v10  ;;  %v223_v46 = vpop.permute.xlu0 %222  ;;  %v326_v47 = vld [vmem:[%s664_s1 + $0x18] sm:$0xff] }
  0xe6   :  { %v169_v50 = vpop.f32.mrf.mxu0 }
  0xe7   :  { %v170_v53 = vadd.f32 %v169_v50, %v89_v44  ;;  %v189_v61 = vmul.f32 %v481_v3, %v177_v52 }
  0xe8   :  { %v394_v55 = vpop.f32.mrf.mxu0 }
  0xe9   :  { %v178_v58 = vmax.f32 %v170_v53, 0.0  ;;  %v327_v55 = vld [vmem:[%s664_s1 + $0x20] sm:$0xff] }
  0xeb   :  { %v190_v62 = vmul.f32 %v481_v3, %v178_v58 }
  0xed   :  { %v193_v5 = vpack.c.bf16 %v190_v62, %v189_v61  ;;  %v328_v62 = vld [vmem:[%s664_s1 + $0x28] sm:$0xff] }
  0xef   :  { %396 = vmatpush3.bf16.msra.mxu1 %v193_v5 }
  0xf0   :  { %397 = vmatprep.subr.bf16.mxu1 %v424_v0 }
  0xf3   :  { %398 = vmatpush3.bf16.msra.mxu1 %v192_v13 }
  0xf4   :  { %399 = vmatprep.subr.bf16.mxu1 %v424_v0 }
  0xf7   :  { %400 = vmatpush3.bf16.msra.mxu1 %v191_v15 }
  0xfa   :  { %402 = vmatmul.mubr.msk.bf16.vlgmr.msra.gmra.mxu1 %vm106_vm1, %v421_v16 }
  0xfb   :  { %405 = vmatprep.mubr.msk.bf16.mxu1 %vm425_vm0, %v424_v0 }
 0x102   :  { %406 = vmatmul.mubr.msk.bf16.gmra.mxu1 %vm106_vm1, %v422_v17 }
 0x103   :  { %409 = vmatprep.mubr.msk.bf16.mxu1 %vm425_vm0, %v424_v0 }
 0x10a   :  { %410 = vmatmul.mubr.msk.bf16.gmra.mxu1 %vm106_vm1, %v423_v18 }
 0x1ba   :  { %v288_v20 = vpop.f32.mrf.mxu1 }
 0x1bb   :  { %v289_v21 = vadd.f32 %v288_v20, %v203_v19 }
 0x1bc   :  { %v403_v22 = vpop.f32.mrf.mxu1 }
 0x1bd   :  { %v311_v23 = vadd.f32 %v289_v21, %v502_v8 }
 0x1be   :  { %v291_v26 = vpop.f32.mrf.mxu1 }
 0x1bf   :  { %v317_v0 = vmul.f32 %v481_v3, %v311_v23  ;;  %v292_v27 = vadd.f32 %v291_v26, %v208_v24 }
 0x1c0   :  { %v404_v28 = vpop.f32.mrf.mxu1 }
 0x1c1   :  { %v329_v29 = vadd.f32 %v323_v25, %v317_v0  ;;  %v312_v30 = vadd.f32 %v292_v27, %v511_v12 }
 0x1c2   :  { %v296_v8 = vpop.f32.mrf.mxu1 }
 0x1c3   :  { %v335_v33 = vmul.f32 %v481_v3, %v329_v29  ;;  %v318_v34 = vmul.f32 %v481_v3, %v312_v30  ;;  %v297_v35 = vadd.f32 %v296_v8, %v213_v31 }
 0x1c4   :  { %v407_v36 = vpop.f32.mrf.mxu1 }
 0x1c5   :  { %342 = vst.msk [vmem:[%s665_s7] sm:$0xff] %vm341_vm2, %v335_v33  ;;  %v330_v37 = vadd.f32 %v324_v32, %v318_v34  ;;  %v313_v12 = vadd.f32 %v297_v35, %v492_v6 }
 0x1c6   :  { %v299_v40 = vpop.f32.mrf.mxu1 }
 0x1c7   :  { %v336_v41 = vmul.f32 %v481_v3, %v330_v37  ;;  %v319_v42 = vmul.f32 %v481_v3, %v313_v12  ;;  %v300_v43 = vadd.f32 %v299_v40, %v218_v38 }
 0x1c8   :  { %v408_v44 = vpop.f32.mrf.mxu1 }
 0x1c9   :  { %343 = vst.msk [vmem:[%s665_s7 + $0x8] sm:$0xff] %vm341_vm2, %v336_v41  ;;  %v331_v45 = vadd.f32 %v325_v39, %v319_v42  ;;  %v314_v6 = vadd.f32 %v300_v43, %v497_v7 }
 0x1ca   :  { %v304_v48 = vpop.f32.mrf.mxu1 }
 0x1cb   :  { %v337_v49 = vmul.f32 %v481_v3, %v331_v45  ;;  %v320_v50 = vmul.f32 %v481_v3, %v314_v6  ;;  %v305_v51 = vadd.f32 %v304_v48, %v223_v46 }
 0x1cc   :  { %v411_v52 = vpop.f32.mrf.mxu1 }
 0x1cd   :  { %344 = vst.msk [vmem:[%s665_s7 + $0x10] sm:$0xff] %vm341_vm2, %v337_v49  ;;  %v332_v53 = vadd.f32 %v326_v47, %v320_v50  ;;  %v315_v7 = vadd.f32 %v305_v51, %v471_v1 }
 0x1ce   :  { %v307_v56 = vpop.f32.mrf.mxu1 }
 0x1cf   :  { %v338_v57 = vmul.f32 %v481_v3, %v332_v53  ;;  %v321_v58 = vmul.f32 %v481_v3, %v315_v7  ;;  %v308_v59 = vadd.f32 %v307_v56, %v228_v54 }
 0x1d0   :  { %v412_v60 = vpop.f32.mrf.mxu1 }
 0x1d1   :  { %345 = vst.msk [vmem:[%s665_s7 + $0x18] sm:$0xff] %vm341_vm2, %v338_v57  ;;  %v333_v61 = vadd.f32 %v327_v55, %v321_v58  ;;  %v316_v1 = vadd.f32 %v308_v59, %v476_v2 }
 0x1d3   :  { %v339_v63 = vmul.f32 %v481_v3, %v333_v61  ;;  %v322_v4 = vmul.f32 %v481_v3, %v316_v1 }
 0x1d5   :  { %346 = vst.msk [vmem:[%s665_s7 + $0x20] sm:$0xff] %vm341_vm2, %v339_v63  ;;  %v334_v5 = vadd.f32 %v328_v62, %v322_v4 }
 0x1d7   :  { %v340_v9 = vmul.f32 %v481_v3, %v334_v5 }
 0x1d9   :  { %347 = vst.msk [vmem:[%s665_s7 + $0x28] sm:$0xff] %vm341_vm2, %v340_v9 }

// kernel: tts_forward.11
= control target key start
LH: loop header
LB: loop body
LE: loop exit
PB: predicated region body
PF: predicated region fallthrough
CT: control target
= control target key end

     0   :  { %v118_v0 = vlaneseq  ;;  %v399_v1 = vmov 0.0   ;;  %vm400_vm0 = vmmov 0   ;;  %v401_v10 = vmov 0   ;;  %s573_s0 = inlined_call_operand.vmem [shape: f32[48,16], index: 0, kind: input, shape index: {}]   ;;  %s574_s1 = inlined_call_operand.vmem [shape: f32[1,16], index: 1, kind: input, shape index: {}]   ;;  %s575_s7 = inlined_call_operand.<no memory space> [shape: f32[1,1], index: 7, kind: input, shape index: {}]   ;;  %s576_s4 = inlined_call_operand.vmem [shape: bf16[48,48], index: 4, kind: input, shape index: {}]   ;;  %s577_s2 = inlined_call_operand.vmem [shape: bf16[16,48], index: 2, kind: input, shape index: {}]   ;;  %s578_s5 = inlined_call_operand.vmem [shape: f32[48,1], index: 5, kind: input, shape index: {}]   ;;  %s579_s3 = inlined_call_operand.vmem [shape: f32[16,1], index: 3, kind: input, shape index: {}]   ;;  %s580_s8 = inlined_call_operand.vmem [shape: f32[16,16], index: 8, kind: output, shape index: {0}]   ;;  %s581_s6 = inlined_call_operand.vmem [shape: bf16[1,48], index: 6, kind: input, shape index: {}]   ;;  %s582_s9 = inlined_call_operand.vmem [shape: f32[1,16], index: 9, kind: output, shape index: {1}]  }
   0x1   :  { %362 = vmatprep.subr.bf16.mxu1 %v399_v1  ;;  %v38_v2 = vld [vmem:[%s573_s0 + $0x20] sm:$0xff]  ;;  %v39_v3 = vld [vmem:[%s573_s0 + $0x28] sm:$0xff]  ;;  %368 = vmatprep.mubr.msk.bf16.mxu1 %vm400_vm0, %v399_v1  ;;  %v15_v4 = vstv %s575_s7  ;;  %v36_v7 = vld [vmem:[%s573_s0 + $0x10] sm:$0xff]  ;;  %vm63_vm1 = vcmask 392192   ;;  %vm108_vm2 = vcmask 130048   ;;  %vm319_vm3 = vcmask 122880  }
   0x2   :  { %v467_v5 = vld [vmem:[%s574_s1] sm:$0x1]  ;;  %v469_v6 = vshrl.u32 %v118_v0, 7  ;;  %352 = vmatprep.subr.bf16.mxu0 %v399_v1  ;;  %v45_v8 = vpack.c.bf16 %v39_v3, %v38_v2  ;;  %358 = vmatprep.mubr.msk.bf16.mxu0 %vm400_vm0, %v399_v1  ;;  %16 = vst [vmem:[#allocation2] sm:$0x1] %v15_v4  ;;  %v37_v9 = vld [vmem:[%s573_s0 + $0x18] sm:$0xff] }
   0x3   :  { %393 = vset.pattern.permute.xlu0 %v401_v10  ;;  %394 = vset.pattern.permute.xlu1 %v401_v10  ;;  %v44_v12 = vpack.c.bf16 %v37_v9, %v36_v7  ;;  %v34_v13 = vld [vmem:[%s573_s0] sm:$0xff]  ;;  %v35_v15 = vld [vmem:[%s573_s0 + $0x8] sm:$0xff]  ;;  %v134_v22 = vld [vmem:[%s578_s5 + $0x10] sm:$0xff] }
   0x4   :  { %v120_v11 = vsub.s32 0, %v469_v6  ;;  %353 = vmatpush3.bf16.msra.mxu0 %v45_v8  ;;  %v43_v16 = vpack.c.bf16 %v35_v15, %v34_v13  ;;  %v136_v17 = vld [vmem:[%s578_s5 + $0x20] sm:$0xff]  ;;  %v137_v24 = vld [vmem:[%s578_s5 + $0x28] sm:$0xff]  ;;  %150 = vperm.xlu1 %394, %v134_v22   ;;  %v135_v26 = vld [vmem:[%s578_s5 + $0x18] sm:$0xff] }
   0x5   :  { %354 = vmatprep.subr.bf16.mxu0 %v399_v1  ;;  %160 = vperm.xlu0 %393, %v136_v17   ;;  %v397_v25 = vld [vmem:[%s577_s2] sm:$0xff]   ;;  %v133_v31 = vld [vmem:[%s578_s5 + $0x8] sm:$0xff]  ;;  %v398_v38 = vld [vmem:[%s576_s4 + $0x10] sm:$0xff]  }
   0x6   :  { %v488_v14 = vrot.slane %v467_v5, %v120_v11  ;;  %v132_v30 = vld [vmem:[%s578_s5] sm:$0xff]  ;;  %v47_v36 = vld [vmem:[%s579_s3 + $0x8] sm:$0xff] }
   0x7   :  { %v395_v34 = vld [vmem:[%s576_s4] sm:$0xff]   ;;  %v396_v37 = vld [vmem:[%s576_s4 + $0x8] sm:$0xff]  }
   0x8   :  { %v127_v18 = vmul.f32 %v488_v14, %v38_v2  ;;  %v128_v19 = vmul.f32 %v488_v14, %v39_v3  ;;  %v125_v20 = vmul.f32 %v488_v14, %v36_v7  ;;  %v126_v21 = vmul.f32 %v488_v14, %v37_v9  ;;  %355 = vmatpush3.bf16.msra.mxu0 %v44_v12  ;;  %v46_v35 = vld [vmem:[%s579_s3] sm:$0xff] }
   0x9   :  { %356 = vmatprep.subr.bf16.mxu0 %v399_v1  ;;  %v123_v28 = vmul.f32 %v488_v14, %v34_v13  ;;  %v124_v29 = vmul.f32 %v488_v14, %v35_v15  ;;  %165 = vperm.xlu0 %393, %v137_v24   ;;  %v265_v33 = vld [vmem:[#allocation2] sm:$0x1] }
   0xa   :  { %v131_v23 = vpack.c.bf16 %v128_v19, %v127_v18  ;;  %v130_v27 = vpack.c.bf16 %v126_v21, %v125_v20  ;;  %155 = vperm.xlu1 %394, %v135_v26  }
   0xb   :  { %v129_v32 = vpack.c.bf16 %v124_v29, %v123_v28  ;;  %v255_v28 = vld [vmem:[%s581_s6] sm:$0x1] }
   0xc   :  { %363 = vmatpush3.bf16.msra.mxu1 %v131_v23  ;;  %357 = vmatpush3.bf16.msra.mxu0 %v43_v16 }
   0xd   :  { %364 = vmatprep.subr.bf16.mxu1 %v399_v1  ;;  %380 = vmatprep.subr.bf16.mxu0 %v399_v1 }
   0xe   :  { %140 = vperm.xlu0 %393, %v132_v30   ;;  %145 = vperm.xlu1 %394, %v133_v31  }
   0xf   :  { %359 = vmatmul.mubr.msk.bf16.vlgmr.msra.gmra.mxu0 %vm63_vm1, %v397_v25 }
  0x10   :  { %365 = vmatpush3.bf16.msra.mxu1 %v130_v27  ;;  %386 = vmatprep.mubr.msk.bf16.mxu0 %vm400_vm0, %v399_v1 }
  0x11   :  { %366 = vmatprep.subr.bf16.mxu1 %v399_v1 }
  0x12   :  { %268 = vperm.xlu0 %393, %v265_v33   ;;  %50 = vperm.xlu1 %394, %v46_v35  }
  0x14   :  { %367 = vmatpush3.bf16.msra.mxu1 %v129_v32 }
  0x16   :  { %55 = vperm.xlu0 %393, %v47_v36  }
  0x17   :  { %369 = vmatmul.mubr.msk.bf16.vlgmr.msra.gmra.mxu1 %vm63_vm1, %v395_v34 }
  0x18   :  { %372 = vmatprep.mubr.msk.bf16.mxu1 %vm400_vm0, %v399_v1 }
  0x1f   :  { %373 = vmatmul.mubr.msk.bf16.gmra.mxu1 %vm63_vm1, %v396_v37 }
  0x20   :  { %376 = vmatprep.mubr.msk.bf16.mxu1 %vm400_vm0, %v399_v1 }
  0x27   :  { %377 = vmatmul.mubr.msk.bf16.gmra.mxu1 %vm63_vm1, %v398_v38 }
  0x7f   :  { %v151_v40 = vpop.permute.xlu1 %150 }
  0x80   :  { %v161_v39 = vpop.permute.xlu0 %160 }
  0x84   :  { %v166_v41 = vpop.permute.xlu0 %165 }
  0x85   :  { %v156_v42 = vpop.permute.xlu1 %155 }
  0x89   :  { %v141_v43 = vpop.permute.xlu0 %140  ;;  %v146_v44 = vpop.permute.xlu1 %145 }
  0x8d   :  { %v269_v45 = vpop.permute.xlu0 %268  ;;  %v51_v46 = vpop.permute.xlu1 %50 }
  0x8e   :  { %v274_v29 = vrot.slane %v269_v45, %v120_v11 }
  0x91   :  { %v56_v50 = vpop.permute.xlu0 %55 }
  0xcf   :  { %v101_v47 = vpop.f32.mrf.mxu0 }
  0xd0   :  { %v102_v48 = vadd.f32 %v101_v47, %v51_v46 }
  0xd1   :  { %v360_v49 = vpop.f32.mrf.mxu0 }
  0xd2   :  { %109 = vst.msk [vmem:[%s580_s8] sm:$0xff] %vm108_vm2, %v102_v48 }
  0xd3   :  { %v104_v51 = vpop.f32.mrf.mxu0 }
  0xd4   :  { %v105_v52 = vadd.f32 %v104_v51, %v56_v50 }
  0xd5   :  { %v361_v53 = vpop.f32.mrf.mxu0 }
  0xd6   :  { %110 = vst.msk [vmem:[%s580_s8 + $0x8] sm:$0xff] %vm108_vm2, %v105_v52 }
  0xd7   :  { %v226_v54 = vpop.f32.mrf.mxu1 }
  0xd8   :  { %v227_v15 = vadd.f32 %v226_v54, %v141_v43 }
  0xd9   :  { %v370_v55 = vpop.f32.mrf.mxu1 }
  0xda   :  { %v249_v22 = vmax.f32 %v227_v15, 0.0 }
  0xdb   :  { %v229_v56 = vpop.f32.mrf.mxu1 }
  0xdc   :  { %v230_v10 = vadd.f32 %v229_v56, %v146_v44  ;;  %v256_v26 = vmul.f32 %v249_v22, %v488_v14 }
  0xdd   :  { %v371_v57 = vpop.f32.mrf.mxu1 }
  0xde   :  { %v250_v19 = vmax.f32 %v230_v10, 0.0 }
  0xdf   :  { %v234_v58 = vpop.f32.mrf.mxu1 }
  0xe0   :  { %v235_v4 = vadd.f32 %v234_v58, %v151_v40  ;;  %v257_v24 = vmul.f32 %v250_v19, %v488_v14 }
  0xe1   :  { %v374_v59 = vpop.f32.mrf.mxu1 }
  0xe2   :  { %v251_v16 = vmax.f32 %v235_v4, 0.0  ;;  %v262_v27 = vpack.c.bf16 %v257_v24, %v256_v26 }
  0xe3   :  { %v237_v60 = vpop.f32.mrf.mxu1 }
  0xe4   :  { %v238_v2 = vadd.f32 %v237_v60, %v156_v42  ;;  %v258_v23 = vmul.f32 %v251_v16, %v488_v14 }
  0xe5   :  { %v375_v61 = vpop.f32.mrf.mxu1 }
  0xe6   :  { %v252_v12 = vmax.f32 %v238_v2, 0.0 }
  0xe7   :  { %v242_v62 = vpop.f32.mrf.mxu1 }
  0xe8   :  { %v243_v63 = vadd.f32 %v242_v62, %v161_v39  ;;  %v259_v20 = vmul.f32 %v252_v12, %v488_v14 }
  0xe9   :  { %v378_v0 = vpop.f32.mrf.mxu1 }
  0xea   :  { %v253_v7 = vmax.f32 %v243_v63, 0.0  ;;  %v263_v25 = vpack.c.bf16 %v259_v20, %v258_v23 }
  0xeb   :  { %v245_v3 = vpop.f32.mrf.mxu1 }
  0xec   :  { %v246_v8 = vadd.f32 %v245_v3, %v166_v41  ;;  %v260_v17 = vmul.f32 %v253_v7, %v488_v14 }
  0xed   :  { %v379_v9 = vpop.f32.mrf.mxu1 }
  0xee   :  { %v254_v13 = vmax.f32 %v246_v8, 0.0 }
  0xf0   :  { %v261_v18 = vmul.f32 %v254_v13, %v488_v14 }
  0xf2   :  { %v264_v21 = vpack.c.bf16 %v261_v18, %v260_v17 }
  0xf4   :  { %381 = vmatpush3.bf16.msra.mxu0 %v264_v21 }
  0xf5   :  { %382 = vmatprep.subr.bf16.mxu0 %v399_v1 }
  0xf8   :  { %383 = vmatpush3.bf16.msra.mxu0 %v263_v25 }
  0xf9   :  { %384 = vmatprep.subr.bf16.mxu0 %v399_v1 }
  0xfc   :  { %385 = vmatpush3.bf16.msra.mxu0 %v262_v27 }
  0xff   :  { %387 = vmatmul.mubr.msk.bf16.vlgmr.msra.gmra.mxu0 %vm63_vm1, %v255_v28 }
 0x1bf   :  { %v312_v30 = vpop.f32.mrf.mxu0 }
 0x1c0   :  { %v313_v31 = vadd.f32 %v312_v30, %v274_v29 }
 0x1c1   :  { %v388_v32 = vpop.f32.mrf.mxu0 }
 0x1c2   :  { %v318_v14 = vmul.f32 %v313_v31, %v467_v5 }
 0x1c3   :  { %v315_v33 = vpop.f32.mrf.mxu0 }
 0x1c4   :  { %320 = vst.msk [vmem:[%s582_s9] sm:$0x1] %vm319_vm3, %v318_v14 }
 0x1c5   :  { %v389_v1 = vpop.f32.mrf.mxu0 }

// kernel: tts_forward.9
= control target key start
LH: loop header
LB: loop body
LE: loop exit
PB: predicated region body
PF: predicated region fallthrough
CT: control target
= control target key end

     0   :  { %v1805_v0 = vmov 0.0   ;;  %vm1806_vm0 = vmmov 0   ;;  %v1807_v9 = vmov 0   ;;  %vm246_vm1 = vcmask 392192   ;;  %s2470_s0 = inlined_call_operand.vmem [shape: f32[48,16], index: 0, kind: input, shape index: {}]   ;;  %s2471_s1 = inlined_call_operand.vmem [shape: f32[1,16], index: 1, kind: input, shape index: {}]   ;;  %s2472_s3 = inlined_call_operand.vmem [shape: bf16[144,48], index: 3, kind: input, shape index: {}]   ;;  %s2473_s4 = inlined_call_operand.vmem [shape: f32[144,1], index: 4, kind: input, shape index: {}]   ;;  %s2474_s2 = inlined_call_operand.vmem [shape: f32[16,16], index: 2, kind: input, shape index: {}]   ;;  %s2475_s6 = inlined_call_operand.vmem [shape: f32[48,1], index: 6, kind: input, shape index: {}]   ;;  %s2476_s7 = inlined_call_operand.vmem [shape: f32[48,1], index: 7, kind: input, shape index: {}]   ;;  %s2477_s8 = inlined_call_operand.vmem [shape: f32[48,1], index: 8, kind: input, shape index: {}]   ;;  %s2478_s10 = inlined_call_operand.vmem [shape: f32[96,1], index: 10, kind: input, shape index: {}]   ;;  %s2479_s12 = inlined_call_operand.vmem [shape: f32[48,1], index: 12, kind: input, shape index: {}]   ;;  %s2480_s13 = inlined_call_operand.vmem [shape: f32[48,1], index: 13, kind: input, shape index: {}]   ;;  %s2481_s14 = inlined_call_operand.vmem [shape: f32[48,1], index: 14, kind: input, shape index: {}]   ;;  %s2482_s5 = inlined_call_operand.vmem [shape: bf16[48,48], index: 5, kind: input, shape index: {}]   ;;  %s2483_s9 = inlined_call_operand.vmem [shape: bf16[96,48], index: 9, kind: input, shape index: {}]   ;;  %s2484_s11 = inlined_call_operand.vmem [shape: bf16[48,96], index: 11, kind: input, shape index: {}]   ;;  %s2485_s15 = inlined_call_operand.vmem [shape: f32[48,16], index: 15, kind: output, shape index: {}]  }
   0x1   :  { %1614 = vmatprep.subr.bf16.mxu0 %v1805_v0  ;;  %v1892_v1 = vld [vmem:[%s2470_s0 + $0x20] sm:$0xff]  ;;  %v1897_v2 = vld [vmem:[%s2470_s0 + $0x28] sm:$0xff]  ;;  %1620 = vmatprep.mubr.msk.bf16.mxu0 %vm1806_vm0, %v1805_v0  ;;  %v1913_v6 = vld [vmem:[%s2470_s0 + $0x10] sm:$0xff]  ;;  %vm403_vm2 = vcmask 1043456   ;;  %vm399_vm3 = vcmask 195584   ;;  %vm456_vm4 = vcmask 130048  }
   0x2   :  { %v1902_v3 = vld [vmem:[%s2471_s1] ss:$0 sm:$0xff]  ;;  %v1918_v7 = vld [vmem:[%s2470_s0 + $0x18] sm:$0xff]  ;;  %1761 = vset.pattern.permute.xlu0 %v1807_v9  ;;  %1762 = vset.pattern.permute.xlu1 %v1807_v9  ;;  %v1932_v12 = vld [vmem:[%s2470_s0 + $0x8] sm:$0xff]  ;;  %vm1280_vm5 = vcmask 785408  }
   0x3   :  { %v88_v4 = vmul.f32 %v1902_v3, %v1892_v1  ;;  %v89_v5 = vmul.f32 %v1902_v3, %v1897_v2  ;;  %v1923_v8 = vld [vmem:[%s2470_s0] sm:$0xff]  ;;  %v86_v10 = vmul.f32 %v1902_v3, %v1913_v6  ;;  %v87_v11 = vmul.f32 %v1902_v3, %v1918_v7  ;;  %1656 = vmatprep.subr.bf16.mxu1 %v1805_v0  ;;  %v94_v18 = vld [vmem:[%s2473_s4 + $0x8] sm:$0xff]  ;;  %v95_v19 = vld [vmem:[%s2473_s4 + $0x10] sm:$0xff] }
   0x4   :  { %1660 = vmatprep.mubr.msk.bf16.mxu1 %vm1806_vm0, %v1805_v0  ;;  %v84_v15 = vmul.f32 %v1902_v3, %v1923_v8  ;;  %v85_v16 = vmul.f32 %v1902_v3, %v1932_v12  ;;  %v93_v17 = vld [vmem:[%s2473_s4] sm:$0xff]  ;;  %123 = vperm.xlu1 %1762, %v95_v19   ;;  %v99_v23 = vld [vmem:[%s2473_s4 + $0x30] sm:$0xff]  ;;  %v100_v24 = vld [vmem:[%s2473_s4 + $0x38] sm:$0xff] }
   0x5   :  { %v92_v13 = vpack.c.bf16 %v89_v5, %v88_v4  ;;  %v91_v14 = vpack.c.bf16 %v87_v11, %v86_v10  ;;  %113 = vperm.xlu0 %1761, %v93_v17   ;;  %v101_v21 = vld [vmem:[%s2473_s4 + $0x40] sm:$0xff]  ;;  %v1764_v25 = vld [vmem:[%s2472_s3 + $0x8] sm:$0xff]   ;;  %v1765_v26 = vld [vmem:[%s2472_s3 + $0x10] sm:$0xff]  }
   0x6   :  { %v90_v20 = vpack.c.bf16 %v85_v16, %v84_v15  ;;  %v1763_v22 = vld [vmem:[%s2472_s3] sm:$0xff]   ;;  %v1766_v27 = vld [vmem:[%s2472_s3 + $0x18] sm:$0xff]   ;;  %v1768_v10 = vld [vmem:[%s2472_s3 + $0x28] sm:$0xff]  }
   0x7   :  { %1615 = vmatpush3.bf16.msra.mxu0 %v92_v13  ;;  %v1767_v28 = vld [vmem:[%s2472_s3 + $0x20] sm:$0xff]   ;;  %v1769_v11 = vld [vmem:[%s2472_s3 + $0x30] sm:$0xff]   ;;  %v1770_v13 = vld [vmem:[%s2472_s3 + $0x38] sm:$0xff]  }
   0x8   :  { %1616 = vmatprep.subr.bf16.mxu0 %v1805_v0  ;;  %153 = vperm.xlu1 %1762, %v101_v21   ;;  %v59_v16 = vld [vmem:[%s2474_s2 + $0x8] sm:$0xff] }
   0x9   :  { %118 = vperm.xlu0 %1761, %v94_v18   ;;  %v1536_v18 = vadd.f32 -1.0, %v59_v16 }
   0xb   :  { %1617 = vmatpush3.bf16.msra.mxu0 %v91_v14  ;;  %v58_v14 = vld [vmem:[%s2474_s2] sm:$0xff] }
   0xc   :  { %1618 = vmatprep.subr.bf16.mxu0 %v1805_v0  ;;  %148 = vperm.xlu1 %1762, %v100_v24   ;;  %v1535_v15 = vadd.f32 -1.0, %v58_v14 }
   0xd   :  { %143 = vperm.xlu0 %1761, %v99_v23   ;;  %v2030_v23 = vmul.f32 1e+09, %v1536_v18 }
   0xe   :  { %v2027_v17 = vmul.f32 1e+09, %v1535_v15 }
   0xf   :  { %1619 = vmatpush3.bf16.msra.mxu0 %v90_v20 }
  0x10   :  { %1720 = vmatprep.subr.bf16.mxu0 %v1805_v0 }
  0x12   :  { %1621 = vmatmul.mubr.msk.bf16.vlgmr.msra.gmra.mxu0 %vm246_vm1, %v1763_v22 }
  0x13   :  { %1624 = vmatprep.mubr.msk.bf16.mxu0 %vm1806_vm0, %v1805_v0 }
  0x1a   :  { %1625 = vmatmul.mubr.msk.bf16.gmra.mxu0 %vm246_vm1, %v1764_v25 }
  0x1b   :  { %1628 = vmatprep.mubr.msk.bf16.mxu0 %vm1806_vm0, %v1805_v0 }
  0x22   :  { %1629 = vmatmul.mubr.msk.bf16.gmra.mxu0 %vm246_vm1, %v1765_v26 }
  0x23   :  { %1632 = vmatprep.mubr.msk.bf16.mxu0 %vm1806_vm0, %v1805_v0 }
  0x2a   :  { %1633 = vmatmul.mubr.msk.bf16.gmra.mxu0 %vm246_vm1, %v1766_v27 }
  0x2b   :  { %1636 = vmatprep.mubr.msk.bf16.mxu0 %vm1806_vm0, %v1805_v0 }
  0x32   :  { %1637 = vmatmul.mubr.msk.bf16.gmra.mxu0 %vm246_vm1, %v1767_v28 }
  0x33   :  { %1640 = vmatprep.mubr.msk.bf16.mxu0 %vm1806_vm0, %v1805_v0 }
  0x3a   :  { %1641 = vmatmul.mubr.msk.bf16.gmra.mxu0 %vm246_vm1, %v1768_v10 }
  0x3b   :  { %1644 = vmatprep.mubr.msk.bf16.mxu0 %vm1806_vm0, %v1805_v0 }
  0x42   :  { %1645 = vmatmul.mubr.msk.bf16.gmra.mxu0 %vm246_vm1, %v1769_v11 }
  0x43   :  { %1648 = vmatprep.mubr.msk.bf16.mxu0 %vm1806_vm0, %v1805_v0 }
  0x4a   :  { %1649 = vmatmul.mubr.msk.bf16.gmra.mxu0 %vm246_vm1, %v1770_v13 }
  0x4b   :  { %1652 = vmatprep.mubr.msk.bf16.mxu0 %vm1806_vm0, %v1805_v0 }
  0x7f   :  { %v124_v38 = vpop.permute.xlu1 %123 }
  0x80   :  { %v114_v29 = vpop.permute.xlu0 %113 }
  0x83   :  { %v154_v52 = vpop.permute.xlu1 %153 }
  0x84   :  { %v119_v32 = vpop.permute.xlu0 %118 }
  0x87   :  { %v149_v57 = vpop.permute.xlu1 %148 }
  0x88   :  { %v144_v61 = vpop.permute.xlu0 %143 }
  0xd2   :  { %v308_v30 = vpop.f32.mrf.mxu0 }
  0xd3   :  { %v309_v34 = vadd.f32 %v308_v30, %v114_v29  ;;  %v96_v30 = vld [vmem:[%s2473_s4 + $0x18] sm:$0xff] }
  0xd4   :  { %v1622_v31 = vpop.f32.mrf.mxu0 }
  0xd5   :  { %v98_v31 = vld [vmem:[%s2473_s4 + $0x28] sm:$0xff] }
  0xd6   :  { %v311_v33 = vpop.f32.mrf.mxu0 }
  0xd7   :  { %v312_v35 = vadd.f32 %v311_v33, %v119_v32  ;;  %v97_v32 = vld [vmem:[%s2473_s4 + $0x20] sm:$0xff] }
  0xd8   :  { %v1623_v36 = vpop.f32.mrf.mxu0 }
  0xd9   :  { %v379_v37 = vpack.c.bf16 %v312_v35, %v309_v34 }
  0xda   :  { %v316_v39 = vpop.f32.mrf.mxu0 }
  0xdb   :  { %v317_v40 = vadd.f32 %v316_v39, %v124_v38  ;;  %383 = vxpose.xlu0.c.b16.start [1/2] (short) (narrow) %v379_v37, 16 }
  0xdc   :  { %v1626_v41 = vpop.f32.mrf.mxu0 }
  0xdd   :  { %v380_v42 = vpack.c.bf16 %v317_v40, %v317_v40 }
  0xde   :  { %v1992_v43 = vpop.f32.mrf.mxu0 }
  0xdf   :  { %384 = vxpose.xlu0.c.b16.end [2/2] (short) (narrow) %v380_v42, 16 }
  0xe0   :  { %v1627_v44 = vpop.f32.mrf.mxu0 }
  0xe2   :  { %v1994_v45 = vpop.f32.mrf.mxu0 }
  0xe4   :  { %v1630_v46 = vpop.f32.mrf.mxu0 }
  0xe6   :  { %v1996_v47 = vpop.f32.mrf.mxu0 }
  0xe8   :  { %v1631_v48 = vpop.f32.mrf.mxu0 }
  0xea   :  { %v332_v49 = vpop.f32.mrf.mxu0 }
  0xeb   :  { %v333_v63 = vadd.f32 %v332_v49, %v144_v61  ;;  %v102_v61 = vld [vmem:[%s2473_s4 + $0x48] sm:$0xff] }
  0xec   :  { %v1634_v50 = vpop.f32.mrf.mxu0 }
  0xee   :  { %v335_v51 = vpop.f32.mrf.mxu0 }
  0xef   :  { %v336_v59 = vadd.f32 %v335_v51, %v149_v57  ;;  %v107_v57 = vld [vmem:[%s2473_s4 + $0x70] sm:$0xff] }
  0xf0   :  { %v1635_v53 = vpop.f32.mrf.mxu0 }
  0xf1   :  { %v381_v5 = vpack.c.bf16 %v336_v59, %v333_v63  ;;  %v106_v53 = vld [vmem:[%s2473_s4 + $0x68] sm:$0xff] }
  0xf2   :  { %v340_v54 = vpop.f32.mrf.mxu0 }
  0xf3   :  { %v341_v55 = vadd.f32 %v340_v54, %v154_v52 }
  0xf4   :  { %v1638_v56 = vpop.f32.mrf.mxu0 }
  0xf5   :  { %v382_v58 = vpack.c.bf16 %v341_v55, %v341_v55  ;;  %v104_v55 = vld [vmem:[%s2473_s4 + $0x58] sm:$0xff] }
  0xf6   :  { %v1998_v60 = vpop.f32.mrf.mxu0 }
  0xf7   :  { %v405_v62 = vsel %vm403_vm2, %v382_v58, 0  ;;  %v105_v58 = vld [vmem:[%s2473_s4 + $0x60] sm:$0xff] }
  0xf8   :  { %1657 = vmatpush3.bf16.msra.mxu1 %v405_v62  ;;  %v1639_v4 = vpop.f32.mrf.mxu0  ;;  %v103_v62 = vld [vmem:[%s2473_s4 + $0x50] sm:$0xff] }
  0xf9   :  { %1658 = vmatprep.subr.bf16.mxu1 %v1805_v0 }
  0xfa   :  { %v2044_v33 = vpop.f32.mrf.mxu0 }
  0xfc   :  { %1659 = vmatpush3.bf16.msra.mxu1 %v381_v5  ;;  %v1642_v34 = vpop.f32.mrf.mxu0 }
  0xfe   :  { %v2046_v35 = vpop.f32.mrf.mxu0 }
 0x100   :  { %v1643_v36 = vpop.f32.mrf.mxu0 }
 0x102   :  { %v356_v50 = vpop.f32.mrf.mxu0 }
 0x104   :  { %v1646_v51 = vpop.f32.mrf.mxu0 }
 0x106   :  { %v359_v52 = vpop.f32.mrf.mxu0 }
 0x108   :  { %v1647_v54 = vpop.f32.mrf.mxu0 }
 0x10a   :  { %v364_v56 = vpop.f32.mrf.mxu0 }
 0x10c   :  { %v1650_v59 = vpop.f32.mrf.mxu0 }
 0x10e   :  { %v2068_v63 = vpop.f32.mrf.mxu0 }
 0x110   :  { %v1651_v4 = vpop.f32.mrf.mxu0 }
 0x13d   :  { %v391_v9 = vpop.trf.xlu0 }
 0x13e   :  { %1661 = vmatmul.mubr.msk.bf16.vlgmr.msra.gmra.mxu1 %vm399_vm3, %v391_v9 }
 0x1fe   :  { %v441_v19 = vpop.f32.mrf.mxu1 }
 0x1ff   :  { %v448_v20 = vmul.f32 0.20412415, %v441_v19 }
 0x200   :  { %v1662_v21 = vpop.f32.mrf.mxu1 }
 0x201   :  { %v454_v22 = vadd.f32 %v2027_v17, %v448_v20 }
 0x202   :  { %v444_v24 = vpop.f32.mrf.mxu1 }
 0x203   :  { %v449_v25 = vmul.f32 0.20412415, %v444_v24  ;;  %v457_v26 = vsel %vm456_vm4, %v454_v22, -inf }
 0x204   :  { %458 = vmax.xlane.f32.xlu1 %v457_v26  ;;  %v1663_v27 = vpop.f32.mrf.mxu1 }
 0x205   :  { %v455_v28 = vadd.f32 %v2030_v23, %v449_v25 }
 0x207   :  { %v460_v29 = vsel %vm456_vm4, %v455_v28, -inf }
 0x208   :  { %461 = vmax.xlane.f32.xlu0 %v460_v29 }
 0x215   :  { %128 = vperm.xlu1 %1762, %v96_v30  }
 0x219   :  { %138 = vperm.xlu1 %1762, %v98_v31  }
 0x21e   :  { %133 = vperm.xlu0 %1761, %v97_v32  }
 0x28d   :  { %v459_v37 = vpop.xlane.xlu1 %458 }
 0x28e   :  { %v463_v38 = vsub.f32 %v454_v22, %v459_v37 }
 0x290   :  { %v465_v39 = vmul.f32 1.442695, %v463_v38 }
 0x291   :  { %v462_v40 = vpop.xlane.xlu0 %461  ;;  %v129_v5 = vpop.permute.xlu1 %128 }
 0x292   :  { %1784 = vpow2.f32 %v465_v39  ;;  %v464_v41 = vsub.f32 %v455_v28, %v462_v40  ;;  %v320_v13 = vadd.f32 %v1992_v43, %v129_v5 }
 0x294   :  { %v467_v42 = vmul.f32 1.442695, %v464_v41 }
 0x295   :  { %v139_v11 = vpop.permute.xlu1 %138 }
 0x296   :  { %1786 = vpow2.f32 %v467_v42  ;;  %v328_v14 = vadd.f32 %v1996_v47, %v139_v11 }
 0x298   :  { %v540_v16 = vpack.c.bf16 %v328_v14, %v328_v14 }
 0x299   :  { %v134_v9 = vpop.permute.xlu0 %133 }
 0x29a   :  { %v325_v10 = vadd.f32 %v1994_v45, %v134_v9 }
 0x29c   :  { %v539_v15 = vpack.c.bf16 %v325_v10, %v320_v13 }
 0x29f   :  { %v1785_v44 = vpop.eup %1784 }
 0x2a0   :  { %v469_v46 = vsel %vm456_vm4, %v1785_v44, 0.0 }
 0x2a1   :  { %470 = vadd.xlane.f32.xlu1 %v469_v46 }
 0x2a3   :  { %v1787_v48 = vpop.eup %1786 }
 0x2a4   :  { %v472_v49 = vsel %vm456_vm4, %v1787_v48, 0.0 }
 0x2a5   :  { %473 = vadd.xlane.f32.xlu0 %v472_v49 }
 0x2b2   :  { %178 = vperm.xlu1 %1762, %v106_v53  }
 0x2b6   :  { %168 = vperm.xlu1 %1762, %v104_v55  }
 0x2ba   :  { %183 = vperm.xlu1 %1762, %v107_v57  }
 0x2bb   :  { %173 = vperm.xlu0 %1761, %v105_v58  }
 0x2be   :  { %158 = vperm.xlu1 %1762, %v102_v61   ;;  %v108_v61 = vld [vmem:[%s2473_s4 + $0x78] sm:$0xff] }
 0x2bf   :  { %163 = vperm.xlu0 %1761, %v103_v62  }
 0x2e1   :  { %543 = vxpose.xlu1.c.b16.start [1/2] (short) (narrow) %v539_v15, 16 }
 0x2e5   :  { %544 = vxpose.xlu1.c.b16.end [2/2] (short) (narrow) %v540_v16, 16 }
 0x32a   :  { %v471_v18 = vpop.xlane.xlu1 %470 }
 0x32b   :  { %1788 = vrcp.f32 %v471_v18 }
 0x32e   :  { %v474_v19 = vpop.xlane.xlu0 %473  ;;  %v179_v20 = vpop.permute.xlu1 %178 }
 0x32f   :  { %1790 = vrcp.f32 %v474_v19  ;;  %v360_v22 = vadd.f32 %v359_v52, %v179_v20  ;;  %v109_v19 = vld [vmem:[%s2473_s4 + $0x80] sm:$0xff]  ;;  %v110_v20 = vld [vmem:[%s2473_s4 + $0x88] sm:$0xff] }
 0x332   :  { %v169_v25 = vpop.permute.xlu1 %168 }
 0x333   :  { %v352_v30 = vadd.f32 %v2046_v35, %v169_v25  ;;  %v704_v25 = vld [vmem:[%s2475_s6 + $0x18] sm:$0xff] }
 0x335   :  { %v542_v34 = vpack.c.bf16 %v352_v30, %v352_v30  ;;  %v890_v30 = vld [vmem:[%s2476_s7 + $0x18] sm:$0xff] }
 0x336   :  { %v174_v21 = vpop.permute.xlu0 %173  ;;  %v184_v28 = vpop.permute.xlu1 %183 }
 0x337   :  { %v357_v24 = vadd.f32 %v356_v50, %v174_v21  ;;  %v365_v32 = vadd.f32 %v364_v56, %v184_v28  ;;  %v563_v41 = vsel %vm403_vm2, %v542_v34, 0  ;;  %v934_v28 = vld [vmem:[%s2477_s8 + $0x28] sm:$0xff]  ;;  %v931_v34 = vld [vmem:[%s2477_s8 + $0x10] sm:$0xff] }
 0x338   :  { %v1789_v45 = vpop.eup %1788 }
 0x339   :  { %v479_v26 = vpack.c.bf16 %v360_v22, %v357_v24  ;;  %v477_v27 = vmul.f32 %v1789_v45, %v1785_v44  ;;  %v480_v38 = vpack.c.bf16 %v365_v32, %v365_v32  ;;  %v702_v22 = vld [vmem:[%s2475_s6 + $0x8] sm:$0xff]  ;;  %v701_v24 = vld [vmem:[%s2475_s6] sm:$0xff]  ;;  %v932_v32 = vld [vmem:[%s2477_s8 + $0x18] sm:$0xff] }
 0x33a   :  { %v159_v36 = vpop.permute.xlu1 %158  ;;  %v164_v37 = vpop.permute.xlu0 %163  ;;  %v706_v45 = vld [vmem:[%s2475_s6 + $0x28] sm:$0xff] }
 0x33b   :  { %1666 = vmatprep.mubr.msk.bf16.mxu1 %vm456_vm4, %v479_v26  ;;  %v344_v39 = vadd.f32 %v1998_v60, %v159_v36  ;;  %v349_v40 = vadd.f32 %v2044_v33, %v164_v37  ;;  %v1771_v60 = vld [vmem:[%s2472_s3 + $0x40] sm:$0xff]   ;;  %v703_v26 = vld [vmem:[%s2475_s6 + $0x10] sm:$0xff]  ;;  %v888_v36 = vld [vmem:[%s2476_s7 + $0x8] sm:$0xff] }
 0x33c   :  { %v1791_v43 = vpop.eup %1790  ;;  %1653 = vmatmul.mubr.msk.bf16.gmra.mxu0 %vm246_vm1, %v1771_v60  ;;  %v887_v37 = vld [vmem:[%s2476_s7] sm:$0xff]  ;;  %v999_v60 = vld [vmem:[%s2478_s10 + $0x38] sm:$0xff] }
 0x33d   :  { %v478_v47 = vmul.f32 %v1791_v43, %v1787_v48  ;;  %v541_v35 = vpack.c.bf16 %v349_v40, %v344_v39  ;;  %1732 = vmatprep.mubr.msk.bf16.mxu0 %vm1806_vm0, %v1805_v0  ;;  %v705_v43 = vld [vmem:[%s2475_s6 + $0x20] sm:$0xff]  ;;  %v1003_v40 = vld [vmem:[%s2478_s10 + $0x58] sm:$0xff] }
 0x33e   :  { %v929_v39 = vld [vmem:[%s2477_s8] sm:$0xff] }
 0x33f   :  { %v481_v29 = vpack.c.bf16 %v478_v47, %v477_v27  ;;  %v892_v27 = vld [vmem:[%s2476_s7 + $0x28] sm:$0xff]  ;;  %v891_v47 = vld [vmem:[%s2476_s7 + $0x20] sm:$0xff] }
 0x341   :  { %1756 = vmatprep.subr.msk.bf16.mxu1 %vm456_vm4, %v481_v29  ;;  %v489_v31 = vsel %vm456_vm4, %v481_v29, 0  ;;  %v933_v29 = vld [vmem:[%s2477_s8 + $0x20] sm:$0xff] }
 0x342   :  { %1665 = vmatpush3.bf16.xpose.msra.mxu1 %v489_v31  ;;  %v889_v31 = vld [vmem:[%s2476_s7 + $0x10] sm:$0xff] }
 0x343   :  { %1670 = vmatprep.subr.bf16.mxu1 %v1805_v0  ;;  %v551_v42 = vpop.trf.xlu1 }
 0x349   :  { %1667 = vmatmul.mubr.msk.bf16.vlgmr.msra.gmra.mxu1 %vm456_vm4, %v480_v38  ;;  %v930_v38 = vld [vmem:[%s2477_s8 + $0x8] sm:$0xff] }
 0x34a   :  { %1671 = vmatpush3.bf16.msra.mxu1 %v563_v41  ;;  %1674 = vmatprep.mubr.msk.bf16.mxu1 %vm1806_vm0, %v1805_v0  ;;  %v1002_v41 = vld [vmem:[%s2478_s10 + $0x50] sm:$0xff] }
 0x34b   :  { %1672 = vmatprep.subr.bf16.mxu1 %v1805_v0 }
 0x34e   :  { %1673 = vmatpush3.bf16.msra.mxu1 %v541_v35  ;;  %v1001_v35 = vld [vmem:[%s2478_s10 + $0x48] sm:$0xff] }
 0x351   :  { %1675 = vmatmul.mubr.msk.bf16.vlgmr.msra.gmra.mxu1 %vm399_vm3, %v551_v42  ;;  %v1000_v42 = vld [vmem:[%s2478_s10 + $0x40] sm:$0xff] }
 0x3fc   :  { %v2115_v15 = vpop.f32.mrf.mxu0 }
 0x3fe   :  { %v1654_v16 = vpop.f32.mrf.mxu0 }
 0x3ff   :  { %v1457_v16 = vld [vmem:[%s2481_s14] sm:$0xff] }
 0x400   :  { %v2117_v18 = vpop.f32.mrf.mxu0 }
 0x402   :  { %v1655_v21 = vpop.f32.mrf.mxu0 }
 0x403   :  { %v1462_v21 = vld [vmem:[%s2481_s14 + $0x28] sm:$0xff] }
 0x409   :  { %v2092_v33 = vpop.f32.mrf.mxu1 }
 0x40b   :  { %v2094_v44 = vpop.f32.mrf.mxu1 }
 0x40d   :  { %v1669_v46 = vpop.f32.mrf.mxu1 }
 0x40e   :  { %v998_v46 = vld [vmem:[%s2478_s10 + $0x30] sm:$0xff] }
 0x40f   :  { %v2096_v48 = vpop.f32.mrf.mxu1 }
 0x410   :  { %v698_v49 = vpack.c.bf16 %v2096_v48, %v2094_v44  ;;  %v1775_v44 = vld [vmem:[%s2483_s9] sm:$0xff]  }
 0x411   :  { %v599_v50 = vpop.f32.mrf.mxu1 }
 0x412   :  { %v606_v51 = vmul.f32 0.20412415, %v599_v50  ;;  %v997_v50 = vld [vmem:[%s2478_s10 + $0x28] sm:$0xff] }
 0x413   :  { %v1676_v52 = vpop.f32.mrf.mxu1 }
 0x414   :  { %v608_v53 = vadd.f32 %v606_v51, %v2027_v17  ;;  %v996_v51 = vld [vmem:[%s2478_s10 + $0x20] sm:$0xff]  ;;  %v995_v52 = vld [vmem:[%s2478_s10 + $0x18] sm:$0xff] }
 0x415   :  { %v602_v54 = vpop.f32.mrf.mxu1 }
 0x416   :  { %v607_v55 = vmul.f32 0.20412415, %v602_v54  ;;  %v610_v56 = vsel %vm456_vm4, %v608_v53, -inf  ;;  %v993_v54 = vld [vmem:[%s2478_s10 + $0x8] sm:$0xff] }
 0x417   :  { %611 = vmax.xlane.f32.xlu0 %v610_v56  ;;  %v1677_v57 = vpop.f32.mrf.mxu1  ;;  %v1230_v56 = vld [vmem:[%s2479_s12 + $0x8] sm:$0xff] }
 0x418   :  { %v609_v58 = vadd.f32 %v607_v55, %v2030_v23  ;;  %v992_v55 = vld [vmem:[%s2478_s10] sm:$0xff] }
 0x419   :  { %v1229_v57 = vld [vmem:[%s2479_s12] sm:$0xff] }
 0x41a   :  { %v613_v59 = vsel %vm456_vm4, %v609_v58, -inf }
 0x41b   :  { %614 = vmax.xlane.f32.xlu0 %v613_v59  ;;  %v1231_v59 = vld [vmem:[%s2479_s12 + $0x10] sm:$0xff] }
 0x431   :  { %188 = vperm.xlu0 %1761, %v108_v61   ;;  %v1234_v61 = vld [vmem:[%s2479_s12 + $0x28] sm:$0xff] }
 0x4a0   :  { %v612_v62 = vpop.xlane.xlu0 %611 }
 0x4a1   :  { %v616_v4 = vsub.f32 %v608_v53, %v612_v62  ;;  %v994_v53 = vld [vmem:[%s2478_s10 + $0x10] sm:$0xff]  ;;  %v1233_v62 = vld [vmem:[%s2479_s12 + $0x20] sm:$0xff] }
 0x4a3   :  { %v618_v5 = vmul.f32 1.442695, %v616_v4  ;;  %v1416_v4 = vld [vmem:[%s2480_s13 + $0x8] sm:$0xff] }
 0x4a4   :  { %v615_v17 = vpop.xlane.xlu0 %614 }
 0x4a5   :  { %1792 = vpow2.f32 %v618_v5  ;;  %v617_v9 = vsub.f32 %v609_v58, %v615_v17  ;;  %v1232_v58 = vld [vmem:[%s2479_s12 + $0x18] sm:$0xff]  ;;  %v1415_v5 = vld [vmem:[%s2480_s13] sm:$0xff] }
 0x4a6   :  { %v1418_v17 = vld [vmem:[%s2480_s13 + $0x18] sm:$0xff] }
 0x4a7   :  { %v620_v10 = vmul.f32 1.442695, %v617_v9  ;;  %v1417_v9 = vld [vmem:[%s2480_s13 + $0x10] sm:$0xff] }
 0x4a9   :  { %1794 = vpow2.f32 %v620_v10  ;;  %v1420_v10 = vld [vmem:[%s2480_s13 + $0x28] sm:$0xff] }
 0x4b2   :  { %v2107_v11 = vpop.eup %1792 }
 0x4b3   :  { %v622_v23 = vsel %vm456_vm4, %v2107_v11, 0.0 }
 0x4b4   :  { %623 = vadd.xlane.f32.xlu0 %v622_v23  ;;  %v1419_v23 = vld [vmem:[%s2480_s13 + $0x20] sm:$0xff] }
 0x4b6   :  { %v2111_v13 = vpop.eup %1794 }
 0x4b7   :  { %v625_v14 = vsel %vm456_vm4, %v2111_v13, 0.0 }
 0x4b8   :  { %626 = vadd.xlane.f32.xlu1 %v625_v14  ;;  %v1458_v14 = vld [vmem:[%s2481_s14 + $0x8] sm:$0xff] }
 0x4c9   :  { %193 = vperm.xlu1 %1762, %v109_v19   ;;  %v1460_v19 = vld [vmem:[%s2481_s14 + $0x18] sm:$0xff] }
 0x4ca   :  { %198 = vperm.xlu0 %1761, %v110_v20   ;;  %v1459_v20 = vld [vmem:[%s2481_s14 + $0x10] sm:$0xff] }
 0x4cd   :  { %714 = vperm.xlu1 %1762, %v702_v22   ;;  %v1461_v22 = vld [vmem:[%s2481_s14 + $0x20] sm:$0xff] }
 0x4ce   :  { %709 = vperm.xlu0 %1761, %v701_v24   ;;  %v189_v24 = vpop.permute.xlu0 %188 }
 0x4d1   :  { %724 = vperm.xlu1 %1762, %v704_v25  }
 0x4d2   :  { %719 = vperm.xlu0 %1761, %v703_v26  }
 0x4d5   :  { %734 = vperm.xlu1 %1762, %v706_v45  }
 0x4d6   :  { %729 = vperm.xlu0 %1761, %v705_v43   ;;  %v368_v43 = vadd.f32 %v2068_v63, %v189_v24 }
 0x4d9   :  { %920 = vperm.xlu1 %1762, %v892_v27  }
 0x4da   :  { %915 = vperm.xlu0 %1761, %v891_v47  }
 0x4dd   :  { %962 = vperm.xlu1 %1762, %v934_v28  }
 0x4de   :  { %957 = vperm.xlu0 %1761, %v933_v29  }
 0x4e1   :  { %910 = vperm.xlu1 %1762, %v890_v30  }
 0x4e2   :  { %905 = vperm.xlu0 %1761, %v889_v31  }
 0x4e5   :  { %952 = vperm.xlu1 %1762, %v932_v32  }
 0x4e6   :  { %947 = vperm.xlu0 %1761, %v931_v34  }
 0x4e9   :  { %900 = vperm.xlu1 %1762, %v888_v36  }
 0x4ea   :  { %895 = vperm.xlu0 %1761, %v887_v37  }
 0x4ed   :  { %942 = vperm.xlu1 %1762, %v930_v38  }
 0x4ee   :  { %937 = vperm.xlu0 %1761, %v929_v39  }
 0x4f1   :  { %1061 = vperm.xlu1 %1762, %v1003_v40  }
 0x4f2   :  { %1056 = vperm.xlu0 %1761, %v1002_v41   ;;  %v1774_v41 = vld [vmem:[%s2482_s5 + $0x10] sm:$0xff]  }
 0x4f5   :  { %1051 = vperm.xlu1 %1762, %v1001_v35  }
 0x4f6   :  { %1046 = vperm.xlu0 %1761, %v1000_v42  }
 0x4f9   :  { %1041 = vperm.xlu1 %1762, %v999_v60  }
 0x4fa   :  { %1036 = vperm.xlu0 %1761, %v998_v46  }
 0x4fd   :  { %1031 = vperm.xlu1 %1762, %v997_v50  }
 0x4fe   :  { %1026 = vperm.xlu0 %1761, %v996_v51  }
 0x501   :  { %1021 = vperm.xlu1 %1762, %v995_v52  }
 0x502   :  { %1016 = vperm.xlu0 %1761, %v994_v53  }
 0x505   :  { %1011 = vperm.xlu1 %1762, %v993_v54  }
 0x506   :  { %1006 = vperm.xlu0 %1761, %v992_v55  }
 0x509   :  { %1242 = vperm.xlu1 %1762, %v1230_v56  }
 0x50a   :  { %1237 = vperm.xlu0 %1761, %v1229_v57  }
 0x50d   :  { %1252 = vperm.xlu1 %1762, %v1232_v58  }
 0x50e   :  { %1247 = vperm.xlu0 %1761, %v1231_v59  }
 0x511   :  { %1262 = vperm.xlu1 %1762, %v1234_v61  }
 0x512   :  { %1257 = vperm.xlu0 %1761, %v1233_v62  }
 0x515   :  { %1428 = vperm.xlu1 %1762, %v1416_v4  }
 0x516   :  { %1423 = vperm.xlu0 %1761, %v1415_v5  }
 0x519   :  { %1438 = vperm.xlu1 %1762, %v1418_v17  }
 0x51a   :  { %1433 = vperm.xlu0 %1761, %v1417_v9  }
 0x51d   :  { %1448 = vperm.xlu1 %1762, %v1420_v10  }
 0x51e   :  { %1443 = vperm.xlu0 %1761, %v1419_v23  }
 0x521   :  { %1470 = vperm.xlu1 %1762, %v1458_v14  }
 0x522   :  { %1465 = vperm.xlu0 %1761, %v1457_v16  }
 0x525   :  { %1480 = vperm.xlu1 %1762, %v1460_v19  }
 0x526   :  { %1475 = vperm.xlu0 %1761, %v1459_v20  }
 0x529   :  { %1490 = vperm.xlu1 %1762, %v1462_v21  }
 0x52a   :  { %1485 = vperm.xlu0 %1761, %v1461_v22  }
 0x53d   :  { %v624_v25 = vpop.xlane.xlu0 %623 }
 0x53e   :  { %1796 = vrcp.f32 %v624_v25 }
 0x541   :  { %v627_v26 = vpop.xlane.xlu1 %626 }
 0x542   :  { %1798 = vrcp.f32 %v627_v26 }
 0x545   :  { %v194_v45 = vpop.permute.xlu1 %193  ;;  %v199_v34 = vpop.permute.xlu0 %198 }
 0x546   :  { %v373_v27 = vadd.f32 %v2115_v15, %v194_v45  ;;  %v376_v63 = vadd.f32 %v2117_v18, %v199_v34  ;;  %v1772_v18 = vld [vmem:[%s2482_s5] sm:$0xff]  }
 0x548   :  { %v632_v47 = vpack.c.bf16 %v373_v27, %v368_v43  ;;  %v633_v15 = vpack.c.bf16 %v376_v63, %v376_v63 }
 0x549   :  { %v715_v42 = vpop.permute.xlu1 %714 }
 0x54a   :  { %1680 = vmatprep.mubr.msk.bf16.mxu1 %vm456_vm4, %v632_v47 }
 0x54b   :  { %v1797_v28 = vpop.eup %1796 }
 0x54c   :  { %v630_v30 = vmul.f32 %v1797_v28, %v2107_v11 }
 0x54d   :  { %v725_v59 = vpop.permute.xlu1 %724 }
 0x54f   :  { %v1799_v29 = vpop.eup %1798 }
 0x550   :  { %v631_v31 = vmul.f32 %v1799_v29, %v2111_v13 }
 0x551   :  { %v735_v22 = vpop.permute.xlu1 %734 }
 0x552   :  { %v634_v32 = vpack.c.bf16 %v631_v31, %v630_v30 }
 0x554   :  { %1757 = vmatprep.subr.msk.bf16.mxu1 %vm456_vm4, %v634_v32  ;;  %v642_v36 = vsel %vm456_vm4, %v634_v32, 0 }
 0x555   :  { %1679 = vmatpush3.bf16.xpose.msra.mxu1 %v642_v36 }
 0x556   :  { %1684 = vmatprep.subr.bf16.mxu1 %v1805_v0 }
 0x55c   :  { %1681 = vmatmul.mubr.msk.bf16.vlgmr.msra.gmra.mxu1 %vm456_vm4, %v633_v15 }
 0x55d   :  { %1690 = vmatprep.mubr.msk.bf16.mxu1 %vm1806_vm0, %v1805_v0 }
 0x61c   :  { %v1682_v11 = vpop.f32.mrf.mxu1 }
 0x61e   :  { %v678_v37 = vpop.f32.mrf.mxu1 }
 0x61f   :  { %v699_v40 = vpack.c.bf16 %v678_v37, %v2092_v33  ;;  %v1773_v33 = vld [vmem:[%s2482_s5 + $0x8] sm:$0xff]  }
 0x620   :  { %v1683_v13 = vpop.f32.mrf.mxu1 }
 0x622   :  { %v681_v38 = vpop.f32.mrf.mxu1 }
 0x623   :  { %v700_v39 = vpack.c.bf16 %v1682_v11, %v681_v38 }
 0x625   :  { %1685 = vmatpush3.bf16.msra.mxu1 %v700_v39 }
 0x626   :  { %1686 = vmatprep.subr.bf16.mxu1 %v1805_v0 }
 0x629   :  { %1687 = vmatpush3.bf16.msra.mxu1 %v699_v40 }
 0x62a   :  { %1688 = vmatprep.subr.bf16.mxu1 %v1805_v0 }
 0x62d   :  { %1689 = vmatpush3.bf16.msra.mxu1 %v698_v49  ;;  %v710_v49 = vpop.permute.xlu0 %709 }
 0x630   :  { %1691 = vmatmul.mubr.msk.bf16.vlgmr.msra.gmra.mxu1 %vm246_vm1, %v1772_v18 }
 0x631   :  { %1694 = vmatprep.mubr.msk.bf16.mxu1 %vm1806_vm0, %v1805_v0  ;;  %v720_v52 = vpop.permute.xlu0 %719 }
 0x635   :  { %v730_v23 = vpop.permute.xlu0 %729 }
 0x638   :  { %1695 = vmatmul.mubr.msk.bf16.gmra.mxu1 %vm246_vm1, %v1773_v33 }
 0x639   :  { %1698 = vmatprep.mubr.msk.bf16.mxu1 %vm1806_vm0, %v1805_v0 }
 0x640   :  { %1699 = vmatmul.mubr.msk.bf16.gmra.mxu1 %vm246_vm1, %v1774_v41 }
 0x641   :  { %1708 = vmatprep.mubr.msk.bf16.mxu1 %vm246_vm1, %v1775_v44 }
 0x6f0   :  { %v795_v48 = vpop.f32.mrf.mxu1 }
 0x6f1   :  { %v796_v51 = vadd.f32 %v795_v48, %v710_v49 }
 0x6f2   :  { %v1692_v35 = vpop.f32.mrf.mxu1 }
 0x6f3   :  { %v818_v57 = vadd.f32 %v796_v51, %v1923_v8 }
 0x6f4   :  { %v798_v60 = vpop.f32.mrf.mxu1 }
 0x6f5   :  { %v799_v46 = vadd.f32 %v798_v60, %v715_v42  ;;  %v824_v17 = vmul.f32 %v1902_v3, %v818_v57 }
 0x6f6   :  { %v1693_v50 = vpop.f32.mrf.mxu1 }
 0x6f7   :  { %v819_v54 = vadd.f32 %v799_v46, %v1932_v12  ;;  %v830_v19 = vsel %vm456_vm4, %v824_v17, 0.0 }
 0x6f8   :  { %v803_v53 = vpop.f32.mrf.mxu1 }
 0x6f9   :  { %v804_v55 = vadd.f32 %v803_v53, %v720_v52  ;;  %v825_v62 = vmul.f32 %v1902_v3, %v819_v54 }
 0x6fa   :  { %v1696_v56 = vpop.f32.mrf.mxu1 }
 0x6fb   :  { %v820_v58 = vadd.f32 %v804_v55, %v1913_v6  ;;  %v831_v14 = vsel %vm456_vm4, %v825_v62, 0.0 }
 0x6fc   :  { %v806_v61 = vpop.f32.mrf.mxu1  ;;  %v832_v24 = vadd.f32 %v831_v14, %v830_v19 }
 0x6fd   :  { %v807_v4 = vadd.f32 %v806_v61, %v725_v59  ;;  %v826_v9 = vmul.f32 %v1902_v3, %v820_v58  ;;  %v921_v61 = vpop.permute.xlu1 %920 }
 0x6fe   :  { %v1697_v5 = vpop.f32.mrf.mxu1 }
 0x6ff   :  { %v821_v10 = vadd.f32 %v807_v4, %v1918_v7  ;;  %v833_v20 = vsel %vm456_vm4, %v826_v9, 0.0 }
 0x700   :  { %v811_v12 = vpop.f32.mrf.mxu1  ;;  %v834_v43 = vadd.f32 %v833_v20, %v832_v24 }
 0x701   :  { %v827_v8 = vmul.f32 %v1902_v3, %v821_v10  ;;  %v812_v16 = vadd.f32 %v811_v12, %v730_v23 }
 0x702   :  { %v1700_v6 = vpop.f32.mrf.mxu1 }
 0x703   :  { %v822_v21 = vadd.f32 %v812_v16, %v1892_v1  ;;  %v835_v26 = vsel %vm456_vm4, %v827_v8, 0.0 }
 0x704   :  { %v814_v25 = vpop.f32.mrf.mxu1  ;;  %v836_v29 = vadd.f32 %v835_v26, %v834_v43 }
 0x705   :  { %v828_v7 = vmul.f32 %v1902_v3, %v822_v21  ;;  %v815_v45 = vadd.f32 %v814_v25, %v735_v22 }
 0x706   :  { %v1701_v27 = vpop.f32.mrf.mxu1 }
 0x707   :  { %v837_v47 = vsel %vm456_vm4, %v828_v7, 0.0  ;;  %v823_v28 = vadd.f32 %v815_v45, %v1897_v2 }
 0x708   :  { %v838_v31 = vadd.f32 %v837_v47, %v836_v29 }
 0x709   :  { %v829_v30 = vmul.f32 %v1902_v3, %v823_v28 }
 0x70b   :  { %v839_v1 = vsel %vm456_vm4, %v829_v30, 0.0 }
 0x70c   :  { %v840_v32 = vadd.f32 %v839_v1, %v838_v31 }
 0x70e   :  { %v841_v34 = vrot.slane %v840_v32, 4 }
 0x710   :  { %v842_v36 = vadd.f32 %v841_v34, %v840_v32 }
 0x712   :  { %v843_v63 = vrot.slane %v842_v36, 2 }
 0x714   :  { %v844_v15 = vadd.f32 %v843_v63, %v842_v36 }
 0x716   :  { %v845_v11 = vrot.slane %v844_v15, 1 }
 0x718   :  { %v846_v37 = vadd.f32 %v845_v11, %v844_v15 }
 0x71a   :  { %v848_v13 = vmul.f32 0.020833334, %v846_v37 }
 0x71c   :  { %v849_v38 = vsub.f32 %v824_v17, %v848_v13  ;;  %v850_v39 = vsub.f32 %v825_v62, %v848_v13  ;;  %v851_v40 = vsub.f32 %v826_v9, %v848_v13  ;;  %v852_v18 = vsub.f32 %v827_v8, %v848_v13  ;;  %v916_v62 = vpop.permute.xlu0 %915  ;;  %v963_v9 = vpop.permute.xlu1 %962 }
 0x71d   :  { %v853_v33 = vsub.f32 %v828_v7, %v848_v13  ;;  %v854_v3 = vsub.f32 %v829_v30, %v848_v13  ;;  %v2346_v13 = vld [vmem:[%s2471_s1] ss:$0 sm:$0xff] }
 0x71e   :  { %v855_v2 = vmul.f32 %v849_v38, %v849_v38  ;;  %v856_v41 = vmul.f32 %v850_v39, %v850_v39  ;;  %v857_v44 = vmul.f32 %v851_v40, %v851_v40  ;;  %v858_v48 = vmul.f32 %v852_v18, %v852_v18 }
 0x71f   :  { %v859_v60 = vmul.f32 %v853_v33, %v853_v33  ;;  %v860_v51 = vmul.f32 %v854_v3, %v854_v3 }
 0x720   :  { %v861_v49 = vsel %vm456_vm4, %v855_v2, 0.0  ;;  %v862_v35 = vsel %vm456_vm4, %v856_v41, 0.0  ;;  %v864_v46 = vsel %vm456_vm4, %v857_v44, 0.0  ;;  %v866_v52 = vsel %vm456_vm4, %v858_v48, 0.0  ;;  %v958_v10 = vpop.permute.xlu0 %957  ;;  %v911_v8 = vpop.permute.xlu1 %910  ;;  %v1776_v48 = vld [vmem:[%s2483_s9 + $0x8] sm:$0xff]  }
 0x721   :  { %v863_v42 = vadd.f32 %v862_v35, %v861_v49  ;;  %v868_v54 = vsel %vm456_vm4, %v859_v60, 0.0  ;;  %v870_v56 = vsel %vm456_vm4, %v860_v51, 0.0  ;;  %v1777_v49 = vld [vmem:[%s2483_s9 + $0x10] sm:$0xff]   ;;  %v1778_v35 = vld [vmem:[%s2483_s9 + $0x18] sm:$0xff]   ;;  %v1780_v60 = vld [vmem:[%s2483_s9 + $0x28] sm:$0xff]  }
 0x723   :  { %v865_v50 = vadd.f32 %v864_v46, %v863_v42  ;;  %v1779_v42 = vld [vmem:[%s2483_s9 + $0x20] sm:$0xff]  }
 0x724   :  { %v906_v16 = vpop.permute.xlu0 %905  ;;  %v953_v6 = vpop.permute.xlu1 %952 }
 0x725   :  { %v867_v53 = vadd.f32 %v866_v52, %v865_v50 }
 0x727   :  { %v869_v55 = vadd.f32 %v868_v54, %v867_v53 }
 0x728   :  { %v948_v19 = vpop.permute.xlu0 %947  ;;  %v901_v20 = vpop.permute.xlu1 %900 }
 0x729   :  { %v871_v57 = vadd.f32 %v870_v56, %v869_v55 }
 0x72b   :  { %v872_v58 = vrot.slane %v871_v57, 4 }
 0x72c   :  { %v896_v21 = vpop.permute.xlu0 %895  ;;  %v943_v1 = vpop.permute.xlu1 %942 }
 0x72d   :  { %v873_v59 = vadd.f32 %v872_v58, %v871_v57 }
 0x72f   :  { %v874_v4 = vrot.slane %v873_v59, 2 }
 0x730   :  { %v938_v32 = vpop.permute.xlu0 %937  ;;  %v1062_v51 = vpop.permute.xlu1 %1061 }
 0x731   :  { %v875_v5 = vadd.f32 %v874_v4, %v873_v59 }
 0x733   :  { %v876_v17 = vrot.slane %v875_v5, 1 }
 0x734   :  { %v1057_v53 = vpop.permute.xlu0 %1056  ;;  %v1052_v56 = vpop.permute.xlu1 %1051 }
 0x735   :  { %v877_v23 = vadd.f32 %v876_v17, %v875_v5 }
 0x737   :  { %v878_v12 = vmul.f32 0.020833334, %v877_v23 }
 0x738   :  { %v1047_v58 = vpop.permute.xlu0 %1046 }
 0x739   :  { %v879_v14 = vadd.f32 0.0001, %v878_v12 }
 0x73b   :  { %1800 = vrsqrt.f32 %v879_v14 }
 0x73c   :  { %v1037_v17 = vpop.permute.xlu0 %1036 }
 0x748   :  { %v1801_v22 = vpop.eup %1800 }
 0x749   :  { %v886_v24 = vmul.f32 %v1801_v22, %v854_v3  ;;  %v885_v25 = vmul.f32 %v1801_v22, %v853_v33  ;;  %v883_v26 = vmul.f32 %v1801_v22, %v851_v40  ;;  %v884_v7 = vmul.f32 %v1801_v22, %v852_v18 }
 0x74a   :  { %v881_v45 = vmul.f32 %v1801_v22, %v849_v38  ;;  %v882_v43 = vmul.f32 %v1801_v22, %v850_v39 }
 0x74b   :  { %v927_v27 = vmul.f32 %v916_v62, %v885_v25  ;;  %v928_v47 = vmul.f32 %v921_v61, %v886_v24  ;;  %v925_v28 = vmul.f32 %v906_v16, %v883_v26  ;;  %v926_v29 = vmul.f32 %v911_v8, %v884_v7  ;;  %v1042_v62 = vpop.permute.xlu1 %1041 }
 0x74c   :  { %v923_v30 = vmul.f32 %v896_v21, %v881_v45  ;;  %v924_v31 = vmul.f32 %v901_v20, %v882_v43  ;;  %v1027_v21 = vpop.permute.xlu0 %1026 }
 0x74d   :  { %v2331_v34 = vadd.f32 %v958_v10, %v927_v27  ;;  %v2333_v36 = vadd.f32 %v963_v9, %v928_v47  ;;  %v2335_v63 = vadd.f32 %v948_v19, %v925_v28  ;;  %v2337_v15 = vadd.f32 %v953_v6, %v926_v29 }
 0x74e   :  { %v2339_v11 = vadd.f32 %v938_v32, %v923_v30  ;;  %v2341_v37 = vadd.f32 %v943_v1, %v924_v31 }
 0x74f   :  { %v987_v38 = vmul.f32 %v2346_v13, %v2331_v34  ;;  %v988_v39 = vmul.f32 %v2346_v13, %v2333_v36  ;;  %v985_v40 = vmul.f32 %v2346_v13, %v2335_v63  ;;  %v986_v18 = vmul.f32 %v2346_v13, %v2337_v15  ;;  %v1032_v8 = vpop.permute.xlu1 %1031 }
 0x750   :  { %v983_v41 = vmul.f32 %v2346_v13, %v2339_v11  ;;  %v984_v44 = vmul.f32 %v2346_v13, %v2341_v37  ;;  %v1017_v1 = vpop.permute.xlu0 %1016 }
 0x751   :  { %v991_v33 = vpack.c.bf16 %v988_v39, %v987_v38  ;;  %v990_v2 = vpack.c.bf16 %v986_v18, %v985_v40 }
 0x752   :  { %v989_v3 = vpack.c.bf16 %v984_v44, %v983_v41 }
 0x753   :  { %1702 = vmatprep.subr.bf16.mxu1 %v991_v33  ;;  %v1022_v28 = vpop.permute.xlu1 %1021 }
 0x754   :  { %1703 = vmatpush3.bf16.msra.mxu1 %v991_v33 }
 0x755   :  { %1704 = vmatprep.subr.bf16.mxu1 %v990_v2 }
 0x757   :  { %v1012_v41 = vpop.permute.xlu1 %1011 }
 0x758   :  { %1705 = vmatpush3.bf16.msra.mxu1 %v990_v2 }
 0x759   :  { %1706 = vmatprep.subr.bf16.mxu1 %v989_v3 }
 0x75c   :  { %1707 = vmatpush3.bf16.msra.mxu1 %v989_v3 }
 0x75d   :  { %1744 = vmatprep.subr.bf16.mxu1 %v1805_v0 }
 0x75f   :  { %1709 = vmatmul.mubr.msk.bf16.vlgmr.msra.gmra.mxu1 %vm246_vm1, %v1776_v48 }
 0x760   :  { %1712 = vmatprep.mubr.msk.bf16.mxu1 %vm246_vm1, %v1777_v49 }
 0x767   :  { %1713 = vmatmul.mubr.msk.bf16.gmra.mxu1 %vm246_vm1, %v1778_v35  ;;  %v1007_v35 = vpop.permute.xlu0 %1006 }
 0x768   :  { %1716 = vmatprep.mubr.msk.bf16.mxu1 %vm246_vm1, %v1779_v42 }
 0x76f   :  { %1717 = vmatmul.mubr.msk.bf16.gmra.mxu1 %vm246_vm1, %v1780_v60 }
 0x770   :  { %1740 = vmatprep.mubr.msk.bf16.mxu1 %vm1806_vm0, %v1805_v0 }
 0x81f   :  { %v1710_v46 = vpop.f32.mrf.mxu1 }
 0x820   :  { %v1155_v18 = vadd.f32 %v1710_v46, %v1017_v1 }
 0x821   :  { %v1146_v50 = vpop.f32.mrf.mxu1 }
 0x822   :  { %v1195_v42 = vmax.f32 %v1155_v18, 0.0  ;;  %v1147_v60 = vadd.f32 %v1146_v50, %v1007_v35 }
 0x823   :  { %v1711_v52 = vpop.f32.mrf.mxu1 }
 0x824   :  { %v1158_v32 = vadd.f32 %v1711_v52, %v1022_v28 }
 0x825   :  { %v1149_v54 = vpop.f32.mrf.mxu1 }
 0x826   :  { %v1196_v44 = vmax.f32 %v1158_v32, 0.0  ;;  %v1150_v3 = vadd.f32 %v1149_v54, %v1012_v41  ;;  %v1213_v54 = vmul.f32 %v2346_v13, %v1195_v42 }
 0x827   :  { %v1714_v55 = vpop.f32.mrf.mxu1 }
 0x828   :  { %v1171_v22 = vadd.f32 %v1714_v55, %v1037_v17  ;;  %v1194_v52 = vmax.f32 %v1150_v3, 0.0  ;;  %v1193_v55 = vmax.f32 %v1147_v60, 0.0 }
 0x829   :  { %v1162_v57 = vpop.f32.mrf.mxu1 }
 0x82a   :  { %v1199_v29 = vmax.f32 %v1171_v22, 0.0  ;;  %v1163_v30 = vadd.f32 %v1162_v57, %v1027_v21  ;;  %v1211_v57 = vmul.f32 %v2346_v13, %v1193_v55 }
 0x82b   :  { %v1715_v59 = vpop.f32.mrf.mxu1 }
 0x82c   :  { %v1174_v6 = vadd.f32 %v1715_v59, %v1042_v62  ;;  %v1217_v33 = vmul.f32 %v2346_v13, %v1199_v29  ;;  %v1197_v2 = vmax.f32 %v1163_v30, 0.0  ;;  %v1781_v59 = vld [vmem:[%s2484_s11] sm:$0xff]   ;;  %v1783_v62 = vld [vmem:[%s2484_s11 + $0x8] sm:$0xff]  }
 0x82d   :  { %v1165_v61 = vpop.f32.mrf.mxu1 }
 0x82e   :  { %v1200_v45 = vmax.f32 %v1174_v6, 0.0  ;;  %v1166_v43 = vadd.f32 %v1165_v61, %v1032_v8  ;;  %v1215_v46 = vmul.f32 %v2346_v13, %v1197_v2  ;;  %v1782_v61 = vld [vmem:[%s2484_s11 + $0x10] sm:$0xff]  }
 0x82f   :  { %v1718_v4 = vpop.f32.mrf.mxu1 }
 0x830   :  { %v1187_v5 = vadd.f32 %v1718_v4, %v1057_v53  ;;  %v1218_v38 = vmul.f32 %v2346_v13, %v1200_v45  ;;  %v1198_v39 = vmax.f32 %v1166_v43, 0.0  ;;  %v1238_v4 = vpop.permute.xlu0 %1237 }
 0x831   :  { %v1178_v9 = vpop.f32.mrf.mxu1 }
 0x832   :  { %v1203_v23 = vmax.f32 %v1187_v5, 0.0  ;;  %v1179_v12 = vadd.f32 %v1178_v9, %v1047_v58  ;;  %v1226_v48 = vpack.c.bf16 %v1218_v38, %v1217_v33  ;;  %v1216_v49 = vmul.f32 %v2346_v13, %v1198_v39  ;;  %v1243_v5 = vpop.permute.xlu1 %1242 }
 0x833   :  { %v1719_v10 = vpop.f32.mrf.mxu1 }
 0x834   :  { %v1190_v14 = vadd.f32 %v1719_v10, %v1062_v51  ;;  %v1221_v24 = vmul.f32 %v2346_v13, %v1203_v23  ;;  %v1201_v25 = vmax.f32 %v1179_v12, 0.0  ;;  %v1214_v51 = vmul.f32 %v2346_v13, %v1196_v44  ;;  %v1248_v10 = vpop.permute.xlu0 %1247 }
 0x835   :  { %v1181_v16 = vpop.f32.mrf.mxu1  ;;  %v1225_v53 = vpack.c.bf16 %v1216_v49, %v1215_v46 }
 0x836   :  { %v1204_v19 = vmax.f32 %v1190_v14, 0.0  ;;  %v1182_v20 = vadd.f32 %v1181_v16, %v1052_v56  ;;  %v1219_v31 = vmul.f32 %v2346_v13, %v1201_v25  ;;  %v1224_v50 = vpack.c.bf16 %v1214_v51, %v1213_v54  ;;  %v1253_v14 = vpop.permute.xlu1 %1252 }
 0x837   :  { %v1212_v56 = vmul.f32 %v2346_v13, %v1194_v52 }
 0x838   :  { %v1222_v26 = vmul.f32 %v2346_v13, %v1204_v19  ;;  %v1202_v7 = vmax.f32 %v1182_v20, 0.0 }
 0x839   :  { %v1223_v58 = vpack.c.bf16 %v1212_v56, %v1211_v57 }
 0x83a   :  { %v1228_v27 = vpack.c.bf16 %v1222_v26, %v1221_v24  ;;  %v1220_v47 = vmul.f32 %v2346_v13, %v1202_v7  ;;  %v1258_v24 = vpop.permute.xlu0 %1257  ;;  %v1263_v43 = vpop.permute.xlu1 %1262 }
 0x83c   :  { %1721 = vmatpush3.bf16.msra.mxu0 %v1228_v27  ;;  %1750 = vmatpush3.bf16.msra.mxu1 %v1228_v27  ;;  %v1227_v40 = vpack.c.bf16 %v1220_v47, %v1219_v31 }
 0x83d   :  { %1722 = vmatprep.subr.bf16.mxu0 %v1805_v0  ;;  %1745 = vmatprep.subr.bf16.mxu1 %v1805_v0 }
 0x840   :  { %1723 = vmatpush3.bf16.msra.mxu0 %v1227_v40  ;;  %1751 = vmatpush3.bf16.msra.mxu1 %v1227_v40 }
 0x841   :  { %1724 = vmatprep.subr.bf16.mxu0 %v1805_v0  ;;  %1746 = vmatprep.subr.bf16.mxu1 %v1805_v0 }
 0x844   :  { %1725 = vmatpush3.bf16.msra.mxu0 %v1226_v48  ;;  %1752 = vmatpush3.bf16.msra.mxu1 %v1226_v48 }
 0x845   :  { %1726 = vmatprep.subr.bf16.mxu0 %v1805_v0  ;;  %1747 = vmatprep.subr.bf16.mxu1 %v1805_v0 }
 0x848   :  { %1727 = vmatpush3.bf16.msra.mxu0 %v1225_v53  ;;  %1753 = vmatpush3.bf16.msra.mxu1 %v1225_v53 }
 0x849   :  { %1728 = vmatprep.subr.bf16.mxu0 %v1805_v0  ;;  %1748 = vmatprep.subr.bf16.mxu1 %v1805_v0 }
 0x84c   :  { %1729 = vmatpush3.bf16.msra.mxu0 %v1224_v50  ;;  %1754 = vmatpush3.bf16.msra.mxu1 %v1224_v50 }
 0x84d   :  { %1730 = vmatprep.subr.bf16.mxu0 %v1805_v0  ;;  %1749 = vmatprep.subr.bf16.mxu1 %v1805_v0 }
 0x850   :  { %1731 = vmatpush3.bf16.msra.mxu0 %v1223_v58  ;;  %1755 = vmatpush3.bf16.msra.mxu1 %v1223_v58 }
 0x853   :  { %1733 = vmatmul.mubr.msk.bf16.vlgmr.msra.gmra.mxu0 %vm1280_vm5, %v1781_v59  ;;  %1741 = vmatmul.mubr.msk.bf16.vlgmr.msra.gmra.mxu1 %vm1280_vm5, %v1782_v61 }
 0x854   :  { %1736 = vmatprep.mubr.msk.bf16.mxu0 %vm1806_vm0, %v1805_v0 }
 0x85b   :  { %1737 = vmatmul.mubr.msk.bf16.gmra.mxu0 %vm1280_vm5, %v1783_v62 }
 0x913   :  { %v1324_v17 = vpop.f32.mrf.mxu0  ;;  %v1340_v9 = vpop.f32.mrf.mxu1 }
 0x914   :  { %v1325_v8 = vadd.f32 %v1324_v17, %v1238_v4  ;;  %v1341_v26 = vadd.f32 %v1340_v9, %v1258_v24  ;;  %v1429_v24 = vpop.permute.xlu1 %1428 }
 0x915   :  { %v1734_v23 = vpop.f32.mrf.mxu0  ;;  %v1742_v12 = vpop.f32.mrf.mxu1 }
 0x916   :  { %v1347_v0 = vadd.f32 %v1325_v8, %v2339_v11  ;;  %v1351_v31 = vadd.f32 %v1341_v26, %v2331_v34 }
 0x917   :  { %v1327_v16 = vpop.f32.mrf.mxu0  ;;  %v1343_v6 = vpop.f32.mrf.mxu1 }
 0x918   :  { %v1328_v19 = vadd.f32 %v1327_v16, %v1243_v5  ;;  %v1353_v47 = vmul.f32 %v2346_v13, %v1347_v0  ;;  %v1344_v28 = vadd.f32 %v1343_v6, %v1263_v43  ;;  %v1439_v43 = vpop.permute.xlu1 %1438 }
 0x919   :  { %v1735_v20 = vpop.f32.mrf.mxu0  ;;  %v1743_v21 = vpop.f32.mrf.mxu1 }
 0x91a   :  { %v1348_v22 = vadd.f32 %v1328_v19, %v2341_v37  ;;  %v1359_v38 = vsel %vm456_vm4, %v1353_v47, 0.0  ;;  %v1352_v39 = vadd.f32 %v1344_v28, %v2333_v36 }
 0x91b   :  { %v1332_v25 = vpop.f32.mrf.mxu0 }
 0x91c   :  { %v1354_v7 = vmul.f32 %v2346_v13, %v1348_v22  ;;  %v1333_v45 = vadd.f32 %v1332_v25, %v1248_v10  ;;  %v1358_v41 = vmul.f32 %v2346_v13, %v1352_v39  ;;  %v1424_v25 = vpop.permute.xlu0 %1423 }
 0x91d   :  { %v1738_v27 = vpop.f32.mrf.mxu0 }
 0x91e   :  { %v1349_v29 = vadd.f32 %v1333_v45, %v2335_v63  ;;  %v1360_v11 = vsel %vm456_vm4, %v1354_v7, 0.0  ;;  %v1357_v63 = vmul.f32 %v2346_v13, %v1351_v31  ;;  %v1368_v36 = vsel %vm456_vm4, %v1358_v41, 0.0 }
 0x91f   :  { %v1335_v30 = vpop.f32.mrf.mxu0  ;;  %v1361_v33 = vadd.f32 %v1360_v11, %v1359_v38 }
 0x920   :  { %v1355_v37 = vmul.f32 %v2346_v13, %v1349_v29  ;;  %v1336_v1 = vadd.f32 %v1335_v30, %v1253_v14  ;;  %v1366_v48 = vsel %vm456_vm4, %v1357_v63, 0.0  ;;  %v1434_v27 = vpop.permute.xlu0 %1433  ;;  %v1449_v30 = vpop.permute.xlu1 %1448 }
 0x921   :  { %v1739_v32 = vpop.f32.mrf.mxu0 }
 0x922   :  { %v1362_v40 = vsel %vm456_vm4, %v1355_v37, 0.0  ;;  %v1350_v18 = vadd.f32 %v1336_v1, %v2337_v15 }
 0x923   :  { %v1363_v34 = vadd.f32 %v1362_v40, %v1361_v33 }
 0x924   :  { %v1356_v2 = vmul.f32 %v2346_v13, %v1350_v18  ;;  %v1444_v31 = vpop.permute.xlu0 %1443  ;;  %v1471_v11 = vpop.permute.xlu1 %1470 }
 0x926   :  { %v1364_v44 = vsel %vm456_vm4, %v1356_v2, 0.0 }
 0x927   :  { %v1365_v3 = vadd.f32 %v1364_v44, %v1363_v34 }
 0x928   :  { %v1481_v1 = vpop.permute.xlu1 %1480 }
 0x929   :  { %v1367_v49 = vadd.f32 %v1366_v48, %v1365_v3 }
 0x92b   :  { %v1369_v35 = vadd.f32 %v1368_v36, %v1367_v49 }
 0x92c   :  { %v1491_v36 = vpop.permute.xlu1 %1490 }
 0x92d   :  { %v1370_v42 = vrot.slane %v1369_v35, 4 }
 0x92f   :  { %v1371_v60 = vadd.f32 %v1370_v42, %v1369_v35 }
 0x931   :  { %v1372_v15 = vrot.slane %v1371_v60, 2 }
 0x933   :  { %v1373_v46 = vadd.f32 %v1372_v15, %v1371_v60 }
 0x935   :  { %v1374_v51 = vrot.slane %v1373_v46, 1 }
 0x937   :  { %v1375_v52 = vadd.f32 %v1374_v51, %v1373_v46 }
 0x939   :  { %v1376_v53 = vmul.f32 0.020833334, %v1375_v52 }
 0x93b   :  { %v1377_v54 = vsub.f32 %v1353_v47, %v1376_v53  ;;  %v1378_v55 = vsub.f32 %v1354_v7, %v1376_v53  ;;  %v1379_v50 = vsub.f32 %v1355_v37, %v1376_v53  ;;  %v1380_v56 = vsub.f32 %v1356_v2, %v1376_v53  ;;  %v1466_v37 = vpop.permute.xlu0 %1465 }
 0x93c   :  { %v1381_v57 = vsub.f32 %v1357_v63, %v1376_v53  ;;  %v1382_v62 = vsub.f32 %v1358_v41, %v1376_v53 }
 0x93d   :  { %v1383_v58 = vmul.f32 %v1377_v54, %v1377_v54  ;;  %v1384_v59 = vmul.f32 %v1378_v55, %v1378_v55  ;;  %v1385_v61 = vmul.f32 %v1379_v50, %v1379_v50  ;;  %v1386_v4 = vmul.f32 %v1380_v56, %v1380_v56 }
 0x93e   :  { %v1387_v10 = vmul.f32 %v1381_v57, %v1381_v57  ;;  %v1388_v14 = vmul.f32 %v1382_v62, %v1382_v62 }
 0x93f   :  { %v1389_v5 = vsel %vm456_vm4, %v1383_v58, 0.0  ;;  %v1390_v17 = vsel %vm456_vm4, %v1384_v59, 0.0  ;;  %v1392_v23 = vsel %vm456_vm4, %v1385_v61, 0.0  ;;  %v1394_v8 = vsel %vm456_vm4, %v1386_v4, 0.0  ;;  %v1476_v32 = vpop.permute.xlu0 %1475 }
 0x940   :  { %v1391_v9 = vadd.f32 %v1390_v17, %v1389_v5  ;;  %v1396_v6 = vsel %vm456_vm4, %v1387_v10, 0.0  ;;  %v1398_v20 = vsel %vm456_vm4, %v1388_v14, 0.0 }
 0x942   :  { %v1393_v12 = vadd.f32 %v1392_v23, %v1391_v9 }
 0x943   :  { %v1486_v35 = vpop.permute.xlu0 %1485 }
 0x944   :  { %v1395_v16 = vadd.f32 %v1394_v8, %v1393_v12 }
 0x946   :  { %v1397_v19 = vadd.f32 %v1396_v6, %v1395_v16 }
 0x948   :  { %v1399_v21 = vadd.f32 %v1398_v20, %v1397_v19 }
 0x94a   :  { %v1400_v0 = vrot.slane %v1399_v21, 4 }
 0x94c   :  { %v1401_v22 = vadd.f32 %v1400_v0, %v1399_v21 }
 0x94e   :  { %v1402_v26 = vrot.slane %v1401_v22, 2 }
 0x950   :  { %v1403_v7 = vadd.f32 %v1402_v26, %v1401_v22 }
 0x952   :  { %v1404_v45 = vrot.slane %v1403_v7, 1 }
 0x954   :  { %v1405_v47 = vadd.f32 %v1404_v45, %v1403_v7 }
 0x956   :  { %v1406_v28 = vmul.f32 0.020833334, %v1405_v47 }
 0x958   :  { %v1407_v29 = vadd.f32 0.0001, %v1406_v28 }
 0x95a   :  { %1802 = vrsqrt.f32 %v1407_v29 }
 0x967   :  { %v1803_v38 = vpop.eup %1802 }
 0x968   :  { %v1409_v39 = vmul.f32 %v1803_v38, %v1377_v54  ;;  %v1410_v40 = vmul.f32 %v1803_v38, %v1378_v55  ;;  %v1411_v18 = vmul.f32 %v1803_v38, %v1379_v50  ;;  %v1412_v33 = vmul.f32 %v1803_v38, %v1380_v56 }
 0x969   :  { %v1413_v63 = vmul.f32 %v1803_v38, %v1381_v57  ;;  %v1414_v2 = vmul.f32 %v1803_v38, %v1382_v62 }
 0x96a   :  { %v1451_v34 = vmul.f32 %v1424_v25, %v1409_v39  ;;  %v1452_v41 = vmul.f32 %v1429_v24, %v1410_v40  ;;  %v1453_v44 = vmul.f32 %v1434_v27, %v1411_v18  ;;  %v1454_v3 = vmul.f32 %v1439_v43, %v1412_v33 }
 0x96b   :  { %v1455_v48 = vmul.f32 %v1444_v31, %v1413_v63  ;;  %v1456_v49 = vmul.f32 %v1449_v30, %v1414_v2 }
 0x96c   :  { %v1493_v42 = vadd.f32 %v1466_v37, %v1451_v34  ;;  %v1494_v60 = vadd.f32 %v1471_v11, %v1452_v41  ;;  %v1495_v15 = vadd.f32 %v1476_v32, %v1453_v44  ;;  %v1496_v46 = vadd.f32 %v1481_v1, %v1454_v3 }
 0x96d   :  { %v1497_v51 = vadd.f32 %v1486_v35, %v1455_v48  ;;  %v1498_v52 = vadd.f32 %v1491_v36, %v1456_v49 }
 0x96e   :  { %v1499_v53 = vmul.f32 %v2346_v13, %v1493_v42  ;;  %v1500_v54 = vmul.f32 %v2346_v13, %v1494_v60  ;;  %v1501_v55 = vmul.f32 %v2346_v13, %v1495_v15  ;;  %v1502_v50 = vmul.f32 %v2346_v13, %v1496_v46 }
 0x96f   :  { %v1503_v56 = vmul.f32 %v2346_v13, %v1497_v51  ;;  %v1504_v57 = vmul.f32 %v2346_v13, %v1498_v52 }
 0x970   :  { %1505 = vst.msk [vmem:[%s2485_s15] sm:$0xff] %vm456_vm4, %v1499_v53  ;;  %1506 = vst.msk [vmem:[%s2485_s15 + $0x8] sm:$0xff] %vm456_vm4, %v1500_v54 }
 0x971   :  { %1507 = vst.msk [vmem:[%s2485_s15 + $0x10] sm:$0xff] %vm456_vm4, %v1501_v55  ;;  %1508 = vst.msk [vmem:[%s2485_s15 + $0x18] sm:$0xff] %vm456_vm4, %v1502_v50 }
 0x972   :  { %1509 = vst.msk [vmem:[%s2485_s15 + $0x20] sm:$0xff] %vm456_vm4, %v1503_v56  ;;  %1510 = vst.msk [vmem:[%s2485_s15 + $0x28] sm:$0xff] %vm456_vm4, %v1504_v57 }

// kernel: tts_forward.12
= control target key start
LH: loop header
LB: loop body
LE: loop exit
PB: predicated region body
PF: predicated region fallthrough
CT: control target
= control target key end

     0   :  { %v529_v0 = vmov 0   ;;  %vm118_vm0 = vcmask 261120   ;;  %vm261_vm1 = vcmask 130048   ;;  %s724_s2 = inlined_call_operand.vmem [shape: f32[32,1], index: 2, kind: input, shape index: {}]   ;;  %s725_s3 = inlined_call_operand.vmem [shape: f32[32,1], index: 3, kind: input, shape index: {}]   ;;  %s726_s6 = inlined_call_operand.vmem [shape: f32[32,1], index: 6, kind: input, shape index: {}]   ;;  %s727_s4 = inlined_call_operand.vmem [shape: f32[32,32], index: 4, kind: input, shape index: {}]   ;;  %s728_s8 = inlined_call_operand.vmem [shape: f32[32,1], index: 8, kind: input, shape index: {}]   ;;  %s729_s0 = inlined_call_operand.vmem [shape: f32[32,16], index: 0, kind: input, shape index: {}]   ;;  %s730_s1 = inlined_call_operand.vmem [shape: f32[1,16], index: 1, kind: input, shape index: {}]   ;;  %s731_s5 = inlined_call_operand.vmem [shape: bf16[32,16], index: 5, kind: input, shape index: {}]   ;;  %s732_s9 = inlined_call_operand.vmem [shape: f32[32,16], index: 9, kind: output, shape index: {0}]   ;;  %s733_s7 = inlined_call_operand.vmem [shape: bf16[32,32], index: 7, kind: input, shape index: {}]   ;;  %s734_s10 = inlined_call_operand.vmem [shape: f32[16,16], index: 10, kind: output, shape index: {1}]  }
   0x1   :  { %504 = vset.pattern.permute.xlu0 %v529_v0  ;;  %503 = vset.pattern.permute.xlu1 %v529_v0  ;;  %v43_v1 = vld [vmem:[%s724_s2 + $0x18] sm:$0xff]  ;;  %v42_v2 = vld [vmem:[%s724_s2 + $0x10] sm:$0xff]  ;;  %v45_v3 = vld [vmem:[%s725_s3 + $0x8] sm:$0xff] }
   0x2   :  { %97 = vperm.xlu1 %503, %v43_v1   ;;  %92 = vperm.xlu0 %504, %v42_v2   ;;  %v50_v4 = vmul.f32 1.442695, %v45_v3  ;;  %v47_v5 = vld [vmem:[%s725_s3 + $0x18] sm:$0xff]  ;;  %v44_v6 = vld [vmem:[%s725_s3] sm:$0xff]  ;;  %v46_v7 = vld [vmem:[%s725_s3 + $0x10] sm:$0xff] }
   0x3   :  { %v54_v8 = vmul.f32 1.442695, %v47_v5  ;;  %v48_v9 = vmul.f32 1.442695, %v44_v6  ;;  %v52_v10 = vmul.f32 1.442695, %v46_v7 }
   0x4   :  { %509 = vpow2.f32 %v50_v4  ;;  %v40_v15 = vld [vmem:[%s724_s2] sm:$0xff]  ;;  %v41_v16 = vld [vmem:[%s724_s2 + $0x8] sm:$0xff]  ;;  %v230_v17 = vld [vmem:[%s726_s6 + $0x18] sm:$0xff] }
   0x5   :  { %511 = vpow2.f32 %v54_v8  ;;  %v229_v18 = vld [vmem:[%s726_s6 + $0x10] sm:$0xff]  ;;  %v114_v19 = vld [vmem:[%s727_s4] sm:$0xff]  ;;  %v228_v20 = vld [vmem:[%s726_s6 + $0x8] sm:$0xff] }
   0x6   :  { %513 = vpow2.f32 %v48_v9  ;;  %482 = vmatprep.mubr.msk.f32.mxu0 %vm118_vm0, %v114_v19  ;;  %v227_v21 = vld [vmem:[%s726_s6] sm:$0xff]  ;;  %v334_v22 = vld [vmem:[%s728_s8 + $0x18] sm:$0xff]  ;;  %v333_v23 = vld [vmem:[%s728_s8 + $0x10] sm:$0xff] }
   0x7   :  { %515 = vpow2.f32 %v52_v10  ;;  %v332_v24 = vld [vmem:[%s728_s8 + $0x8] sm:$0xff]  ;;  %v331_v25 = vld [vmem:[%s728_s8] sm:$0xff]  ;;  %v39_v28 = vld [vmem:[%s729_s0 + $0x18] sm:$0xff] }
   0x8   :  { %v38_v32 = vld [vmem:[%s729_s0 + $0x10] sm:$0xff]  ;;  %v646_v33 = vld [vmem:[%s730_s1] ss:$0 sm:$0xff]  ;;  %v37_v36 = vld [vmem:[%s729_s0 + $0x8] sm:$0xff] }
   0x9   :  { %v36_v37 = vld [vmem:[%s729_s0] sm:$0xff]  ;;  %v115_v51 = vld [vmem:[%s727_s4 + $0x8] sm:$0xff]  ;;  %v116_v62 = vld [vmem:[%s727_s4 + $0x10] sm:$0xff] }
   0xa   :  { %v505_v52 = vld [vmem:[%s731_s5] sm:$0xff]   ;;  %v506_v60 = vld [vmem:[%s731_s5 + $0x8] sm:$0xff]   ;;  %v117_v63 = vld [vmem:[%s727_s4 + $0x18] sm:$0xff] }
   0xb   :  { %490 = vmatprep.mubr.msk.bf16.mxu1 %vm261_vm1, %v505_v52  ;;  %v507_v61 = vld [vmem:[%s733_s7] sm:$0xff]  }
  0x11   :  { %v510_v11 = vpop.eup %509 }
  0x12   :  { %v512_v12 = vpop.eup %511  ;;  %63 = vperm.xlu1 %503, %v510_v11  }
  0x13   :  { %v514_v13 = vpop.eup %513  ;;  %73 = vperm.xlu0 %504, %v512_v12  }
  0x14   :  { %v516_v14 = vpop.eup %515 }
  0x16   :  { %58 = vperm.xlu1 %503, %v514_v13  }
  0x17   :  { %68 = vperm.xlu0 %504, %v516_v14  }
  0x1a   :  { %82 = vperm.xlu1 %503, %v40_v15  }
  0x1b   :  { %87 = vperm.xlu0 %504, %v41_v16  }
  0x1e   :  { %248 = vperm.xlu1 %503, %v230_v17  }
  0x1f   :  { %243 = vperm.xlu0 %504, %v229_v18  }
  0x22   :  { %238 = vperm.xlu1 %503, %v228_v20  }
  0x23   :  { %233 = vperm.xlu0 %504, %v227_v21  }
  0x26   :  { %352 = vperm.xlu1 %503, %v334_v22   ;;  %v508_v22 = vld [vmem:[%s733_s7 + $0x8] sm:$0xff]  }
  0x27   :  { %347 = vperm.xlu0 %504, %v333_v23  }
  0x2a   :  { %342 = vperm.xlu1 %503, %v332_v24  }
  0x2b   :  { %337 = vperm.xlu0 %504, %v331_v25  }
  0x7d   :  { %v98_v26 = vpop.permute.xlu1 %97  ;;  %v93_v27 = vpop.permute.xlu0 %92 }
  0x8d   :  { %v64_v29 = vpop.permute.xlu1 %63 }
  0x8e   :  { %v74_v30 = vpop.permute.xlu0 %73  ;;  %v77_v41 = vmul.f32 %v64_v29, %v37_v36 }
  0x8f   :  { %v79_v31 = vmul.f32 %v74_v30, %v39_v28 }
  0x91   :  { %v103_v34 = vadd.f32 %v98_v26, %v79_v31  ;;  %v59_v35 = vpop.permute.xlu1 %58 }
  0x92   :  { %v69_v38 = vpop.permute.xlu0 %68  ;;  %v76_v42 = vmul.f32 %v59_v35, %v36_v37 }
  0x93   :  { %v78_v39 = vmul.f32 %v69_v38, %v38_v32  ;;  %v113_v40 = vmul.f32 %v646_v33, %v103_v34 }
  0x95   :  { %v102_v43 = vadd.f32 %v93_v27, %v78_v39  ;;  %474 = vmatprep.subr.mxu0 %v113_v40  ;;  %v83_v44 = vpop.permute.xlu1 %82 }
  0x96   :  { %v88_v45 = vpop.permute.xlu0 %87  ;;  %475 = vmatpush3.msra.mxu0 %v113_v40  ;;  %v100_v47 = vadd.f32 %v83_v44, %v76_v42 }
  0x97   :  { %v101_v46 = vadd.f32 %v88_v45, %v77_v41  ;;  %v112_v48 = vmul.f32 %v646_v33, %v102_v43 }
  0x98   :  { %v110_v50 = vmul.f32 %v646_v33, %v100_v47 }
  0x99   :  { %v111_v49 = vmul.f32 %v646_v33, %v101_v46  ;;  %476 = vmatprep.subr.mxu0 %v112_v48  ;;  %v249_v1 = vpop.permute.xlu1 %248 }
  0x9a   :  { %477 = vmatpush3.msra.mxu0 %v112_v48  ;;  %v244_v0 = vpop.permute.xlu0 %243 }
  0x9b   :  { %478 = vmatprep.subr.mxu0 %v111_v49 }
  0x9c   :  { %479 = vmatpush3.msra.mxu0 %v111_v49 }
  0x9d   :  { %480 = vmatprep.subr.mxu0 %v110_v50  ;;  %v239_v9 = vpop.permute.xlu1 %238 }
  0x9e   :  { %481 = vmatpush3.msra.mxu0 %v110_v50  ;;  %v234_v4 = vpop.permute.xlu0 %233 }
  0x9f   :  { %483 = vmatmul.mubr.msk.f32.vlgmr.msra.gmra.mxu0 %vm118_vm0, %v115_v51 }
  0xa0   :  { %485 = vmatprep.mubr.msk.f32.mxu0 %vm118_vm0, %v116_v62 }
  0xa1   :  { %v353_v29 = vpop.permute.xlu1 %352 }
  0xa2   :  { %v348_v23 = vpop.permute.xlu0 %347 }
  0xa3   :  { %486 = vmatmul.mubr.msk.f32.gmra.mxu0 %vm118_vm0, %v117_v63 }
  0xa5   :  { %v343_v46 = vpop.permute.xlu1 %342 }
  0xa6   :  { %v338_v39 = vpop.permute.xlu0 %337 }
 0x15f   :  { %v484_v53 = vpop.f32.mrf.mxu0 }
 0x160   :  { %v217_v54 = vmul.f32 %v484_v53, %v646_v33 }
 0x161   :  { %v197_v55 = vpop.f32.mrf.mxu0 }
 0x162   :  { %431 = vst.msk [vmem:[%s732_s9 + $0x8] sm:$0xff] %vm261_vm1, %v217_v54  ;;  %v216_v56 = vmul.f32 %v646_v33, %v197_v55  ;;  %v225_v57 = vmul.f32 %v646_v33, %v217_v54 }
 0x163   :  { %v487_v35 = vpop.f32.mrf.mxu0 }
 0x164   :  { %v224_v58 = vmul.f32 %v646_v33, %v216_v56  ;;  %430 = vst.msk [vmem:[%s732_s9] sm:$0xff] %vm261_vm1, %v216_v56  ;;  %v219_v43 = vmul.f32 %v487_v35, %v646_v33 }
 0x165   :  { %v207_v36 = vpop.f32.mrf.mxu0 }
 0x166   :  { %v226_v59 = vpack.c.bf16 %v225_v57, %v224_v58  ;;  %v218_v37 = vmul.f32 %v646_v33, %v207_v36 }
 0x168   :  { %488 = vmatprep.subr.bf16.mxu1 %v226_v59 }
 0x169   :  { %489 = vmatpush3.bf16.msra.mxu1 %v226_v59 }
 0x16c   :  { %491 = vmatmul.mubr.msk.bf16.vlgmr.msra.gmra.mxu1 %vm261_vm1, %v506_v60 }
 0x16d   :  { %498 = vmatprep.mubr.msk.bf16.mxu1 %vm118_vm0, %v507_v61 }
 0x22c   :  { %v492_v2 = vpop.f32.mrf.mxu1 }
 0x22d   :  { %v311_v3 = vadd.f32 %v492_v2, %v244_v0 }
 0x22e   :  { %v302_v5 = vpop.f32.mrf.mxu1 }
 0x22f   :  { %v303_v6 = vadd.f32 %v302_v5, %v234_v4  ;;  %517 = vtanh.f32 %v311_v3 }
 0x230   :  { %v493_v7 = vpop.f32.mrf.mxu1 }
 0x231   :  { %v314_v8 = vadd.f32 %v493_v7, %v249_v1  ;;  %519 = vtanh.f32 %v303_v6 }
 0x232   :  { %v305_v10 = vpop.f32.mrf.mxu1 }
 0x233   :  { %521 = vtanh.f32 %v314_v8  ;;  %v306_v11 = vadd.f32 %v305_v10, %v239_v9 }
 0x235   :  { %523 = vtanh.f32 %v306_v11 }
 0x23c   :  { %v518_v12 = vpop.eup %517 }
 0x23d   :  { %v327_v15 = vmul.f32 %v518_v12, %v646_v33 }
 0x23e   :  { %v520_v13 = vpop.eup %519 }
 0x23f   :  { %v325_v19 = vmul.f32 %v520_v13, %v646_v33 }
 0x240   :  { %v522_v14 = vpop.eup %521 }
 0x241   :  { %v328_v16 = vmul.f32 %v522_v14, %v646_v33 }
 0x242   :  { %v524_v17 = vpop.eup %523 }
 0x243   :  { %v330_v18 = vpack.c.bf16 %v328_v16, %v327_v15  ;;  %v326_v20 = vmul.f32 %v524_v17, %v646_v33 }
 0x245   :  { %494 = vmatprep.subr.bf16.mxu1 %v330_v18  ;;  %v329_v21 = vpack.c.bf16 %v326_v20, %v325_v19 }
 0x246   :  { %495 = vmatpush3.bf16.msra.mxu1 %v330_v18 }
 0x247   :  { %496 = vmatprep.subr.bf16.mxu1 %v329_v21 }
 0x24a   :  { %497 = vmatpush3.bf16.msra.mxu1 %v329_v21 }
 0x24d   :  { %499 = vmatmul.mubr.msk.bf16.vlgmr.msra.gmra.mxu1 %vm118_vm0, %v508_v22 }
 0x30d   :  { %v500_v24 = vpop.f32.mrf.mxu1 }
 0x30e   :  { %v414_v25 = vadd.f32 %v500_v24, %v348_v23 }
 0x30f   :  { %v405_v26 = vpop.f32.mrf.mxu1 }
 0x310   :  { %v420_v27 = vmul.f32 1.442695, %v414_v25  ;;  %v434_v28 = vmul.f32 %v646_v33, %v414_v25  ;;  %v406_v40 = vadd.f32 %v405_v26, %v338_v39 }
 0x311   :  { %v501_v30 = vpop.f32.mrf.mxu1 }
 0x312   :  { %525 = vpow2.f32 %v420_v27  ;;  %436 = vst.msk [vmem:[%s734_s10] sm:$0xff] %vm261_vm1, %v434_v28  ;;  %v417_v31 = vadd.f32 %v501_v30, %v353_v29 }
 0x313   :  { %v408_v42 = vpop.f32.mrf.mxu1 }
 0x314   :  { %v422_v32 = vmul.f32 1.442695, %v417_v31  ;;  %v435_v34 = vmul.f32 %v646_v33, %v417_v31  ;;  %v409_v47 = vadd.f32 %v408_v42, %v343_v46 }
 0x316   :  { %527 = vpow2.f32 %v422_v32  ;;  %437 = vst.msk [vmem:[%s734_s10 + $0x8] sm:$0xff] %vm261_vm1, %v435_v34 }
 0x31f   :  { %v526_v38 = vpop.eup %525 }
 0x320   :  { %v424_v41 = vmul.f32 %v526_v38, %v218_v37 }
 0x322   :  { %v426_v44 = vadd.f32 %v424_v41, %v406_v40 }
 0x323   :  { %v528_v45 = vpop.eup %527 }
 0x324   :  { %v425_v48 = vmul.f32 %v528_v45, %v219_v43  ;;  %v428_v49 = vmul.f32 %v646_v33, %v426_v44 }
 0x326   :  { %v427_v50 = vadd.f32 %v425_v48, %v409_v47  ;;  %432 = vst.msk [vmem:[%s732_s9 + $0x10] sm:$0xff] %vm261_vm1, %v428_v49 }
 0x328   :  { %v429_v51 = vmul.f32 %v646_v33, %v427_v50 }
 0x32a   :  { %433 = vst.msk [vmem:[%s732_s9 + $0x18] sm:$0xff] %vm261_vm1, %v429_v51 }

// kernel: custom-call.25
= control target key start
LH: loop header
LB: loop body
LE: loop exit
PB: predicated region body
PF: predicated region fallthrough
CT: control target
= control target key end

     0   :  { %s6_s0 = inlined_call_operand.vmem [shape: f32[16,2,8], index: 0, kind: output, shape index: {}]  }

// kernel: custom-call.11
= control target key start
LH: loop header
LB: loop body
LE: loop exit
PB: predicated region body
PF: predicated region fallthrough
CT: control target
= control target key end

     0   :  { %s6_s0 = inlined_call_operand.vmem [shape: f32[2,8], index: 0, kind: output, shape index: {}]  }

// kernel: custom-call.24
= control target key start
LH: loop header
LB: loop body
LE: loop exit
PB: predicated region body
PF: predicated region fallthrough
CT: control target
= control target key end

     0   :  { %s6_s0 = inlined_call_operand.vmem [shape: f32[16,2,8], index: 0, kind: output, shape index: {}]  }

// kernel: tts_forward.14
= control target key start
LH: loop header
LB: loop body
LE: loop exit
PB: predicated region body
PF: predicated region fallthrough
CT: control target
= control target key end

     0   :  { %s529_s12 = smov 0   ;;  %s562_s0 = inlined_call_operand.vmem [shape: f32[2,8,16], index: 0, kind: input, shape index: {}]   ;;  %s563_s1 = inlined_call_operand.vmem [shape: f32[2,8,16], index: 1, kind: input, shape index: {}]   ;;  %s564_s2 = inlined_call_operand.vmem [shape: f32[2,16,16], index: 2, kind: input, shape index: {}]   ;;  %s565_s3 = inlined_call_operand.vmem [shape: f32[2,8,16], index: 3, kind: output, shape index: {}]  }
   0x1 LB: > { %s452_s13 = sadd.s32 4294967295, %s505_s12   ;;  %p456_p0 = scmp.ge.s32.totalorder %s505_s12, 1  ;;  %s505_s12 = sphi %s529_s12, %s13_s12  }
   0x2   : > { %p155_p1 = scmp.lt.s32.totalorder %s505_s12, 3 }
   0x4   : > { %p156_p2 = pnand %p456_p0, %p155_p1 }
   0x5   : > { %p186_p3 = scmp.lt.s32.totalorder (!%p156_p2), %s452_s13, 1 }
   0x6   : > { %159 = sbr.rel (%p156_p2) target bundleno = 235 (0xeb), region = 32 }
   0xb   : > { %v507_v0 = vmov 0.0   ;;  %s567_s13 = smov (!%p186_p3, %s452_s13), 1  ;;  %vm508_vm0 = vmmov 0   ;;  %vm211_vm1 = vcmask 130048  }
   0xc   : > { %480 = vmatprep.subr.mxu1 %v507_v0  ;;  %473 = vmatprep.subr.mxu0 %v507_v0  ;;  %s537_s14 = sshll.u32 %s567_s13, 3  ;;  %s466_s15 = sshll.u32 %s567_s13, 4 }
   0xd   : > { %484 = vmatprep.mubr.msk.f32.mxu1 %vm508_vm0, %v507_v0  ;;  %477 = vmatprep.mubr.msk.f32.mxu0 %vm508_vm0, %v507_v0  ;;  %s193_s18 = scalar_lea.vmem %s563_s1, %s537_s14  ;;  %s198_s21 = scalar_lea.vmem %s564_s2, %s466_s15 }
   0xe   : > { %v204_v1 = vld [vmem:[%s193_s18] sm:$0xff]  ;;  %v206_v3 = vld [vmem:[%s198_s21 + $0x8] sm:$0xff]  ;;  %s189_s24 = scalar_lea.vmem %s562_s0, %s537_s14  ;;  %s202_s27 = scalar_lea.vmem %s565_s3, %s537_s14 }
   0xf   : > { %v205_v2 = vld [vmem:[%s198_s21] sm:$0xff]  ;;  %v207_v4 = vmul.f32 -2.0, %v204_v1  ;;  %v222_v5 = vmul.f32 -0.5, %v206_v3  ;;  %474 = vmatpush3.msra.mxu0 %v206_v3  ;;  %v210_v7 = vsub.f32 -0.9189385, %v204_v1 }
  0x10   : > { %v221_v6 = vmul.f32 -0.5, %v205_v2  ;;  %475 = vmatprep.subr.mxu0 %v507_v0  ;;  %v203_v12 = vld [vmem:[%s189_s24] sm:$0xff] }
  0x11   : > { %v208_v8 = vmul.f32 1.442695, %v207_v4  ;;  %v224_v9 = vmul.f32 %v222_v5, %v206_v3  ;;  %476 = vmatpush3.msra.mxu0 %v205_v2  ;;  %v212_v11 = vsel %vm211_vm1, %v210_v7, 0.0  ;;  %v215_v13 = vmul.f32 -0.5, %v203_v12 }
  0x12   : > { %v223_v10 = vmul.f32 %v221_v6, %v205_v2  ;;  %213 = vadd.xlane.f32.xlu0 %v212_v11 }
  0x13   : > { %497 = vpow2.f32 %v208_v8  ;;  %481 = vmatpush3.msra.mxu1 %v224_v9  ;;  %v216_v14 = vmul.f32 %v215_v13, %v203_v12 }
  0x14   : > { %482 = vmatprep.subr.mxu1 %v507_v0 }
  0x15   : > { %483 = vmatpush3.msra.mxu1 %v223_v10 }
  0x20   : > { %v498_v15 = vpop.eup %497 }
  0x21   : > { %485 = vmatmul.mubr.msk.f32.vlgmr.msra.gmra.mxu1 %vm211_vm1, %v498_v15  ;;  %v225_v16 = vmul.f32 %v498_v15, %v203_v12  ;;  %v217_v17 = vmul.f32 %v498_v15, %v216_v14 }
  0x23   : > { %478 = vmatmul.mubr.msk.f32.vlgmr.msra.gmra.mxu0 %vm211_vm1, %v225_v16  ;;  %v218_v18 = vsel %vm211_vm1, %v217_v17, 0.0 }
  0x24   : > { %219 = vadd.xlane.f32.xlu0 %v218_v18 }
  0x9b   : > { %v214_v19 = vpop.xlane.xlu0 %213 }
  0xad   : > { %v220_v25 = vpop.xlane.xlu0 %219 }
  0xe1   : > { %v368_v20 = vpop.f32.mrf.mxu1 }
  0xe3   : > { %v295_v21 = vpop.f32.mrf.mxu0  ;;  %v486_v22 = vpop.f32.mrf.mxu1 }
  0xe4   : > { %v369_v23 = vadd.f32 %v368_v20, %v295_v21 }
  0xe5   : > { %v479_v24 = vpop.f32.mrf.mxu0 }
  0xe6   : > { %v372_v26 = vadd.f32 %v369_v23, %v214_v19 }
  0xe8   : > { %v373_v27 = vadd.f32 %v372_v26, %v220_v25 }
  0xea   : > { %374 = vst.msk [vmem:[%s202_s27] sm:$0xff] %vm211_vm1, %v373_v27 }
  0xeb PF: > { %s13_s12 = sadd.s32 1, %s505_s12  }
  0xec   : > { %p10_p4 = scmp.ge.s32.totalorder %s13_s12, 4  }
  0xee   :  { %12 = sbr.rel (!%p10_p4) target bundleno = 1 (0x1), region = 68 }

// kernel: custom-call.14
= control target key start
LH: loop header
LB: loop body
LE: loop exit
PB: predicated region body
PF: predicated region fallthrough
CT: control target
= control target key end

     0   :  { %5 = vsyncpa [#allocation4], 0  ;;  %s920_s0 = inlined_call_operand.vmem [shape: f32[32,32], index: 0, kind: input, shape index: {}]   ;;  %s921_s1 = inlined_call_operand.vmem [shape: f32[32,32], index: 1, kind: output, shape index: {0}]   ;;  %s922_s2 = inlined_call_operand.hbm [shape: s32[32], index: 2, kind: output, shape index: {1}]   ;;  %s923_s3 = inlined_call_operand.hbm [shape: s32[32], index: 3, kind: output, shape index: {2}]  }
   0x1   :  { %6 = vsyncpa [#allocation7], 0  ;;  %s20_s14 = scalar_lea.vmem %s920_s0, 24 }
   0x2   :  { %p469_p0 = scmp.gt.s32.totalorder %s920_s0, %s20_s14 }
   0x3   :  { %s764_s17 = smov (!%p469_p0), [#allocation0]   ;;  %s768_s20 = smov (!%p469_p0), %s920_s0  }
   0x4   :  { %470 = sbr.rel (%p469_p0) target bundleno = 17 (0x11), region = 136 }
   0x9 LB: > { %v54_v0 = vld [vmem:[%s770_s20] sm:$0xff]  ;;  %s56_s20 = scalar_lea.vmem %s770_s20, 8   ;;  %s770_s20 = sphi %s768_s20, %s56_s20   ;;  %s766_s17 = sphi %s764_s17, %s57_s17  }
   0xa   : > { %55 = vst [vmem:[%s766_s17] sm:$0xff] %v54_v0  ;;  %s57_s17 = scalar_lea.vmem %s766_s17, 8   ;;  %p51_p1 = scmp.gt.s32.totalorder %s56_s20, %s20_s14 }
   0xc   :  { %53 = sbr.rel (!%p51_p1) target bundleno = 9 (0x9), region = 142 }
  0x11 PF:  { %v70_v1 = vld [vmem:[#allocation0] sm:$0xff]  ;;  %v74_v2 = vld [vmem:[#allocation0 + $0x8] sm:$0xff]  ;;  %v78_v3 = vld [vmem:[#allocation0 + $0x10] sm:$0xff]  ;;  %v85_v4 = vlaneseq  ;;  %v788_v6 = vmov 0   ;;  %s772_s0 = smov 0  }
  0x12   :  { %71 = vst [vmem:[#allocation1] sm:$0xff] %v70_v1  ;;  %75 = vst [vmem:[#allocation1 + $0x8] sm:$0xff] %v74_v2  ;;  %v82_v5 = vld [vmem:[#allocation0 + $0x18] sm:$0xff] }
  0x13   :  { %79 = vst [vmem:[#allocation1 + $0x10] sm:$0xff] %v78_v3  ;;  %84 = vst [vmem:[#allocation2] sm:$0x1] %v788_v6  ;;  %v821_v7 = vshrl.u32 %v85_v4, 7 }
  0x14   :  { %83 = vst [vmem:[#allocation1 + $0x18] sm:$0xff] %v82_v5 }
  0x15 LB: > { %s507_s21 = sshll.u32 %s774_s0, 3  ;;  %s93_s0 = sadd.s32 1, %s774_s0   ;;  %s774_s0 = sphi %s772_s0, %s93_s0  }
  0x16   : > { %v97_v8 = vstv %s507_s21  ;;  %s95_s22 = scalar_lea.vmem [#allocation8], %s507_s21  ;;  %p90_p2 = scmp.ge.s32.totalorder %s93_s0, 4  }
  0x17   : > { %v98_v9 = vadd.s32 %v97_v8, %v821_v7  ;;  %s824_s23 = smov (%p90_p2), 0  }
  0x18   :  { %92 = sbr.rel (!%p90_p2) target bundleno = 21 (0x15), region = 153 }
  0x19   : > { %99 = vst [vmem:[%s95_s22] sm:$0xff] %v98_v9 }
  0x1d LB: > { %v110_v10 = vld [vmem:[#allocation1] sm:$0xff]  ;;  %v122_v11 = vld [vmem:[#allocation1 + $0x8] sm:$0xff]  ;;  %v830_v12 = vadd.s32 8, %v821_v7  ;;  %v833_v14 = vstv %s778_s23  ;;  %v134_v16 = vld [vmem:[#allocation1 + $0x10] sm:$0xff]  ;;  %v838_v17 = vadd.s32 16, %v821_v7  ;;  %v845_v22 = vadd.s32 24, %v821_v7  ;;  %s778_s23 = sphi %s824_s23, %s105_s23  }
  0x1e   : > { %v111_v13 = vand.u32 2147483647, %v110_v10  ;;  %v123_v15 = vand.u32 2147483647, %v122_v11  ;;  %vm114_vm0 = vcmp.ge.s32.totalorder %v821_v7, %v833_v14  ;;  %v135_v20 = vand.u32 2147483647, %v134_v16 }
  0x1f   : > { %vm126_vm3 = vcmp.ge.s32.totalorder %v830_v12, %v833_v14  ;;  %v146_v21 = vld [vmem:[#allocation1 + $0x18] sm:$0xff]  ;;  %vm138_vm6 = vcmp.ge.s32.totalorder %v838_v17, %v833_v14  ;;  %vm150_vm9 = vcmp.ge.s32.totalorder %v845_v22, %v833_v14  ;;  %s192_s24 = ssub.s32 128, %s778_s23  ;;  %v198_v58 = vand.u32 127, %v85_v4  ;;  %v201_v60 = vld [vmem:[#allocation2] ss:$0 sm:$0xff]  ;;  %s204_s25 = scalar_lea.vmem [#allocation1], %s778_s23 }
  0x20   : > { %vm509_vm1 = vcmp.gt.f32.partialorder %v111_v13, -inf  ;;  %v147_v25 = vand.u32 2147483647, %v146_v21  ;;  %v206_v61 = vld [vmem:[%s204_s25] ss:$0 sm:$0xff]  ;;  %s210_s27 = scalar_lea.vmem [#allocation8], %s778_s23 }
  0x21   : > { %vm118_vm2 = vmand %vm114_vm0, %vm509_vm1  ;;  %v212_v62 = vld [vmem:[%s210_s27] ss:$0 sm:$0xff]  ;;  %s105_s23 = sadd.s32 1, %s778_s23  }
  0x22   : > { %v119_v18 = vsel %vm118_vm2, %v821_v7, %v833_v14  ;;  %v120_v19 = vsel %vm118_vm2, %v111_v13, -inf  ;;  %p102_p3 = scmp.ge.s32.totalorder %s105_s23, 32  }
  0x23   : > { %vm129_vm4 = vcmp.lt.f32.partialorder %v120_v19, %v123_v15  ;;  %s780_s5 = smov (%p102_p3), %s921_s1   ;;  %s784_s6 = smov (%p102_p3), [#allocation1]  }
  0x24   : > { %vm130_vm5 = vmand %vm126_vm3, %vm129_vm4  ;;  %vm857_vm3 = vcmp.eq.s32.totalorder %v198_v58, %v833_v14 }
  0x25   : > { %v131_v23 = vsel %vm130_vm5, %v830_v12, %v119_v18  ;;  %v132_v24 = vsel %vm130_vm5, %v123_v15, %v120_v19  ;;  %vm245_vm5 = vcmp.gt.s32.totalorder %v830_v12, %v833_v14 }
  0x26   : > { %vm141_vm7 = vcmp.lt.f32.partialorder %v132_v24, %v135_v20 }
  0x27   : > { %vm142_vm8 = vmand %vm138_vm6, %vm141_vm7  ;;  %vm230_vm6 = vcmp.gt.s32.totalorder %v821_v7, %v833_v14  ;;  %vm260_vm7 = vcmp.gt.s32.totalorder %v838_v17, %v833_v14 }
  0x28   : > { %v143_v26 = vsel %vm142_vm8, %v838_v17, %v131_v23  ;;  %v144_v27 = vsel %vm142_vm8, %v135_v20, %v132_v24 }
  0x29   : > { %vm153_vm10 = vcmp.lt.f32.partialorder %v144_v27, %v147_v25 }
  0x2a   : > { %vm154_vm11 = vmand %vm150_vm9, %vm153_vm10  ;;  %vm275_vm9 = vcmp.gt.s32.totalorder %v845_v22, %v833_v14 }
  0x2b   : > { %v155_v28 = vsel %vm154_vm11, %v845_v22, %v143_v26  ;;  %v156_v29 = vsel %vm154_vm11, %v147_v25, %v144_v27  ;;  %vm249_vm10 = vmand %vm245_vm5, %vm857_vm3 }
  0x2c   : > { %v157_v30 = vrot.slane %v156_v29, 1  ;;  %v158_v31 = vrot.slane %v155_v28, 1  ;;  %vm234_vm11 = vmand %vm230_vm6, %vm857_vm3 }
  0x2e   : > { %vm159_vm12 = vcmp.ge.f32.partialorder %v157_v30, %v156_v29  ;;  %v162_v32 = vrot.slane %v157_v30, 1  ;;  %v163_v33 = vrot.slane %v158_v31, 1 }
  0x2f   : > { %v160_v34 = vsel %vm159_vm12, %v157_v30, %v156_v29  ;;  %v161_v35 = vsel %vm159_vm12, %v158_v31, %v155_v28  ;;  %vm264_vm12 = vmand %vm260_vm7, %vm857_vm3 }
  0x30   : > { %vm164_vm13 = vcmp.ge.f32.partialorder %v162_v32, %v160_v34  ;;  %v167_v36 = vrot.slane %v162_v32, 1  ;;  %v168_v37 = vrot.slane %v163_v33, 1 }
  0x31   : > { %v165_v38 = vsel %vm164_vm13, %v162_v32, %v160_v34  ;;  %v166_v39 = vsel %vm164_vm13, %v163_v33, %v161_v35  ;;  %vm279_vm13 = vmand %vm275_vm9, %vm857_vm3 }
  0x32   : > { %vm169_vm14 = vcmp.ge.f32.partialorder %v167_v36, %v165_v38  ;;  %v172_v40 = vrot.slane %v167_v36, 1  ;;  %v173_v41 = vrot.slane %v168_v37, 1 }
  0x33   : > { %v170_v42 = vsel %vm169_vm14, %v167_v36, %v165_v38  ;;  %v171_v43 = vsel %vm169_vm14, %v168_v37, %v166_v39  ;;  %vm222_vm14 = vcmp.gt.s32.totalorder %v198_v58, %v833_v14 }
  0x34   : > { %vm174_vm15 = vcmp.ge.f32.partialorder %v172_v40, %v170_v42  ;;  %v177_v44 = vrot.slane %v172_v40, 1  ;;  %v178_v45 = vrot.slane %v173_v41, 1 }
  0x35   : > { %v175_v46 = vsel %vm174_vm15, %v172_v40, %v170_v42  ;;  %v176_v47 = vsel %vm174_vm15, %v173_v41, %v171_v43 }
  0x36   : > { %vm179_vm0 = vcmp.ge.f32.partialorder %v177_v44, %v175_v46  ;;  %v182_v48 = vrot.slane %v177_v44, 1  ;;  %v183_v49 = vrot.slane %v178_v45, 1 }
  0x37   : > { %v180_v50 = vsel %vm179_vm0, %v177_v44, %v175_v46  ;;  %v181_v51 = vsel %vm179_vm0, %v178_v45, %v176_v47 }
  0x38   : > { %vm184_vm1 = vcmp.ge.f32.partialorder %v182_v48, %v180_v50  ;;  %v187_v52 = vrot.slane %v182_v48, 1  ;;  %v188_v53 = vrot.slane %v183_v49, 1 }
  0x39   : > { %v185_v54 = vsel %vm184_vm1, %v182_v48, %v180_v50  ;;  %v186_v55 = vsel %vm184_vm1, %v183_v49, %v181_v51 }
  0x3a   : > { %vm189_vm2 = vcmp.ge.f32.partialorder %v187_v52, %v185_v54 }
  0x3b   : > { %v191_v56 = vsel %vm189_vm2, %v188_v53, %v186_v55 }
  0x3c   : > { %193 = vrot.lane.b32.xlu0 %v191_v56, %s192_s24 }
  0xae   : > { %v194_v57 = vpop.permute.xlu0 %193 }
  0xaf   : > { %514 = vpush %v194_v57 }
  0xe0   : > { %s515_s26 = spop %514 }
  0xe1   : > { %v200_v63 = vstv %s515_s26  ;;  %s205_s28 = scalar_lea.vmem [#allocation1], %s515_s26  ;;  %s211_s29 = scalar_lea.vmem [#allocation8], %s515_s26 }
  0xe2   : > { %v202_v0 = vsel %vm857_vm3, %v200_v63, %v201_v60  ;;  %v207_v1 = vld [vmem:[%s205_s28] ss:$0 sm:$0xff] }
  0xe3   : > { %v213_v2 = vld [vmem:[%s211_s29] ss:$0 sm:$0xff]  ;;  %203 = vst [vmem:[#allocation2] sm:$0x1] %v202_v0  ;;  %208 = vst [vmem:[%s205_s28] sm:$0x1] %v206_v61  ;;  %vm216_vm4 = vcmp.ne.f32.partialorder %v207_v1, 0.0 }
  0xe4   : > { %214 = vst [vmem:[%s211_s29] sm:$0x1] %v212_v62  ;;  %209 = vst [vmem:[%s204_s25] sm:$0x1] %v207_v1  ;;  %v223_v29 = vsel %vm222_vm14, %v207_v1, 0.0 }
  0xe5   : > { %215 = vst [vmem:[%s210_s27] sm:$0x1] %v213_v2  ;;  %vm217_vm8 = vmand %vm857_vm3, %vm216_vm4 }
  0xe6   : > { %v218_v3 = vsel %vm217_vm8, %v207_v1, 1.0 }
  0xe7   : > { %v246_v5 = vsel %vm245_vm5, %v218_v3, 1.0  ;;  %v231_v6 = vsel %vm230_vm6, %v218_v3, 1.0  ;;  %v261_v8 = vsel %vm260_vm7, %v218_v3, 1.0  ;;  %v276_v9 = vsel %vm275_vm9, %v218_v3, 1.0 }
  0xe8   : > { %648 = vrcp.f32 %v246_v5 }
  0xe9   : > { %650 = vrcp.f32 %v231_v6 }
  0xea   : > { %652 = vrcp.f32 %v261_v8  ;;  %v342_v41 = vld [vmem:[#allocation2] sm:$0x1] (%p102_p3) }
  0xeb   : > { %654 = vrcp.f32 %v276_v9  ;;  %v242_v11 = vld [vmem:[#allocation1 + $0x8] sm:$0xff]  ;;  %v227_v16 = vld [vmem:[#allocation1] sm:$0xff]  ;;  %v257_v20 = vld [vmem:[#allocation1 + $0x10] sm:$0xff]  ;;  %345 = vst [vmem:[#allocation3] sm:$0x1] (%p102_p3), %v342_v41 }
  0xec   : > { %v272_v12 = vld [vmem:[#allocation1 + $0x18] sm:$0xff]  ;;  %v290_v42 = vld [vmem:[#allocation8 + $0x10] sm:$0xff] (%p102_p3)  ;;  %v292_v43 = vld [vmem:[#allocation8 + $0x18] sm:$0xff] (%p102_p3) }
  0xed   :  { %v286_v14 = vld [vmem:[#allocation8] sm:$0xff] (%p102_p3)  ;;  %v288_v40 = vld [vmem:[#allocation8 + $0x8] sm:$0xff] (%p102_p3) }
  0xf5   : > { %v649_v10 = vpop.eup %648 }
  0xf6   : > { %v651_v13 = vpop.eup %650  ;;  %v248_v15 = vmul.f32 %v649_v10, %v242_v11 }
  0xf7   : > { %v653_v18 = vpop.eup %652  ;;  %v233_v19 = vmul.f32 %v651_v13, %v227_v16 }
  0xf8   : > { %v250_v21 = vsel %vm249_vm10, %v248_v15, 0.0  ;;  %v263_v23 = vmul.f32 %v653_v18, %v257_v20  ;;  %v655_v24 = vpop.eup %654 }
  0xf9   : > { %251 = vadd.xlane.f32.xlu1 %v250_v21  ;;  %v235_v25 = vsel %vm234_vm11, %v233_v19, 0.0  ;;  %v278_v27 = vmul.f32 %v655_v24, %v272_v12 }
  0xfa   : > { %236 = vadd.xlane.f32.xlu0 %v235_v25  ;;  %v265_v26 = vsel %vm264_vm12, %v263_v23, 0.0 }
  0xfb   : > { %v280_v28 = vsel %vm279_vm13, %v278_v27, 0.0 }
  0xfd   : > { %266 = vadd.xlane.f32.xlu1 %v265_v26 }
 0x101   : > { %281 = vadd.xlane.f32.xlu1 %v280_v28 }
 0x127   :  { %305 = vxpose.xlu0.b32.start [1/4] (short) (narrow) (%p102_p3), %v286_v14, 8 }
 0x12b   :  { %306 = vxpose.xlu0.b32.cont [2/4] (short) (narrow) (%p102_p3), %v288_v40, 8 }
 0x12f   :  { %307 = vxpose.xlu0.b32.cont [3/4] (short) (narrow) (%p102_p3), %v290_v42, 8 }
 0x133   :  { %308 = vxpose.xlu0.b32.end [4/4] (short) (narrow) (%p102_p3), %v292_v43, 8 }
 0x182   : > { %v252_v30 = vpop.xlane.xlu1 %251 }
 0x183   : > { %v253_v31 = vmul.f32 %v252_v30, %v223_v29  ;;  %v237_v17 = vpop.xlane.xlu0 %236 }
 0x184   : > { %v238_v32 = vmul.f32 %v237_v17, %v223_v29 }
 0x185   : > { %v254_v33 = vsub.f32 %v248_v15, %v253_v31 }
 0x186   : > { %v239_v34 = vsub.f32 %v233_v19, %v238_v32  ;;  %v267_v35 = vpop.xlane.xlu1 %266 }
 0x187   : > { %255 = vst [vmem:[#allocation1 + $0x8] sm:$0xff] %v254_v33  ;;  %v268_v36 = vmul.f32 %v267_v35, %v223_v29 }
 0x188   : > { %240 = vst [vmem:[#allocation1] sm:$0xff] %v239_v34 }
 0x189   : > { %v269_v37 = vsub.f32 %v263_v23, %v268_v36 }
 0x18a   : > { %v282_v38 = vpop.xlane.xlu1 %281 }
 0x18b   : > { %270 = vst [vmem:[#allocation1 + $0x10] sm:$0xff] %v269_v37  ;;  %v283_v22 = vmul.f32 %v282_v38, %v223_v29 }
 0x18d   : > { %v284_v39 = vsub.f32 %v278_v27, %v283_v22 }
 0x18f   : > { %285 = vst [vmem:[#allocation1 + $0x18] sm:$0xff] %v284_v39 }
 0x190   :  { %104 = sbr.rel (!%p102_p3) target bundleno = 29 (0x1d), region = 164 }
 0x1a3   :  { %v321_v44 = vpop.trf.xlu0 }
 0x1a4   :  { %337 = vst [vmem:[#allocation5] sm:$0x1] %v321_v44 }
 0x1ab   :  { %v350_v45 = vld [vmem:[#allocation5] sm:$0x1] }
 0x1ac   :  { %353 = vst [vmem:[#allocation6] sm:$0x1] %v350_v45 }
 0x1ad LB: > { %v401_v4 = vld [vmem:[%s786_s6] sm:$0xff]  ;;  %s403_s6 = scalar_lea.vmem %s786_s6, 8   ;;  %s786_s6 = sphi %s784_s6, %s403_s6   ;;  %s782_s5 = sphi %s780_s5, %s404_s5  }
 0x1ae   : > { %402 = vst [vmem:[%s782_s5] sm:$0xff] %v401_v4  ;;  %s404_s5 = scalar_lea.vmem %s782_s5, 8   ;;  %p398_p4 = scmp.gt.s32.totalorder %s403_s6, [#allocation1 + $0x18] }
 0x1af   :  { %s789_s7 = smov (%p398_p4), [#allocation3]   ;;  %s790_s9 = smov (%p398_p4), [#allocation6]  }
 0x1b0   :  { %400 = sbr.rel (!%p398_p4) target bundleno = 429 (0x1ad), region = 186  ;;  %s422_s8 = sshll.u32 (%p398_p4), %s789_s7, 4  ;;  %s423_s8 = int_to_ptr.vmem [resolvable:$true] %s422_s8 }
 0x1b1   :  { %s431_s10 = sshll.u32 (%p398_p4), %s790_s9, 4  ;;  %s656_s1 = scalar_lea.vmem (%p398_p4), %s423_s8, 16  ;;  %s432_s10 = int_to_ptr.vmem [resolvable:$true] %s431_s10 }
 0x1b2   :  { %p657_p5 = scmp.ne.s32.totalorder (%p398_p4), %s423_s8, %s656_s1  ;;  %s660_s11 = scalar_lea.vmem (%p398_p4), %s423_s8, 32 }
 0x1b3   :  { %p661_p6 = scmp.lt.s32.totalorder (%p398_p4), %s423_s8, %s423_s8  ;;  %p662_p7 = scmp.lt.s32.totalorder (%p398_p4), %s660_s11, %s656_s1 }
 0x1b5   :  { %p663_p8 = por %p662_p7, %p661_p6 }
 0x1b7   :  { %p664_p9 = pnand %p663_p8, %p657_p5 }
 0x1b9   :  { %667 = shalt.err (!%p664_p9)
}
 0x1ba   :  { %425 = dma.vmem_to_hbm [thread:$0]  %s423_s8, 16, %s922_s2, [#allocation4]  }
 0x1bb   :  { %s676_s14 = scalar_lea.vmem %s432_s10, 16  ;;  %s680_s15 = scalar_lea.vmem %s432_s10, 32 }
 0x1bc   :  { %p677_p10 = scmp.ne.s32.totalorder %s432_s10, %s676_s14  ;;  %p681_p11 = scmp.lt.s32.totalorder %s432_s10, %s432_s10 }
 0x1bd   :  { %p682_p12 = scmp.lt.s32.totalorder %s680_s15, %s676_s14 }
 0x1bf   :  { %p683_p13 = por %p682_p12, %p681_p11 }
 0x1c1   :  { %p684_p0 = pnand %p683_p13, %p677_p10 }
 0x1c3   :  { %687 = shalt.err (!%p684_p0)
}
 0x1c4   :  { %434 = dma.vmem_to_hbm [thread:$0]  %s432_s10, 16, %s923_s3, [#allocation7]  }
 0x1c5   :  { %760 = dma.done.wait [#allocation4], 16  }
 0x1c6   :  { %761 = vsyncadd [#allocation4], 4294967280 }
 0x1c7   :  { %762 = dma.done.wait [#allocation7], 16  }
 0x1c8   :  { %763 = vsyncadd [#allocation7], 4294967280 }
 0x1c9   :  { %441 = vsyncpa [#allocation4], 1 }
 0x1ca   :  { %442 = vsyncpa [#allocation7], 1 }

// kernel: tts_forward.15
= control target key start
LH: loop header
LB: loop body
LE: loop exit
PB: predicated region body
PF: predicated region fallthrough
CT: control target
= control target key end

     0   :  { %10 = vsyncpa [#allocation3], 0  ;;  %s925_s0 = inlined_call_operand.vmem [shape: f32[2,16,8], index: 0, kind: input, shape index: {}]   ;;  %s926_s1 = inlined_call_operand.vmem [shape: f32[2,16,8], index: 1, kind: input, shape index: {}]   ;;  %s927_s2 = inlined_call_operand.vmem [shape: f32[2,8,16], index: 2, kind: input, shape index: {}]   ;;  %s928_s3 = inlined_call_operand.hbm [shape: f32[2,16,16], index: 3, kind: output, shape index: {0}]   ;;  %s929_s4 = inlined_call_operand.hbm [shape: f32[2,16,16], index: 4, kind: output, shape index: {1}]  }
   0x1   :  { %12 = vsyncpa [#allocation3 + $0x1], 0 }
   0x2   :  { %13 = vsyncpa [#allocation5], 0 }
   0x3   :  { %15 = vsyncpa [#allocation5 + $0x1], 0  ;;  %s780_s15 = smov 0   ;;  %s782_s16 = smov 0  }
   0x4   :  { %s784_s17 = smov 0   ;;  %s786_s18 = smov 0  }
   0x5 LB: > { %s801_s19 = sadd.s32 4294967295, %s749_s18   ;;  %s570_s20 = sadd.s32 4294967294, %s749_s18   ;;  %s749_s18 = sphi %s786_s18, %s935_s18   ;;  %s745_s17 = sphi %s784_s17, %s934_s17   ;;  %s741_s16 = sphi %s782_s16, %s933_s16   ;;  %s737_s15 = sphi %s780_s15, %s932_s15  }
   0x6   : > { %s805_s21 = sadd.s32 1, %s749_s18   ;;  %s106_s22 = sadd.s32 1, %s745_s17 }
   0x7   : > { %s103_s23 = ssub.s32 %s749_s18, %s805_s21  ;;  %p116_p0 = scmp.ne.s32.totalorder %s745_s17, %s741_s16 }
   0x8   : > { %p104_p1 = scmp.eq.s32.totalorder %s103_s23, 0  ;;  %p117_p2 = scmp.eq.s32.totalorder %s801_s19, 1 }
   0x9   : > { %p122_p3 = scmp.ne.s32.totalorder %s741_s16, %s737_s15  ;;  %p123_p4 = scmp.eq.s32.totalorder %s570_s20, 1 }
   0xa   : > { %s816_s24 = scalar_select %p104_p1, %s745_s17, %s106_s22  }
   0xb   : > { %p818_p5 = por %p117_p2, %p116_p0  ;;  %p822_p6 = por %p123_p4, %p122_p3 }
   0xc   : > { %p573_p7 = scmp.ge.s32.totalorder %s749_s18, 1  ;;  %p190_p8 = scmp.lt.s32.totalorder %s749_s18, 3 }
   0xe   : > { %p191_p9 = pnand %p573_p7, %p190_p8 }
   0xf   : > { %p230_p10 = scmp.lt.s32.totalorder (!%p191_p9), %s801_s19, 1  ;;  %s840_s13 = sand.u32 (!%p191_p9), 1, %s741_s16  }
  0x10   : > { %194 = sbr.rel (%p191_p9) target bundleno = 260 (0x104), region = 32  ;;  %s574_s14 = sshll.u32 (!%p191_p9), %s840_s13, 4 }
  0x11   : > { %s222_s20 = scalar_lea.vmem (!%p191_p9), [#allocation2], %s574_s14  ;;  %s595_s23 = sshll.u32 (!%p191_p9), %s801_s19, 8 }
  0x12   : > { %s436_s22 = sshll.u32 (!%p191_p9), %s222_s20, 4  ;;  %s849_s5 = scalar_lea.hbm (!%p191_p9), %s928_s3, %s595_s23  ;;  %s844_s22 = int_to_ptr.vmem [resolvable:$true] %s436_s22 }
  0x13   : > { %s856_s7 = scalar_lea.hbm (!%p191_p9), %s929_s4, %s595_s23  ;;  %s418_s8 = scalar_lea.sflag (!%p191_p9), [#allocation3], %s840_s13 }
  0x14   : > { %s751_s10 = smov (!%p191_p9), [#allocation2]  }
  0x15   : > { %s231_s27 = scalar_select %p230_p10, %s801_s19, 1  ;;  %vm247_vm0 = vcmask 64512   ;;  %vm329_vm1 = vcmask 130048  }
  0x16   : > { %s663_s11 = sshll.u32 %s751_s10, 4  ;;  %s664_s11 = int_to_ptr.vmem [resolvable:$false] %s663_s11 }
  0x17   : > { %s580_s28 = sshll.u32 %s231_s27, 3  ;;  %s593_s29 = sshll.u32 %s231_s27, 4 }
  0x18   : > { %s243_s6 = scalar_lea.vmem %s927_s2, %s580_s28  ;;  %s234_s9 = scalar_lea.vmem %s925_s0, %s593_s29 }
  0x19   : > { %v244_v0 = vld [vmem:[%s243_s6] sm:$0xff]  ;;  %s239_s12 = scalar_lea.vmem %s926_s1, %s593_s29  ;;  %v246_v2 = vld [vmem:[%s234_s9 + $0x8] sm:$0xff]  ;;  %s229_s27 = scalar_lea.vmem [#allocation4], %s574_s14 }
  0x1a   : > { %v245_v1 = vld [vmem:[%s234_s9] sm:$0xff]  ;;  %603 = vmatprep.subr.mxu0 %v244_v0  ;;  %608 = vmatprep.subr.mxu1 %v244_v0  ;;  %v333_v4 = vld [vmem:[%s239_s12 + $0x8] sm:$0xff]  ;;  %s452_s28 = sshll.u32 %s229_s27, 4  ;;  %s659_s9 = scalar_lea.vmem %s844_s22, 256  ;;  %s851_s28 = int_to_ptr.vmem [resolvable:$true] %s452_s28 }
  0x1b   : > { %v332_v3 = vld [vmem:[%s239_s12] sm:$0xff]  ;;  %604 = vmatpush3.msra.mxu0 %v244_v0  ;;  %605 = vmatprep.mubr.msk.f32.mxu0 %vm247_vm0, %v245_v1  ;;  %p660_p11 = scmp.ne.s32.totalorder %s844_s22, %s659_s9  ;;  %s665_s12 = scalar_lea.vmem %s664_s11, 512 }
  0x1c   : > { %609 = vmatpush3.msra.mxu1 %v244_v0  ;;  %610 = vmatprep.mubr.msk.f32.mxu1 %vm247_vm0, %v332_v3  ;;  %p666_p0 = scmp.lt.s32.totalorder %s844_s22, %s664_s11  ;;  %p667_p1 = scmp.lt.s32.totalorder %s665_s12, %s659_s9 }
  0x1d   : > { %606 = vmatmul.mubr.msk.f32.vlgmr.msra.gmra.mxu0 %vm247_vm0, %v246_v2  ;;  %611 = vmatmul.mubr.msk.f32.vlgmr.msra.gmra.mxu1 %vm247_vm0, %v333_v4  ;;  %p661_p12 = pnand %p660_p11, %p818_p5 }
  0x1e   : > { %p668_p2 = por %p667_p1, %p666_p0 }
  0x1f   : > { %p662_p13 = pneg %p661_p12 }
  0x21   : > { %p669_p3 = pnand %p668_p2, %p662_p13 }
  0xdd   : > { %v607_v5 = vpop.f32.mrf.mxu0  ;;  %v612_v6 = vpop.f32.mrf.mxu1 }
  0xde   : > { %331 = vst.msk [vmem:[%s222_s20 + $0x8] sm:$0xff] %vm329_vm1, %v607_v5  ;;  %416 = vst.msk [vmem:[%s229_s27 + $0x8] sm:$0xff] %vm329_vm1, %v612_v6 }
  0xdf   : > { %v320_v7 = vpop.f32.mrf.mxu0  ;;  %v406_v8 = vpop.f32.mrf.mxu1 }
  0xe0   : > { %330 = vst.msk [vmem:[%s222_s20] sm:$0xff] %vm329_vm1, %v320_v7  ;;  %415 = vst.msk [vmem:[%s229_s27] sm:$0xff] %vm329_vm1, %v406_v8 }
  0xe1   : > { %672 = shalt.err (!%p669_p3)
}
  0xe2   : > { %s673_s14 = scalar_lea.hbm %s849_s5, 256  ;;  %s677_s27 = scalar_lea.hbm %s928_s3, 512 }
  0xe3   : > { %p674_p4 = scmp.ne.s32.totalorder %s849_s5, %s673_s14  ;;  %p678_p9 = scmp.lt.s32.totalorder %s849_s5, %s928_s3 }
  0xe4   : > { %p679_p10 = scmp.lt.s32.totalorder %s677_s27, %s673_s14 }
  0xe5   : > { %p675_p7 = pnand %p674_p4, %p818_p5 }
  0xe6   : > { %p680_p11 = por %p679_p10, %p678_p9 }
  0xe7   : > { %p676_p8 = pneg %p675_p7 }
  0xe9   : > { %p681_p12 = pnand %p680_p11, %p676_p8 }
  0xeb   : > { %684 = shalt.err (!%p681_p12)
}
  0xec   : > { %s752_s19 = smov 128   ;;  %s753_s6 = smov 8  }
  0xed   : > { %613 = dma.vmem_to_hbm [thread:$0]  (%p818_p5), %s844_s22, 256, %s849_s5, %s418_s8, %s752_s19, %s752_s19, %s753_s6  }
  0xee   : > { %s423_s9 = scalar_lea.sflag [#allocation5], %s840_s13  ;;  %s685_s10 = scalar_lea.vmem %s851_s28, 256 }
  0xef   : > { %p686_p13 = scmp.ne.s32.totalorder %s851_s28, %s685_s10  ;;  %s754_s11 = smov [#allocation4]  }
  0xf0   : > { %s689_s12 = sshll.u32 %s754_s11, 4  ;;  %s690_s12 = int_to_ptr.vmem [resolvable:$false] %s689_s12 }
  0xf1   : > { %p687_p0 = pnand %p686_p13, %p818_p5  ;;  %s691_s14 = scalar_lea.vmem %s690_s12, 512 }
  0xf2   : > { %p692_p2 = scmp.lt.s32.totalorder %s851_s28, %s690_s12  ;;  %p693_p3 = scmp.lt.s32.totalorder %s691_s14, %s685_s10 }
  0xf3   : > { %p688_p1 = pneg %p687_p0 }
  0xf4   : > { %p694_p4 = por %p693_p3, %p692_p2 }
  0xf6   : > { %p695_p7 = pnand %p694_p4, %p688_p1 }
  0xf8   : > { %698 = shalt.err (!%p695_p7)
}
  0xf9   : > { %s699_s22 = scalar_lea.hbm %s856_s7, 256  ;;  %s703_s8 = scalar_lea.hbm %s929_s4, 512 }
  0xfa   : > { %p700_p8 = scmp.ne.s32.totalorder %s856_s7, %s699_s22  ;;  %p704_p11 = scmp.lt.s32.totalorder %s856_s7, %s929_s4 }
  0xfb   : > { %p705_p12 = scmp.lt.s32.totalorder %s703_s8, %s699_s22 }
  0xfc   : > { %p701_p9 = pnand %p700_p8, %p818_p5 }
  0xfd   : > { %p706_p13 = por %p705_p12, %p704_p11 }
  0xfe   : > { %p702_p10 = pneg %p701_p9 }
 0x100   : > { %p707_p0 = pnand %p706_p13, %p702_p10 }
 0x102   : > { %710 = shalt.err (!%p707_p0)
}
 0x103   : > { %614 = dma.vmem_to_hbm [thread:$0]  (%p818_p5), %s851_s28, 256, %s856_s7, %s423_s9, %s752_s19, %s752_s19, %s753_s6  }
 0x104 PF: > { %p624_p1 = scmp.ge.s32.totalorder %s749_s18, 2  ;;  %s467_s27 = sand.u32 1, %s737_s15  }
 0x105   : > { %s468_s29 = scalar_lea.sflag [#allocation3], %s467_s27 }
 0x106   : > { %p618_p2 = pnand %p624_p1, %p822_p6 }
 0x108   : > { %p619_p3 = pneg %p618_p2 }
 0x10a   : > { %728 = dma.done.wait (%p619_p3), %s468_s29, 256  }
 0x10b   : > { %730 = vsyncadd (%p619_p3), %s468_s29, 4294967040  ;;  %s477_s30 = scalar_lea.sflag [#allocation5], %s467_s27 }
 0x10c   : > { %732 = dma.done.wait (%p619_p3), %s477_s30, 256  }
 0x10d   : > { %734 = vsyncadd (%p619_p3), %s477_s30, 4294967040  ;;  %p18_p5 = scmp.ge.s32.totalorder %s805_s21, 4   ;;  %s932_s15 = smov %s741_s16 }
 0x10e   : > { %s933_s16 = smov %s745_s17  ;;  %s934_s17 = smov %s816_s24 }
 0x10f   : > { %s935_s18 = smov %s805_s21  ;;  %20 = sbr.rel (!%p18_p5) target bundleno = 5 (0x5), region = 90 }
 0x114   :  { %482 = vsyncpa [#allocation3], 1 }
 0x115   :  { %484 = vsyncpa [#allocation3 + $0x1], 1 }
 0x116   :  { %485 = vsyncpa [#allocation5], 1 }
 0x117   :  { %487 = vsyncpa [#allocation5 + $0x1], 1 }

</bundles_post_ra>
